<compile_context>
chip_gen: v7x
topology: tpu7x:2x2x1
jax: 0.10.0
libtpu: 0.0.40
codegen_flags: <defaults>
</compile_context>

<pallas_src>
import functools

import jax
import jax.numpy as jnp
from jax.experimental import pallas as pl
from jax.experimental.pallas import tpu as pltpu

_QUAD = ((0, 0), (0, 1), (1, 0), (1, 1))
_OFF3 = tuple((i, j) for i in range(3) for j in range(3))
_VMEM_LIMIT = 32 * 1024 * 1024


def _batch_block(n: int, cap: int = 8) -> int:
    """Largest divisor of n <= min(cap, n//2): >=2 grid blocks whenever n >= 2."""
    target = max(1, min(cap, n // 2 if n >= 2 else 1))
    for d in range(target, 0, -1):
        if n % d == 0:
            return d
    return 1


def _shift2(v, s1, s2):
    """result[:, i, j, :] = v[:, i+s1, j+s2, :] (wrap-around; wrapped rows are padding)."""
    if s1:
        v = jnp.concatenate([v[:, s1:, :, :], v[:, :s1, :, :]], axis=1)
    if s2:
        v = jnp.concatenate([v[:, :, s2:, :], v[:, :, :s2, :]], axis=2)
    return v


def _sum_shifted_matmuls(x, w, offsets):
    """sum_k shift(x, offsets[k]) @ w[k].

    x: (b, H, W, K) bf16, w: (len(offsets), K, OC) bf16 -> (b*H*W, OC) f32.
    """
    b, hh, ww, kc = x.shape
    rows = b * hh * ww
    acc = None
    for k, (di, dj) in enumerate(offsets):
        v = _shift2(x, di, dj).reshape(rows, kc)
        d = jnp.dot(v, w[k], preferred_element_type=jnp.float32)
        acc = d if acc is None else acc + d
    return acc


# ----------------------------------------------------------------------------
# Conv1 kernel: 8x8 / stride-4 conv on a factor-4 space-to-depth input
# ----------------------------------------------------------------------------
def _conv1_kernel(x_ref, w_ref, b_ref, o_ref):
    bb, hp, wp, _ = x_ref.shape            # (bb, 16, 16, 16*C)
    oc = o_ref.shape[-1]
    x = x_ref[...]
    w = w_ref[...]
    y = jnp.maximum(_sum_shifted_matmuls(x, w, _QUAD) + b_ref[...], 0.0)
    # valid output positions are 0..14; row/col 15 is wrap-around padding.
    o_ref[...] = y.reshape(bb, hp, wp, oc).astype(o_ref.dtype)


def pallas_conv1(x4, w1q, b1, *, bb):
    B, hp, wp, kc = x4.shape
    oc = w1q.shape[-1]
    return pl.pallas_call(
        _conv1_kernel,
        out_shape=jax.ShapeDtypeStruct((B, hp, wp, oc), jnp.bfloat16),
        grid_spec=pltpu.PrefetchScalarGridSpec(
            num_scalar_prefetch=0,
            grid=(B // bb,),
            in_specs=[
                pl.BlockSpec((bb, hp, wp, kc), lambda m: (m, 0, 0, 0)),
                pl.BlockSpec(w1q.shape, lambda m: (0, 0, 0)),   # resident
                pl.BlockSpec(b1.shape, lambda m: (0, 0)),       # resident
            ],
            out_specs=pl.BlockSpec((bb, hp, wp, oc), lambda m: (m, 0, 0, 0)),
        ),
        compiler_params=pltpu.CompilerParams(
            dimension_semantics=("parallel",),
            vmem_limit_bytes=_VMEM_LIMIT,
        ),
    )(x4, w1q, b1)


# ----------------------------------------------------------------------------
# Fused tail kernel: conv2 + conv3 + FC + heads + Categorical
# ----------------------------------------------------------------------------
def _tail_kernel(h2_ref, w2_ref, b2_ref, w3_ref, b3_ref, wfc_ref, bfc_ref,
                 wh_ref, bh_ref, gum_ref, out_ref, *, action_dim):
    bt = h2_ref.shape[0]

    # --- conv2: 4x4 / stride-2 as 2x2 quadrants on the space-to-depth input ---
    h2 = h2_ref[...]                                    # (bt, 8, 8, 4*32) bf16
    oc2 = w2_ref.shape[-1]
    h3 = jnp.maximum(_sum_shifted_matmuls(h2, w2_ref[...], _QUAD) + b2_ref[...], 0.0)
    h3 = h3.astype(jnp.bfloat16).reshape(bt, 8, 8, oc2)  # valid spatial 0..5

    # --- conv3: 3x3 / stride-1 as 9 shifted matmuls ----------------------------
    oc3 = w3_ref.shape[-1]
    y3 = jnp.maximum(_sum_shifted_matmuls(h3, w3_ref[...], _OFF3) + b3_ref[...], 0.0)
    y3 = y3.astype(jnp.bfloat16).reshape(bt, 8, 8, oc3)  # valid spatial 0..3

    # --- flatten the valid 4x4 window lane-major; FC + fused actor/critic -----
    feat_in = jnp.concatenate(
        [y3[:, p, q, :] for p in range(4) for q in range(4)], axis=-1)  # (bt, 1024)
    feat = jnp.dot(feat_in, wfc_ref[...], preferred_element_type=jnp.float32) + bfc_ref[...]
    feat = jnp.maximum(feat, 0.0).astype(jnp.bfloat16)
    ho = jnp.dot(feat, wh_ref[...], preferred_element_type=jnp.float32) + bh_ref[...]
    logits = ho[:, :action_dim]
    value = ho[:, action_dim:action_dim + 1]

    # --- log-softmax / softmax (f32, exact reciprocal for entropy) ------------
    m = jnp.max(logits, axis=-1, keepdims=True)
    z = logits - m
    ez = jnp.exp(z)
    s = jnp.sum(ez, axis=-1, keepdims=True)
    log_softmax = z - jnp.log(s)
    probs = ez / s
    entropy = -jnp.sum(probs * log_softmax, axis=-1, keepdims=True)

    # --- Gumbel-max categorical sample + its log-prob --------------------------
    gum = gum_ref[...].reshape(bt, action_dim)
    perturbed = logits + gum
    pmax = jnp.max(perturbed, axis=-1, keepdims=True)
    ids = jax.lax.broadcasted_iota(jnp.int32, perturbed.shape, 1)
    cand = jnp.where(perturbed >= pmax, ids, jnp.int32(action_dim))
    action = jnp.min(cand, axis=-1, keepdims=True)       # (bt, 1) int32
    logprob = jnp.sum(jnp.where(ids == action, log_softmax, 0.0),
                      axis=-1, keepdims=True)

    # --- pack the four per-env scalars into one lane-dense store ---------------
    col = jax.lax.broadcasted_iota(jnp.int32, (bt, 8), 1)
    packed = (jnp.where(col == 0, action.astype(jnp.float32), 0.0)
              + jnp.where(col == 1, logprob, 0.0)
              + jnp.where(col == 2, entropy, 0.0)
              + jnp.where(col == 3, value, 0.0))
    out_ref[...] = packed[:, None, :]


def pallas_tail(h2, w2q, b2, w3q, b3, wfc, bfc, wh, bh, gumbel, *, bt, action_dim):
    B = h2.shape[0]
    return pl.pallas_call(
        functools.partial(_tail_kernel, action_dim=action_dim),
        out_shape=jax.ShapeDtypeStruct((B, 1, 8), jnp.float32),
        grid_spec=pltpu.PrefetchScalarGridSpec(
            num_scalar_prefetch=0,
            grid=(B // bt,),
            in_specs=[
                pl.BlockSpec((bt,) + h2.shape[1:], lambda m: (m, 0, 0, 0)),
                pl.BlockSpec(w2q.shape, lambda m: (0, 0, 0)),
                pl.BlockSpec(b2.shape, lambda m: (0, 0)),
                pl.BlockSpec(w3q.shape, lambda m: (0, 0, 0)),
                pl.BlockSpec(b3.shape, lambda m: (0, 0)),
                pl.BlockSpec(wfc.shape, lambda m: (0, 0)),
                pl.BlockSpec(bfc.shape, lambda m: (0, 0)),
                pl.BlockSpec(wh.shape, lambda m: (0, 0)),
                pl.BlockSpec(bh.shape, lambda m: (0, 0)),
                pl.BlockSpec((bt, 1, action_dim), lambda m: (m, 0, 0)),
            ],
            out_specs=pl.BlockSpec((bt, 1, 8), lambda m: (m, 0, 0)),
        ),
        compiler_params=pltpu.CompilerParams(
            dimension_semantics=("parallel",),
            vmem_limit_bytes=_VMEM_LIMIT,
        ),
    )(h2, w2q, b2, w3q, b3, wfc, bfc, wh, bh, gumbel)


# ----------------------------------------------------------------------------
# Parameters (PyTorch layout) and kernel-layout preparation
# ----------------------------------------------------------------------------
def init_params(key, in_channels, features_dim, action_dim):
    """PyTorch-layout parameters (uniform fan-in init, PRNGKey-seeded)."""
    def unif(k, shape, fan_in):
        bound = 1.0 / jnp.sqrt(jnp.float32(fan_in))
        return jax.random.uniform(k, shape, jnp.float32, -bound, bound)

    ks = jax.random.split(key, 12)
    return {
        "c1_w": unif(ks[0], (32, in_channels, 8, 8), in_channels * 64),
        "c1_b": unif(ks[1], (32,), in_channels * 64),
        "c2_w": unif(ks[2], (64, 32, 4, 4), 32 * 16),
        "c2_b": unif(ks[3], (64,), 32 * 16),
        "c3_w": unif(ks[4], (64, 64, 3, 3), 64 * 9),
        "c3_b": unif(ks[5], (64,), 64 * 9),
        "fc_w": unif(ks[6], (1024, features_dim), 1024),     # (in [C,H,W order], out)
        "fc_b": unif(ks[7], (features_dim,), 1024),
        "a_w": unif(ks[8], (features_dim, action_dim), features_dim),
        "a_b": unif(ks[9], (action_dim,), features_dim),
        "c_w": unif(ks[10], (features_dim, 1), features_dim),
        "c_b": unif(ks[11], (1,), features_dim),
    }


def prepare_params(params):
    """PyTorch layouts -> kernel layouts (bf16 matmul weights, quadrant/offset blocks)."""
    def quad_conv(w, s):
        # (OC, Cin, 2s, 2s) -> (4, s*s*Cin, OC): quadrant (di,dj), rows (i,j,c)-ordered
        oc, cin, _, _ = w.shape
        w = w.reshape(oc, cin, 2, s, 2, s).transpose(2, 4, 3, 5, 1, 0)
        return w.reshape(4, s * s * cin, oc).astype(jnp.bfloat16)

    def full_conv(w):
        # (OC, Cin, KH, KW) -> (KH*KW, Cin, OC)
        oc, cin, kh, kw = w.shape
        return w.transpose(2, 3, 1, 0).reshape(kh * kw, cin, oc).astype(jnp.bfloat16)

    oc3 = params["c3_w"].shape[0]                 # conv3 out channels (64)
    feat_dim = params["fc_w"].shape[1]
    # torch flatten order is (C, H, W): re-order rows to our (p, q, c) order.
    fc_w = (params["fc_w"].reshape(oc3, 4, 4, feat_dim).transpose(1, 2, 0, 3)
            .reshape(oc3 * 16, feat_dim).astype(jnp.bfloat16))

    return {
        "c1_wq": quad_conv(params["c1_w"], 4), "c1_b": params["c1_b"].reshape(1, -1),
        "c2_wq": quad_conv(params["c2_w"], 2), "c2_b": params["c2_b"].reshape(1, -1),
        "c3_wk": full_conv(params["c3_w"]),    "c3_b": params["c3_b"].reshape(1, -1),
        "fc_w": fc_w, "fc_b": params["fc_b"].reshape(1, -1),
        "head_w": jnp.concatenate([params["a_w"], params["c_w"]], axis=1).astype(jnp.bfloat16),
        "head_b": jnp.concatenate([params["a_b"], params["c_b"]], axis=0).reshape(1, -1),
    }


# ----------------------------------------------------------------------------
# Forward pass (reproduces PPOAtariAgent.forward(obs, action=None))
# ----------------------------------------------------------------------------
def ppo_atari_forward(prepared, obs, sample_key):
    """obs: (B, C, 64, 64) f32 NCHW.  Returns action, log_prob, entropy, value (all (B,1))."""
    B, C = obs.shape[0], obs.shape[1]
    # NCHW f32 -> bf16 factor-4 space-to-depth layout (B,16,16,16C); one fused
    # XLA copy, no data expansion, halves the biggest layout's HBM traffic.
    x4 = (obs.astype(jnp.bfloat16)
          .reshape(B, C, 16, 4, 16, 4)
          .transpose(0, 2, 4, 3, 5, 1)
          .reshape(B, 16, 16, 16 * C))

    bb = _batch_block(B)
    h1 = pallas_conv1(x4, prepared["c1_wq"], prepared["c1_b"], bb=bb)   # (B,16,16,32)

    # Stride-2 space-to-depth of the tiny conv1 output so the fused tail kernel
    # only needs unit-stride window shifts for conv2/conv3.
    oc1 = h1.shape[-1]
    h2 = (h1.reshape(B, 8, 2, 8, 2, oc1)
          .transpose(0, 1, 3, 2, 4, 5)
          .reshape(B, 8, 8, 4 * oc1))

    action_dim = prepared["head_w"].shape[1] - 1
    # TODO(synk): torch.distributions RNG stream is not reproduced; Gumbel-max
    # sampling below is distributionally equivalent to Categorical.sample.
    gumbel = jax.random.gumbel(sample_key, (B, 1, action_dim), jnp.float32)

    bt = _batch_block(B)
    packed = pallas_tail(h2, prepared["c2_wq"], prepared["c2_b"],
                         prepared["c3_wk"], prepared["c3_b"],
                         prepared["fc_w"], prepared["fc_b"],
                         prepared["head_w"], prepared["head_b"],
                         gumbel, bt=bt, action_dim=action_dim)[:, 0, :]

    action = packed[:, 0:1].astype(jnp.int32)
    log_prob = packed[:, 1:2]
    entropy = packed[:, 2:3]
    value = packed[:, 3:4]
    return action, log_prob, entropy, value


# ----------------------------------------------------------------------------
# Pure-JAX f32 reference (for a loose-tolerance sanity check)
# ----------------------------------------------------------------------------
def reference_forward(params, obs, action):
    prec = jax.lax.Precision.HIGHEST

    def conv(x, w, b, stride):
        y = jax.lax.conv_general_dilated(
            x, w, window_strides=(stride, stride), padding="VALID",
            dimension_numbers=("NCHW", "OIHW", "NCHW"), precision=prec)
        return jax.nn.relu(y + b[None, :, None, None])

    h = conv(obs, params["c1_w"], params["c1_b"], 4)
    h = conv(h, params["c2_w"], params["c2_b"], 2)
    h = conv(h, params["c3_w"], params["c3_b"], 1)
    feat = h.reshape(h.shape[0], -1)                     # torch flatten: (C, H, W)
    feat = jax.nn.relu(jnp.dot(feat, params["fc_w"], precision=prec) + params["fc_b"])
    logits = jnp.dot(feat, params["a_w"], precision=prec) + params["a_b"]
    value = jnp.dot(feat, params["c_w"], precision=prec) + params["c_b"]
    logp = jax.nn.log_softmax(logits, axis=-1)
    probs = jax.nn.softmax(logits, axis=-1)
    entropy = -jnp.sum(probs * logp, axis=-1, keepdims=True)
    log_prob = jnp.take_along_axis(logp, action, axis=-1)
    return log_prob, entropy, value


if __name__ == "__main__":
    B, C, H, W = 2, 4, 64, 64        # NatureCNN stride math requires screen_size=64
    FEATURES_DIM = 64
    ACTION_DIM = 6

    root = jax.random.PRNGKey(0)
    k_params, k_obs, k_sample = jax.random.split(root, 3)

    params = init_params(k_params, C, FEATURES_DIM, ACTION_DIM)
    prepared = prepare_params(params)
    obs = jax.random.uniform(k_obs, (B, C, H, W), jnp.float32)

    fwd = jax.jit(ppo_atari_forward)
    action, log_prob, entropy, value = fwd(prepared, obs, k_sample)
    jax.block_until_ready((action, log_prob, entropy, value))

    assert action.shape == (B, 1) and action.dtype == jnp.int32
    assert log_prob.shape == (B, 1) and entropy.shape == (B, 1) and value.shape == (B, 1)
    assert bool(jnp.all((action >= 0) & (action < ACTION_DIM)))
    assert bool(jnp.all(jnp.isfinite(log_prob)))
    assert bool(jnp.all(jnp.isfinite(entropy)))
    assert bool(jnp.all(jnp.isfinite(value)))

    # f32 reference on the same params/obs; loose tolerance for the bf16 MXU path.
    lp_ref, ent_ref, val_ref = reference_forward(params, obs, action)
    assert bool(jnp.allclose(log_prob, lp_ref, atol=1e-1)), "log_prob mismatch vs f32 reference"
    assert bool(jnp.allclose(entropy, ent_ref, atol=1e-1)), "entropy mismatch vs f32 reference"
    assert bool(jnp.allclose(value, val_ref, atol=1e-1)), "value mismatch vs f32 reference"
    print("KERNEL_OK")
</pallas_src>

<mosaic_0001>
module attributes {stable_mosaic.version = 11 : i64} {
  func.func @_conv1_kernel(%arg0: i32, %arg1: memref<1x16x16x64xbf16, #tpu.memory_space<vmem>>, %arg2: memref<4x64x32xbf16, #tpu.memory_space<vmem>>, %arg3: memref<1x32xf32, #tpu.memory_space<vmem>>, %arg4: memref<1x16x16x32xbf16, #tpu.memory_space<vmem>>) attributes {dimension_semantics = [#tpu.dimension_semantics<parallel>], iteration_bounds = array<i64: 2>, scalar_prefetch = 0 : i64, scratch_operands = 0 : i64, tpu.core_type = #tpu.core_type<tc>, window_params = [{transform_indices = @transform_0, window_bounds = array<i64: 1, 16, 16, 64>}, {pipeline_mode = #tpu.pipeline_mode<synchronous>, transform_indices = @transform_1, window_bounds = array<i64: 4, 64, 32>}, {pipeline_mode = #tpu.pipeline_mode<synchronous>, transform_indices = @transform_2, window_bounds = array<i64: 1, 32>}, {transform_indices = @transform_3, window_bounds = array<i64: 1, 16, 16, 32>}]} {
    %c0 = arith.constant 0 : index
    %c0_0 = arith.constant 0 : index
    %c0_1 = arith.constant 0 : index
    %c0_2 = arith.constant 0 : index
    %0 = vector.load %arg1[%c0, %c0_0, %c0_1, %c0_2] : memref<1x16x16x64xbf16, #tpu.memory_space<vmem>>, vector<1x16x16x64xbf16>
    %c0_3 = arith.constant 0 : index
    %c0_4 = arith.constant 0 : index
    %c0_5 = arith.constant 0 : index
    %1 = vector.load %arg2[%c0_3, %c0_4, %c0_5] : memref<4x64x32xbf16, #tpu.memory_space<vmem>>, vector<4x64x32xbf16>
    %2 = vector.shape_cast %0 : vector<1x16x16x64xbf16> to vector<256x64xbf16>
    %3 = vector.extract_strided_slice %1 {offsets = [0, 0, 0], sizes = [1, 64, 32], strides = [1, 1, 1]} : vector<4x64x32xbf16> to vector<1x64x32xbf16>
    %4 = vector.shape_cast %3 : vector<1x64x32xbf16> to vector<64x32xbf16>
    %cst = arith.constant dense<0.000000e+00> : vector<256x32xf32>
    %5 = tpu.matmul %2, %4, %cst {dimension_numbers = #tpu.dot_dimension_numbers<[1], [0], [0], [1], [0, 0, 1, 1], [], []>} : vector<256x64xbf16>, vector<64x32xbf16>, vector<256x32xf32> -> vector<256x32xf32>
    %6 = vector.extract_strided_slice %0 {offsets = [0, 0, 1, 0], sizes = [1, 16, 15, 64], strides = [1, 1, 1, 1]} : vector<1x16x16x64xbf16> to vector<1x16x15x64xbf16>
    %7 = vector.extract_strided_slice %0 {offsets = [0, 0, 0, 0], sizes = [1, 16, 1, 64], strides = [1, 1, 1, 1]} : vector<1x16x16x64xbf16> to vector<1x16x1x64xbf16>
    %8 = tpu.concatenate %6, %7 in 2 : vector<1x16x15x64xbf16>, vector<1x16x1x64xbf16> -> vector<1x16x16x64xbf16>
    %9 = vector.shape_cast %8 : vector<1x16x16x64xbf16> to vector<256x64xbf16>
    %10 = vector.extract_strided_slice %1 {offsets = [1, 0, 0], sizes = [1, 64, 32], strides = [1, 1, 1]} : vector<4x64x32xbf16> to vector<1x64x32xbf16>
    %11 = vector.shape_cast %10 : vector<1x64x32xbf16> to vector<64x32xbf16>
    %cst_6 = arith.constant dense<0.000000e+00> : vector<256x32xf32>
    %12 = tpu.matmul %9, %11, %cst_6 {dimension_numbers = #tpu.dot_dimension_numbers<[1], [0], [0], [1], [0, 0, 1, 1], [], []>} : vector<256x64xbf16>, vector<64x32xbf16>, vector<256x32xf32> -> vector<256x32xf32>
    %13 = arith.addf %5, %12 : vector<256x32xf32>
    %14 = vector.extract_strided_slice %0 {offsets = [0, 1, 0, 0], sizes = [1, 15, 16, 64], strides = [1, 1, 1, 1]} : vector<1x16x16x64xbf16> to vector<1x15x16x64xbf16>
    %15 = vector.extract_strided_slice %0 {offsets = [0, 0, 0, 0], sizes = [1, 1, 16, 64], strides = [1, 1, 1, 1]} : vector<1x16x16x64xbf16> to vector<1x1x16x64xbf16>
    %16 = tpu.concatenate %14, %15 in 1 : vector<1x15x16x64xbf16>, vector<1x1x16x64xbf16> -> vector<1x16x16x64xbf16>
    %17 = vector.shape_cast %16 : vector<1x16x16x64xbf16> to vector<256x64xbf16>
    %18 = vector.extract_strided_slice %1 {offsets = [2, 0, 0], sizes = [1, 64, 32], strides = [1, 1, 1]} : vector<4x64x32xbf16> to vector<1x64x32xbf16>
    %19 = vector.shape_cast %18 : vector<1x64x32xbf16> to vector<64x32xbf16>
    %cst_7 = arith.constant dense<0.000000e+00> : vector<256x32xf32>
    %20 = tpu.matmul %17, %19, %cst_7 {dimension_numbers = #tpu.dot_dimension_numbers<[1], [0], [0], [1], [0, 0, 1, 1], [], []>} : vector<256x64xbf16>, vector<64x32xbf16>, vector<256x32xf32> -> vector<256x32xf32>
    %21 = arith.addf %13, %20 : vector<256x32xf32>
    %22 = vector.extract_strided_slice %0 {offsets = [0, 1, 0, 0], sizes = [1, 15, 16, 64], strides = [1, 1, 1, 1]} : vector<1x16x16x64xbf16> to vector<1x15x16x64xbf16>
    %23 = vector.extract_strided_slice %0 {offsets = [0, 0, 0, 0], sizes = [1, 1, 16, 64], strides = [1, 1, 1, 1]} : vector<1x16x16x64xbf16> to vector<1x1x16x64xbf16>
    %24 = tpu.concatenate %22, %23 in 1 : vector<1x15x16x64xbf16>, vector<1x1x16x64xbf16> -> vector<1x16x16x64xbf16>
    %25 = vector.extract_strided_slice %24 {offsets = [0, 0, 1, 0], sizes = [1, 16, 15, 64], strides = [1, 1, 1, 1]} : vector<1x16x16x64xbf16> to vector<1x16x15x64xbf16>
    %26 = vector.extract_strided_slice %24 {offsets = [0, 0, 0, 0], sizes = [1, 16, 1, 64], strides = [1, 1, 1, 1]} : vector<1x16x16x64xbf16> to vector<1x16x1x64xbf16>
    %27 = tpu.concatenate %25, %26 in 2 : vector<1x16x15x64xbf16>, vector<1x16x1x64xbf16> -> vector<1x16x16x64xbf16>
    %28 = vector.shape_cast %27 : vector<1x16x16x64xbf16> to vector<256x64xbf16>
    %29 = vector.extract_strided_slice %1 {offsets = [3, 0, 0], sizes = [1, 64, 32], strides = [1, 1, 1]} : vector<4x64x32xbf16> to vector<1x64x32xbf16>
    %30 = vector.shape_cast %29 : vector<1x64x32xbf16> to vector<64x32xbf16>
    %cst_8 = arith.constant dense<0.000000e+00> : vector<256x32xf32>
    %31 = tpu.matmul %28, %30, %cst_8 {dimension_numbers = #tpu.dot_dimension_numbers<[1], [0], [0], [1], [0, 0, 1, 1], [], []>} : vector<256x64xbf16>, vector<64x32xbf16>, vector<256x32xf32> -> vector<256x32xf32>
    %32 = arith.addf %21, %31 : vector<256x32xf32>
    %c0_9 = arith.constant 0 : index
    %c0_10 = arith.constant 0 : index
    %33 = vector.load %arg3[%c0_9, %c0_10] : memref<1x32xf32, #tpu.memory_space<vmem>>, vector<1x32xf32>
    %34 = vector.broadcast %33 : vector<1x32xf32> to vector<256x32xf32>
    %35 = arith.addf %32, %34 : vector<256x32xf32>
    %cst_11 = arith.constant 0.000000e+00 : f32
    %36 = vector.broadcast %cst_11 : f32 to vector<256x32xf32>
    %37 = arith.maximumf %35, %36 : vector<256x32xf32>
    %38 = vector.shape_cast %37 : vector<256x32xf32> to vector<1x16x16x32xf32>
    %39 = arith.truncf %38 : vector<1x16x16x32xf32> to vector<1x16x16x32xbf16>
    %c0_12 = arith.constant 0 : index
    %c0_13 = arith.constant 0 : index
    %c0_14 = arith.constant 0 : index
    %c0_15 = arith.constant 0 : index
    %40 = vector.load %arg4[%c0_12, %c0_13, %c0_14, %c0_15] : memref<1x16x16x32xbf16, #tpu.memory_space<vmem>>, vector<1x16x16x32xbf16>
    tpu.vector_store %arg4[%c0_12, %c0_13, %c0_14, %c0_15], %39 {strides = array<i32>} : memref<1x16x16x32xbf16, #tpu.memory_space<vmem>>, vector<1x16x16x32xbf16>,
    return
  }
  func.func @transform_0(%arg0: i32) -> (i32, i32, i32, i32) {
    %c0_i32 = arith.constant 0 : i32
    %c0_i32_0 = arith.constant 0 : i32
    %c0_i32_1 = arith.constant 0 : i32
    %c0_i32_2 = arith.constant 0 : i32
    return %arg0, %c0_i32, %c0_i32_0, %c0_i32_1 : i32, i32, i32, i32
  }
  func.func @transform_1(%arg0: i32) -> (i32, i32, i32) {
    %c0_i32 = arith.constant 0 : i32
    %c0_i32_0 = arith.constant 0 : i32
    %c0_i32_1 = arith.constant 0 : i32
    %c0_i32_2 = arith.constant 0 : i32
    return %c0_i32, %c0_i32_0, %c0_i32_1 : i32, i32, i32
  }
  func.func @transform_2(%arg0: i32) -> (i32, i32) {
    %c0_i32 = arith.constant 0 : i32
    %c0_i32_0 = arith.constant 0 : i32
    %c0_i32_1 = arith.constant 0 : i32
    return %c0_i32, %c0_i32_0 : i32, i32
  }
  func.func @transform_3(%arg0: i32) -> (i32, i32, i32, i32) {
    %c0_i32 = arith.constant 0 : i32
    %c0_i32_0 = arith.constant 0 : i32
    %c0_i32_1 = arith.constant 0 : i32
    %c0_i32_2 = arith.constant 0 : i32
    return %arg0, %c0_i32, %c0_i32_0, %c0_i32_1 : i32, i32, i32, i32
  }
}

module attributes {stable_mosaic.version = 11 : i64} {
  func.func @_tail_kernel(%arg0: i32, %arg1: memref<1x8x8x128xbf16, #tpu.memory_space<vmem>>, %arg2: memref<4x128x64xbf16, #tpu.memory_space<vmem>>, %arg3: memref<1x64xf32, #tpu.memory_space<vmem>>, %arg4: memref<9x64x64xbf16, #tpu.memory_space<vmem>>, %arg5: memref<1x64xf32, #tpu.memory_space<vmem>>, %arg6: memref<1024x64xbf16, #tpu.memory_space<vmem>>, %arg7: memref<1x64xf32, #tpu.memory_space<vmem>>, %arg8: memref<64x7xbf16, #tpu.memory_space<vmem>>, %arg9: memref<1x7xf32, #tpu.memory_space<vmem>>, %arg10: memref<1x1x6xf32, #tpu.memory_space<vmem>>, %arg11: memref<1x1x8xf32, #tpu.memory_space<vmem>>) attributes {dimension_semantics = [#tpu.dimension_semantics<parallel>], iteration_bounds = array<i64: 2>, scalar_prefetch = 0 : i64, scratch_operands = 0 : i64, tpu.core_type = #tpu.core_type<tc>, window_params = [{transform_indices = @transform_0, window_bounds = array<i64: 1, 8, 8, 128>}, {pipeline_mode = #tpu.pipeline_mode<synchronous>, transform_indices = @transform_1, window_bounds = array<i64: 4, 128, 64>}, {pipeline_mode = #tpu.pipeline_mode<synchronous>, transform_indices = @transform_2, window_bounds = array<i64: 1, 64>}, {pipeline_mode = #tpu.pipeline_mode<synchronous>, transform_indices = @transform_3, window_bounds = array<i64: 9, 64, 64>}, {pipeline_mode = #tpu.pipeline_mode<synchronous>, transform_indices = @transform_4, window_bounds = array<i64: 1, 64>}, {pipeline_mode = #tpu.pipeline_mode<synchronous>, transform_indices = @transform_5, window_bounds = array<i64: 1024, 64>}, {pipeline_mode = #tpu.pipeline_mode<synchronous>, transform_indices = @transform_6, window_bounds = array<i64: 1, 64>}, {pipeline_mode = #tpu.pipeline_mode<synchronous>, transform_indices = @transform_7, window_bounds = array<i64: 64, 7>}, {pipeline_mode = #tpu.pipeline_mode<synchronous>, transform_indices = @transform_8, window_bounds = array<i64: 1, 7>}, {transform_indices = @transform_9, window_bounds = array<i64: 1, 1, 6>}, {transform_indices = @transform_10, window_bounds = array<i64: 1, 1, 8>}]} {
    %c0 = arith.constant 0 : index
    %c0_0 = arith.constant 0 : index
    %c0_1 = arith.constant 0 : index
    %c0_2 = arith.constant 0 : index
    %0 = vector.load %arg1[%c0, %c0_0, %c0_1, %c0_2] : memref<1x8x8x128xbf16, #tpu.memory_space<vmem>>, vector<1x8x8x128xbf16>
    %c0_3 = arith.constant 0 : index
    %c0_4 = arith.constant 0 : index
    %c0_5 = arith.constant 0 : index
    %1 = vector.load %arg2[%c0_3, %c0_4, %c0_5] : memref<4x128x64xbf16, #tpu.memory_space<vmem>>, vector<4x128x64xbf16>
    %2 = vector.shape_cast %0 : vector<1x8x8x128xbf16> to vector<64x128xbf16>
    %3 = vector.extract_strided_slice %1 {offsets = [0, 0, 0], sizes = [1, 128, 64], strides = [1, 1, 1]} : vector<4x128x64xbf16> to vector<1x128x64xbf16>
    %4 = vector.shape_cast %3 : vector<1x128x64xbf16> to vector<128x64xbf16>
    %cst = arith.constant dense<0.000000e+00> : vector<64x64xf32>
    %5 = tpu.matmul %2, %4, %cst {dimension_numbers = #tpu.dot_dimension_numbers<[1], [0], [0], [1], [0, 0, 1, 1], [], []>} : vector<64x128xbf16>, vector<128x64xbf16>, vector<64x64xf32> -> vector<64x64xf32>
    %6 = vector.extract_strided_slice %0 {offsets = [0, 0, 1, 0], sizes = [1, 8, 7, 128], strides = [1, 1, 1, 1]} : vector<1x8x8x128xbf16> to vector<1x8x7x128xbf16>
    %7 = vector.extract_strided_slice %0 {offsets = [0, 0, 0, 0], sizes = [1, 8, 1, 128], strides = [1, 1, 1, 1]} : vector<1x8x8x128xbf16> to vector<1x8x1x128xbf16>
    %8 = tpu.concatenate %6, %7 in 2 : vector<1x8x7x128xbf16>, vector<1x8x1x128xbf16> -> vector<1x8x8x128xbf16>
    %9 = vector.shape_cast %8 : vector<1x8x8x128xbf16> to vector<64x128xbf16>
    %10 = vector.extract_strided_slice %1 {offsets = [1, 0, 0], sizes = [1, 128, 64], strides = [1, 1, 1]} : vector<4x128x64xbf16> to vector<1x128x64xbf16>
    %11 = vector.shape_cast %10 : vector<1x128x64xbf16> to vector<128x64xbf16>
    %cst_6 = arith.constant dense<0.000000e+00> : vector<64x64xf32>
    %12 = tpu.matmul %9, %11, %cst_6 {dimension_numbers = #tpu.dot_dimension_numbers<[1], [0], [0], [1], [0, 0, 1, 1], [], []>} : vector<64x128xbf16>, vector<128x64xbf16>, vector<64x64xf32> -> vector<64x64xf32>
    %13 = arith.addf %5, %12 : vector<64x64xf32>
    %14 = vector.extract_strided_slice %0 {offsets = [0, 1, 0, 0], sizes = [1, 7, 8, 128], strides = [1, 1, 1, 1]} : vector<1x8x8x128xbf16> to vector<1x7x8x128xbf16>
    %15 = vector.extract_strided_slice %0 {offsets = [0, 0, 0, 0], sizes = [1, 1, 8, 128], strides = [1, 1, 1, 1]} : vector<1x8x8x128xbf16> to vector<1x1x8x128xbf16>
    %16 = tpu.concatenate %14, %15 in 1 : vector<1x7x8x128xbf16>, vector<1x1x8x128xbf16> -> vector<1x8x8x128xbf16>
    %17 = vector.shape_cast %16 : vector<1x8x8x128xbf16> to vector<64x128xbf16>
    %18 = vector.extract_strided_slice %1 {offsets = [2, 0, 0], sizes = [1, 128, 64], strides = [1, 1, 1]} : vector<4x128x64xbf16> to vector<1x128x64xbf16>
    %19 = vector.shape_cast %18 : vector<1x128x64xbf16> to vector<128x64xbf16>
    %cst_7 = arith.constant dense<0.000000e+00> : vector<64x64xf32>
    %20 = tpu.matmul %17, %19, %cst_7 {dimension_numbers = #tpu.dot_dimension_numbers<[1], [0], [0], [1], [0, 0, 1, 1], [], []>} : vector<64x128xbf16>, vector<128x64xbf16>, vector<64x64xf32> -> vector<64x64xf32>
    %21 = arith.addf %13, %20 : vector<64x64xf32>
    %22 = vector.extract_strided_slice %0 {offsets = [0, 1, 0, 0], sizes = [1, 7, 8, 128], strides = [1, 1, 1, 1]} : vector<1x8x8x128xbf16> to vector<1x7x8x128xbf16>
    %23 = vector.extract_strided_slice %0 {offsets = [0, 0, 0, 0], sizes = [1, 1, 8, 128], strides = [1, 1, 1, 1]} : vector<1x8x8x128xbf16> to vector<1x1x8x128xbf16>
    %24 = tpu.concatenate %22, %23 in 1 : vector<1x7x8x128xbf16>, vector<1x1x8x128xbf16> -> vector<1x8x8x128xbf16>
    %25 = vector.extract_strided_slice %24 {offsets = [0, 0, 1, 0], sizes = [1, 8, 7, 128], strides = [1, 1, 1, 1]} : vector<1x8x8x128xbf16> to vector<1x8x7x128xbf16>
    %26 = vector.extract_strided_slice %24 {offsets = [0, 0, 0, 0], sizes = [1, 8, 1, 128], strides = [1, 1, 1, 1]} : vector<1x8x8x128xbf16> to vector<1x8x1x128xbf16>
    %27 = tpu.concatenate %25, %26 in 2 : vector<1x8x7x128xbf16>, vector<1x8x1x128xbf16> -> vector<1x8x8x128xbf16>
    %28 = vector.shape_cast %27 : vector<1x8x8x128xbf16> to vector<64x128xbf16>
    %29 = vector.extract_strided_slice %1 {offsets = [3, 0, 0], sizes = [1, 128, 64], strides = [1, 1, 1]} : vector<4x128x64xbf16> to vector<1x128x64xbf16>
    %30 = vector.shape_cast %29 : vector<1x128x64xbf16> to vector<128x64xbf16>
    %cst_8 = arith.constant dense<0.000000e+00> : vector<64x64xf32>
    %31 = tpu.matmul %28, %30, %cst_8 {dimension_numbers = #tpu.dot_dimension_numbers<[1], [0], [0], [1], [0, 0, 1, 1], [], []>} : vector<64x128xbf16>, vector<128x64xbf16>, vector<64x64xf32> -> vector<64x64xf32>
    %32 = arith.addf %21, %31 : vector<64x64xf32>
    %c0_9 = arith.constant 0 : index
    %c0_10 = arith.constant 0 : index
    %33 = vector.load %arg3[%c0_9, %c0_10] : memref<1x64xf32, #tpu.memory_space<vmem>>, vector<1x64xf32>
    %34 = vector.broadcast %33 : vector<1x64xf32> to vector<64x64xf32>
    %35 = arith.addf %32, %34 : vector<64x64xf32>
    %cst_11 = arith.constant 0.000000e+00 : f32
    %36 = vector.broadcast %cst_11 : f32 to vector<64x64xf32>
    %37 = arith.maximumf %35, %36 : vector<64x64xf32>
    %38 = arith.truncf %37 : vector<64x64xf32> to vector<64x64xbf16>
    %39 = vector.shape_cast %38 : vector<64x64xbf16> to vector<1x8x8x64xbf16>
    %c0_12 = arith.constant 0 : index
    %c0_13 = arith.constant 0 : index
    %c0_14 = arith.constant 0 : index
    %40 = vector.load %arg4[%c0_12, %c0_13, %c0_14] : memref<9x64x64xbf16, #tpu.memory_space<vmem>>, vector<9x64x64xbf16>
    %41 = vector.shape_cast %39 : vector<1x8x8x64xbf16> to vector<64x64xbf16>
    %42 = vector.extract_strided_slice %40 {offsets = [0, 0, 0], sizes = [1, 64, 64], strides = [1, 1, 1]} : vector<9x64x64xbf16> to vector<1x64x64xbf16>
    %43 = vector.shape_cast %42 : vector<1x64x64xbf16> to vector<64x64xbf16>
    %cst_15 = arith.constant dense<0.000000e+00> : vector<64x64xf32>
    %44 = tpu.matmul %41, %43, %cst_15 {dimension_numbers = #tpu.dot_dimension_numbers<[1], [0], [0], [1], [0, 0, 1, 1], [], []>} : vector<64x64xbf16>, vector<64x64xbf16>, vector<64x64xf32> -> vector<64x64xf32>
    %45 = vector.extract_strided_slice %39 {offsets = [0, 0, 1, 0], sizes = [1, 8, 7, 64], strides = [1, 1, 1, 1]} : vector<1x8x8x64xbf16> to vector<1x8x7x64xbf16>
    %46 = vector.extract_strided_slice %39 {offsets = [0, 0, 0, 0], sizes = [1, 8, 1, 64], strides = [1, 1, 1, 1]} : vector<1x8x8x64xbf16> to vector<1x8x1x64xbf16>
    %47 = tpu.concatenate %45, %46 in 2 : vector<1x8x7x64xbf16>, vector<1x8x1x64xbf16> -> vector<1x8x8x64xbf16>
    %48 = vector.shape_cast %47 : vector<1x8x8x64xbf16> to vector<64x64xbf16>
    %49 = vector.extract_strided_slice %40 {offsets = [1, 0, 0], sizes = [1, 64, 64], strides = [1, 1, 1]} : vector<9x64x64xbf16> to vector<1x64x64xbf16>
    %50 = vector.shape_cast %49 : vector<1x64x64xbf16> to vector<64x64xbf16>
    %cst_16 = arith.constant dense<0.000000e+00> : vector<64x64xf32>
    %51 = tpu.matmul %48, %50, %cst_16 {dimension_numbers = #tpu.dot_dimension_numbers<[1], [0], [0], [1], [0, 0, 1, 1], [], []>} : vector<64x64xbf16>, vector<64x64xbf16>, vector<64x64xf32> -> vector<64x64xf32>
    %52 = arith.addf %44, %51 : vector<64x64xf32>
    %53 = vector.extract_strided_slice %39 {offsets = [0, 0, 2, 0], sizes = [1, 8, 6, 64], strides = [1, 1, 1, 1]} : vector<1x8x8x64xbf16> to vector<1x8x6x64xbf16>
    %54 = vector.extract_strided_slice %39 {offsets = [0, 0, 0, 0], sizes = [1, 8, 2, 64], strides = [1, 1, 1, 1]} : vector<1x8x8x64xbf16> to vector<1x8x2x64xbf16>
    %55 = tpu.concatenate %53, %54 in 2 : vector<1x8x6x64xbf16>, vector<1x8x2x64xbf16> -> vector<1x8x8x64xbf16>
    %56 = vector.shape_cast %55 : vector<1x8x8x64xbf16> to vector<64x64xbf16>
    %57 = vector.extract_strided_slice %40 {offsets = [2, 0, 0], sizes = [1, 64, 64], strides = [1, 1, 1]} : vector<9x64x64xbf16> to vector<1x64x64xbf16>
    %58 = vector.shape_cast %57 : vector<1x64x64xbf16> to vector<64x64xbf16>
    %cst_17 = arith.constant dense<0.000000e+00> : vector<64x64xf32>
    %59 = tpu.matmul %56, %58, %cst_17 {dimension_numbers = #tpu.dot_dimension_numbers<[1], [0], [0], [1], [0, 0, 1, 1], [], []>} : vector<64x64xbf16>, vector<64x64xbf16>, vector<64x64xf32> -> vector<64x64xf32>
    %60 = arith.addf %52, %59 : vector<64x64xf32>
    %61 = vector.extract_strided_slice %39 {offsets = [0, 1, 0, 0], sizes = [1, 7, 8, 64], strides = [1, 1, 1, 1]} : vector<1x8x8x64xbf16> to vector<1x7x8x64xbf16>
    %62 = vector.extract_strided_slice %39 {offsets = [0, 0, 0, 0], sizes = [1, 1, 8, 64], strides = [1, 1, 1, 1]} : vector<1x8x8x64xbf16> to vector<1x1x8x64xbf16>
    %63 = tpu.concatenate %61, %62 in 1 : vector<1x7x8x64xbf16>, vector<1x1x8x64xbf16> -> vector<1x8x8x64xbf16>
    %64 = vector.shape_cast %63 : vector<1x8x8x64xbf16> to vector<64x64xbf16>
    %65 = vector.extract_strided_slice %40 {offsets = [3, 0, 0], sizes = [1, 64, 64], strides = [1, 1, 1]} : vector<9x64x64xbf16> to vector<1x64x64xbf16>
    %66 = vector.shape_cast %65 : vector<1x64x64xbf16> to vector<64x64xbf16>
    %cst_18 = arith.constant dense<0.000000e+00> : vector<64x64xf32>
    %67 = tpu.matmul %64, %66, %cst_18 {dimension_numbers = #tpu.dot_dimension_numbers<[1], [0], [0], [1], [0, 0, 1, 1], [], []>} : vector<64x64xbf16>, vector<64x64xbf16>, vector<64x64xf32> -> vector<64x64xf32>
    %68 = arith.addf %60, %67 : vector<64x64xf32>
    %69 = vector.extract_strided_slice %39 {offsets = [0, 1, 0, 0], sizes = [1, 7, 8, 64], strides = [1, 1, 1, 1]} : vector<1x8x8x64xbf16> to vector<1x7x8x64xbf16>
    %70 = vector.extract_strided_slice %39 {offsets = [0, 0, 0, 0], sizes = [1, 1, 8, 64], strides = [1, 1, 1, 1]} : vector<1x8x8x64xbf16> to vector<1x1x8x64xbf16>
    %71 = tpu.concatenate %69, %70 in 1 : vector<1x7x8x64xbf16>, vector<1x1x8x64xbf16> -> vector<1x8x8x64xbf16>
    %72 = vector.extract_strided_slice %71 {offsets = [0, 0, 1, 0], sizes = [1, 8, 7, 64], strides = [1, 1, 1, 1]} : vector<1x8x8x64xbf16> to vector<1x8x7x64xbf16>
    %73 = vector.extract_strided_slice %71 {offsets = [0, 0, 0, 0], sizes = [1, 8, 1, 64], strides = [1, 1, 1, 1]} : vector<1x8x8x64xbf16> to vector<1x8x1x64xbf16>
    %74 = tpu.concatenate %72, %73 in 2 : vector<1x8x7x64xbf16>, vector<1x8x1x64xbf16> -> vector<1x8x8x64xbf16>
    %75 = vector.shape_cast %74 : vector<1x8x8x64xbf16> to vector<64x64xbf16>
    %76 = vector.extract_strided_slice %40 {offsets = [4, 0, 0], sizes = [1, 64, 64], strides = [1, 1, 1]} : vector<9x64x64xbf16> to vector<1x64x64xbf16>
    %77 = vector.shape_cast %76 : vector<1x64x64xbf16> to vector<64x64xbf16>
    %cst_19 = arith.constant dense<0.000000e+00> : vector<64x64xf32>
    %78 = tpu.matmul %75, %77, %cst_19 {dimension_numbers = #tpu.dot_dimension_numbers<[1], [0], [0], [1], [0, 0, 1, 1], [], []>} : vector<64x64xbf16>, vector<64x64xbf16>, vector<64x64xf32> -> vector<64x64xf32>
    %79 = arith.addf %68, %78 : vector<64x64xf32>
    %80 = vector.extract_strided_slice %39 {offsets = [0, 1, 0, 0], sizes = [1, 7, 8, 64], strides = [1, 1, 1, 1]} : vector<1x8x8x64xbf16> to vector<1x7x8x64xbf16>
    %81 = vector.extract_strided_slice %39 {offsets = [0, 0, 0, 0], sizes = [1, 1, 8, 64], strides = [1, 1, 1, 1]} : vector<1x8x8x64xbf16> to vector<1x1x8x64xbf16>
    %82 = tpu.concatenate %80, %81 in 1 : vector<1x7x8x64xbf16>, vector<1x1x8x64xbf16> -> vector<1x8x8x64xbf16>
    %83 = vector.extract_strided_slice %82 {offsets = [0, 0, 2, 0], sizes = [1, 8, 6, 64], strides = [1, 1, 1, 1]} : vector<1x8x8x64xbf16> to vector<1x8x6x64xbf16>
    %84 = vector.extract_strided_slice %82 {offsets = [0, 0, 0, 0], sizes = [1, 8, 2, 64], strides = [1, 1, 1, 1]} : vector<1x8x8x64xbf16> to vector<1x8x2x64xbf16>
    %85 = tpu.concatenate %83, %84 in 2 : vector<1x8x6x64xbf16>, vector<1x8x2x64xbf16> -> vector<1x8x8x64xbf16>
    %86 = vector.shape_cast %85 : vector<1x8x8x64xbf16> to vector<64x64xbf16>
    %87 = vector.extract_strided_slice %40 {offsets = [5, 0, 0], sizes = [1, 64, 64], strides = [1, 1, 1]} : vector<9x64x64xbf16> to vector<1x64x64xbf16>
    %88 = vector.shape_cast %87 : vector<1x64x64xbf16> to vector<64x64xbf16>
    %cst_20 = arith.constant dense<0.000000e+00> : vector<64x64xf32>
    %89 = tpu.matmul %86, %88, %cst_20 {dimension_numbers = #tpu.dot_dimension_numbers<[1], [0], [0], [1], [0, 0, 1, 1], [], []>} : vector<64x64xbf16>, vector<64x64xbf16>, vector<64x64xf32> -> vector<64x64xf32>
    %90 = arith.addf %79, %89 : vector<64x64xf32>
    %91 = vector.extract_strided_slice %39 {offsets = [0, 2, 0, 0], sizes = [1, 6, 8, 64], strides = [1, 1, 1, 1]} : vector<1x8x8x64xbf16> to vector<1x6x8x64xbf16>
    %92 = vector.extract_strided_slice %39 {offsets = [0, 0, 0, 0], sizes = [1, 2, 8, 64], strides = [1, 1, 1, 1]} : vector<1x8x8x64xbf16> to vector<1x2x8x64xbf16>
    %93 = tpu.concatenate %91, %92 in 1 : vector<1x6x8x64xbf16>, vector<1x2x8x64xbf16> -> vector<1x8x8x64xbf16>
    %94 = vector.shape_cast %93 : vector<1x8x8x64xbf16> to vector<64x64xbf16>
    %95 = vector.extract_strided_slice %40 {offsets = [6, 0, 0], sizes = [1, 64, 64], strides = [1, 1, 1]} : vector<9x64x64xbf16> to vector<1x64x64xbf16>
    %96 = vector.shape_cast %95 : vector<1x64x64xbf16> to vector<64x64xbf16>
    %cst_21 = arith.constant dense<0.000000e+00> : vector<64x64xf32>
    %97 = tpu.matmul %94, %96, %cst_21 {dimension_numbers = #tpu.dot_dimension_numbers<[1], [0], [0], [1], [0, 0, 1, 1], [], []>} : vector<64x64xbf16>, vector<64x64xbf16>, vector<64x64xf32> -> vector<64x64xf32>
    %98 = arith.addf %90, %97 : vector<64x64xf32>
    %99 = vector.extract_strided_slice %39 {offsets = [0, 2, 0, 0], sizes = [1, 6, 8, 64], strides = [1, 1, 1, 1]} : vector<1x8x8x64xbf16> to vector<1x6x8x64xbf16>
    %100 = vector.extract_strided_slice %39 {offsets = [0, 0, 0, 0], sizes = [1, 2, 8, 64], strides = [1, 1, 1, 1]} : vector<1x8x8x64xbf16> to vector<1x2x8x64xbf16>
    %101 = tpu.concatenate %99, %100 in 1 : vector<1x6x8x64xbf16>, vector<1x2x8x64xbf16> -> vector<1x8x8x64xbf16>
    %102 = vector.extract_strided_slice %101 {offsets = [0, 0, 1, 0], sizes = [1, 8, 7, 64], strides = [1, 1, 1, 1]} : vector<1x8x8x64xbf16> to vector<1x8x7x64xbf16>
    %103 = vector.extract_strided_slice %101 {offsets = [0, 0, 0, 0], sizes = [1, 8, 1, 64], strides = [1, 1, 1, 1]} : vector<1x8x8x64xbf16> to vector<1x8x1x64xbf16>
    %104 = tpu.concatenate %102, %103 in 2 : vector<1x8x7x64xbf16>, vector<1x8x1x64xbf16> -> vector<1x8x8x64xbf16>
    %105 = vector.shape_cast %104 : vector<1x8x8x64xbf16> to vector<64x64xbf16>
    %106 = vector.extract_strided_slice %40 {offsets = [7, 0, 0], sizes = [1, 64, 64], strides = [1, 1, 1]} : vector<9x64x64xbf16> to vector<1x64x64xbf16>
    %107 = vector.shape_cast %106 : vector<1x64x64xbf16> to vector<64x64xbf16>
    %cst_22 = arith.constant dense<0.000000e+00> : vector<64x64xf32>
    %108 = tpu.matmul %105, %107, %cst_22 {dimension_numbers = #tpu.dot_dimension_numbers<[1], [0], [0], [1], [0, 0, 1, 1], [], []>} : vector<64x64xbf16>, vector<64x64xbf16>, vector<64x64xf32> -> vector<64x64xf32>
    %109 = arith.addf %98, %108 : vector<64x64xf32>
    %110 = vector.extract_strided_slice %39 {offsets = [0, 2, 0, 0], sizes = [1, 6, 8, 64], strides = [1, 1, 1, 1]} : vector<1x8x8x64xbf16> to vector<1x6x8x64xbf16>
    %111 = vector.extract_strided_slice %39 {offsets = [0, 0, 0, 0], sizes = [1, 2, 8, 64], strides = [1, 1, 1, 1]} : vector<1x8x8x64xbf16> to vector<1x2x8x64xbf16>
    %112 = tpu.concatenate %110, %111 in 1 : vector<1x6x8x64xbf16>, vector<1x2x8x64xbf16> -> vector<1x8x8x64xbf16>
    %113 = vector.extract_strided_slice %112 {offsets = [0, 0, 2, 0], sizes = [1, 8, 6, 64], strides = [1, 1, 1, 1]} : vector<1x8x8x64xbf16> to vector<1x8x6x64xbf16>
    %114 = vector.extract_strided_slice %112 {offsets = [0, 0, 0, 0], sizes = [1, 8, 2, 64], strides = [1, 1, 1, 1]} : vector<1x8x8x64xbf16> to vector<1x8x2x64xbf16>
    %115 = tpu.concatenate %113, %114 in 2 : vector<1x8x6x64xbf16>, vector<1x8x2x64xbf16> -> vector<1x8x8x64xbf16>
    %116 = vector.shape_cast %115 : vector<1x8x8x64xbf16> to vector<64x64xbf16>
    %117 = vector.extract_strided_slice %40 {offsets = [8, 0, 0], sizes = [1, 64, 64], strides = [1, 1, 1]} : vector<9x64x64xbf16> to vector<1x64x64xbf16>
    %118 = vector.shape_cast %117 : vector<1x64x64xbf16> to vector<64x64xbf16>
    %cst_23 = arith.constant dense<0.000000e+00> : vector<64x64xf32>
    %119 = tpu.matmul %116, %118, %cst_23 {dimension_numbers = #tpu.dot_dimension_numbers<[1], [0], [0], [1], [0, 0, 1, 1], [], []>} : vector<64x64xbf16>, vector<64x64xbf16>, vector<64x64xf32> -> vector<64x64xf32>
    %120 = arith.addf %109, %119 : vector<64x64xf32>
    %c0_24 = arith.constant 0 : index
    %c0_25 = arith.constant 0 : index
    %121 = vector.load %arg5[%c0_24, %c0_25] : memref<1x64xf32, #tpu.memory_space<vmem>>, vector<1x64xf32>
    %122 = vector.broadcast %121 : vector<1x64xf32> to vector<64x64xf32>
    %123 = arith.addf %120, %122 : vector<64x64xf32>
    %cst_26 = arith.constant 0.000000e+00 : f32
    %124 = vector.broadcast %cst_26 : f32 to vector<64x64xf32>
    %125 = arith.maximumf %123, %124 : vector<64x64xf32>
    %126 = arith.truncf %125 : vector<64x64xf32> to vector<64x64xbf16>
    %127 = vector.shape_cast %126 : vector<64x64xbf16> to vector<1x8x8x64xbf16>
    %128 = vector.extract_strided_slice %127 {offsets = [0, 0, 0, 0], sizes = [1, 1, 1, 64], strides = [1, 1, 1, 1]} : vector<1x8x8x64xbf16> to vector<1x1x1x64xbf16>
    %129 = vector.shape_cast %128 : vector<1x1x1x64xbf16> to vector<1x64xbf16>
    %130 = vector.extract_strided_slice %127 {offsets = [0, 0, 1, 0], sizes = [1, 1, 1, 64], strides = [1, 1, 1, 1]} : vector<1x8x8x64xbf16> to vector<1x1x1x64xbf16>
    %131 = vector.shape_cast %130 : vector<1x1x1x64xbf16> to vector<1x64xbf16>
    %132 = vector.extract_strided_slice %127 {offsets = [0, 0, 2, 0], sizes = [1, 1, 1, 64], strides = [1, 1, 1, 1]} : vector<1x8x8x64xbf16> to vector<1x1x1x64xbf16>
    %133 = vector.shape_cast %132 : vector<1x1x1x64xbf16> to vector<1x64xbf16>
    %134 = vector.extract_strided_slice %127 {offsets = [0, 0, 3, 0], sizes = [1, 1, 1, 64], strides = [1, 1, 1, 1]} : vector<1x8x8x64xbf16> to vector<1x1x1x64xbf16>
    %135 = vector.shape_cast %134 : vector<1x1x1x64xbf16> to vector<1x64xbf16>
    %136 = vector.extract_strided_slice %127 {offsets = [0, 1, 0, 0], sizes = [1, 1, 1, 64], strides = [1, 1, 1, 1]} : vector<1x8x8x64xbf16> to vector<1x1x1x64xbf16>
    %137 = vector.shape_cast %136 : vector<1x1x1x64xbf16> to vector<1x64xbf16>
    %138 = vector.extract_strided_slice %127 {offsets = [0, 1, 1, 0], sizes = [1, 1, 1, 64], strides = [1, 1, 1, 1]} : vector<1x8x8x64xbf16> to vector<1x1x1x64xbf16>
    %139 = vector.shape_cast %138 : vector<1x1x1x64xbf16> to vector<1x64xbf16>
    %140 = vector.extract_strided_slice %127 {offsets = [0, 1, 2, 0], sizes = [1, 1, 1, 64], strides = [1, 1, 1, 1]} : vector<1x8x8x64xbf16> to vector<1x1x1x64xbf16>
    %141 = vector.shape_cast %140 : vector<1x1x1x64xbf16> to vector<1x64xbf16>
    %142 = vector.extract_strided_slice %127 {offsets = [0, 1, 3, 0], sizes = [1, 1, 1, 64], strides = [1, 1, 1, 1]} : vector<1x8x8x64xbf16> to vector<1x1x1x64xbf16>
    %143 = vector.shape_cast %142 : vector<1x1x1x64xbf16> to vector<1x64xbf16>
    %144 = vector.extract_strided_slice %127 {offsets = [0, 2, 0, 0], sizes = [1, 1, 1, 64], strides = [1, 1, 1, 1]} : vector<1x8x8x64xbf16> to vector<1x1x1x64xbf16>
    %145 = vector.shape_cast %144 : vector<1x1x1x64xbf16> to vector<1x64xbf16>
    %146 = vector.extract_strided_slice %127 {offsets = [0, 2, 1, 0], sizes = [1, 1, 1, 64], strides = [1, 1, 1, 1]} : vector<1x8x8x64xbf16> to vector<1x1x1x64xbf16>
    %147 = vector.shape_cast %146 : vector<1x1x1x64xbf16> to vector<1x64xbf16>
    %148 = vector.extract_strided_slice %127 {offsets = [0, 2, 2, 0], sizes = [1, 1, 1, 64], strides = [1, 1, 1, 1]} : vector<1x8x8x64xbf16> to vector<1x1x1x64xbf16>
    %149 = vector.shape_cast %148 : vector<1x1x1x64xbf16> to vector<1x64xbf16>
    %150 = vector.extract_strided_slice %127 {offsets = [0, 2, 3, 0], sizes = [1, 1, 1, 64], strides = [1, 1, 1, 1]} : vector<1x8x8x64xbf16> to vector<1x1x1x64xbf16>
    %151 = vector.shape_cast %150 : vector<1x1x1x64xbf16> to vector<1x64xbf16>
    %152 = vector.extract_strided_slice %127 {offsets = [0, 3, 0, 0], sizes = [1, 1, 1, 64], strides = [1, 1, 1, 1]} : vector<1x8x8x64xbf16> to vector<1x1x1x64xbf16>
    %153 = vector.shape_cast %152 : vector<1x1x1x64xbf16> to vector<1x64xbf16>
    %154 = vector.extract_strided_slice %127 {offsets = [0, 3, 1, 0], sizes = [1, 1, 1, 64], strides = [1, 1, 1, 1]} : vector<1x8x8x64xbf16> to vector<1x1x1x64xbf16>
    %155 = vector.shape_cast %154 : vector<1x1x1x64xbf16> to vector<1x64xbf16>
    %156 = vector.extract_strided_slice %127 {offsets = [0, 3, 2, 0], sizes = [1, 1, 1, 64], strides = [1, 1, 1, 1]} : vector<1x8x8x64xbf16> to vector<1x1x1x64xbf16>
    %157 = vector.shape_cast %156 : vector<1x1x1x64xbf16> to vector<1x64xbf16>
    %158 = vector.extract_strided_slice %127 {offsets = [0, 3, 3, 0], sizes = [1, 1, 1, 64], strides = [1, 1, 1, 1]} : vector<1x8x8x64xbf16> to vector<1x1x1x64xbf16>
    %159 = vector.shape_cast %158 : vector<1x1x1x64xbf16> to vector<1x64xbf16>
    %160 = tpu.concatenate %129, %131, %133, %135, %137, %139, %141, %143, %145, %147, %149, %151, %153, %155, %157, %159 in 1 : vector<1x64xbf16>, vector<1x64xbf16>, vector<1x64xbf16>, vector<1x64xbf16>, vector<1x64xbf16>, vector<1x64xbf16>, vector<1x64xbf16>, vector<1x64xbf16>, vector<1x64xbf16>, vector<1x64xbf16>, vector<1x64xbf16>, vector<1x64xbf16>, vector<1x64xbf16>, vector<1x64xbf16>, vector<1x64xbf16>, vector<1x64xbf16> -> vector<1x1024xbf16>
    %c0_27 = arith.constant 0 : index
    %c0_28 = arith.constant 0 : index
    %161 = vector.load %arg6[%c0_27, %c0_28] : memref<1024x64xbf16, #tpu.memory_space<vmem>>, vector<1024x64xbf16>
    %cst_29 = arith.constant dense<0.000000e+00> : vector<1x64xf32>
    %162 = tpu.matmul %160, %161, %cst_29 {dimension_numbers = #tpu.dot_dimension_numbers<[1], [0], [0], [1], [0, 0, 1, 1], [], []>} : vector<1x1024xbf16>, vector<1024x64xbf16>, vector<1x64xf32> -> vector<1x64xf32>
    %c0_30 = arith.constant 0 : index
    %c0_31 = arith.constant 0 : index
    %163 = vector.load %arg7[%c0_30, %c0_31] : memref<1x64xf32, #tpu.memory_space<vmem>>, vector<1x64xf32>
    %164 = arith.addf %162, %163 : vector<1x64xf32>
    %cst_32 = arith.constant 0.000000e+00 : f32
    %165 = vector.broadcast %cst_32 : f32 to vector<1x64xf32>
    %166 = arith.maximumf %164, %165 : vector<1x64xf32>
    %167 = arith.truncf %166 : vector<1x64xf32> to vector<1x64xbf16>
    %c0_33 = arith.constant 0 : index
    %c0_34 = arith.constant 0 : index
    %168 = vector.load %arg8[%c0_33, %c0_34] : memref<64x7xbf16, #tpu.memory_space<vmem>>, vector<64x7xbf16>
    %cst_35 = arith.constant dense<0.000000e+00> : vector<1x7xf32>
    %169 = tpu.matmul %167, %168, %cst_35 {dimension_numbers = #tpu.dot_dimension_numbers<[1], [0], [0], [1], [0, 0, 1, 1], [], []>} : vector<1x64xbf16>, vector<64x7xbf16>, vector<1x7xf32> -> vector<1x7xf32>
    %c0_36 = arith.constant 0 : index
    %c0_37 = arith.constant 0 : index
    %170 = vector.load %arg9[%c0_36, %c0_37] : memref<1x7xf32, #tpu.memory_space<vmem>>, vector<1x7xf32>
    %171 = arith.addf %169, %170 : vector<1x7xf32>
    %172 = vector.extract_strided_slice %171 {offsets = [0, 0], sizes = [1, 6], strides = [1, 1]} : vector<1x7xf32> to vector<1x6xf32>
    %173 = vector.extract_strided_slice %171 {offsets = [0, 6], sizes = [1, 1], strides = [1, 1]} : vector<1x7xf32> to vector<1x1xf32>
    %cst_38 = arith.constant dense<0xFF800000> : vector<1xf32>
    %174 = vector.multi_reduction <maximumf>, %172, %cst_38 [1] : vector<1x6xf32> to vector<1xf32>
    %175 = vector.shape_cast %174 : vector<1xf32> to vector<1x1xf32>
    %176 = vector.broadcast %175 : vector<1x1xf32> to vector<1x6xf32>
    %177 = arith.subf %172, %176 : vector<1x6xf32>
    %178 = math.exp %177 : vector<1x6xf32>
    %cst_39 = arith.constant dense<0.000000e+00> : vector<1xf32>
    %179 = vector.multi_reduction <add>, %178, %cst_39 [1] : vector<1x6xf32> to vector<1xf32>
    %180 = vector.shape_cast %179 : vector<1xf32> to vector<1x1xf32>
    %181 = math.log %180 : vector<1x1xf32>
    %182 = vector.broadcast %181 : vector<1x1xf32> to vector<1x6xf32>
    %183 = arith.subf %177, %182 : vector<1x6xf32>
    %184 = vector.broadcast %180 : vector<1x1xf32> to vector<1x6xf32>
    %185 = arith.divf %178, %184 : vector<1x6xf32>
    %186 = arith.mulf %185, %183 : vector<1x6xf32>
    %cst_40 = arith.constant dense<0.000000e+00> : vector<1xf32>
    %187 = vector.multi_reduction <add>, %186, %cst_40 [1] : vector<1x6xf32> to vector<1xf32>
    %188 = vector.shape_cast %187 : vector<1xf32> to vector<1x1xf32>
    %cst_41 = arith.constant 0.000000e+00 : f32
    %189 = vector.broadcast %cst_41 : f32 to vector<1x1xf32>
    %190 = arith.subf %189, %188 : vector<1x1xf32>
    %c0_42 = arith.constant 0 : index
    %c0_43 = arith.constant 0 : index
    %c0_44 = arith.constant 0 : index
    %191 = vector.load %arg10[%c0_42, %c0_43, %c0_44] : memref<1x1x6xf32, #tpu.memory_space<vmem>>, vector<1x1x6xf32>
    %192 = vector.shape_cast %191 : vector<1x1x6xf32> to vector<1x6xf32>
    %193 = arith.addf %172, %192 : vector<1x6xf32>
    %cst_45 = arith.constant dense<0xFF800000> : vector<1xf32>
    %194 = vector.multi_reduction <maximumf>, %193, %cst_45 [1] : vector<1x6xf32> to vector<1xf32>
    %195 = vector.shape_cast %194 : vector<1xf32> to vector<1x1xf32>
    %196 = tpu.iota {dimensions = array<i32: 1>} : vector<1x6xi32>
    %197 = vector.broadcast %195 : vector<1x1xf32> to vector<1x6xf32>
    %198 = arith.cmpf oge, %193, %197 : vector<1x6xf32>
    %c6_i32 = arith.constant 6 : i32
    %199 = vector.broadcast %c6_i32 : i32 to vector<1x6xi32>
    %200 = arith.select %198, %196, %199 : vector<1x6xi1>, vector<1x6xi32>
    %cst_46 = arith.constant dense<2147483647> : vector<1xi32>
    %201 = vector.multi_reduction <minsi>, %200, %cst_46 [1] : vector<1x6xi32> to vector<1xi32>
    %202 = vector.shape_cast %201 : vector<1xi32> to vector<1x1xi32>
    %203 = vector.broadcast %202 : vector<1x1xi32> to vector<1x6xi32>
    %204 = arith.cmpi eq, %196, %203 : vector<1x6xi32>
    %cst_47 = arith.constant 0.000000e+00 : f32
    %205 = vector.broadcast %cst_47 : f32 to vector<1x6xf32>
    %206 = arith.select %204, %183, %205 : vector<1x6xi1>, vector<1x6xf32>
    %cst_48 = arith.constant dense<0.000000e+00> : vector<1xf32>
    %207 = vector.multi_reduction <add>, %206, %cst_48 [1] : vector<1x6xf32> to vector<1xf32>
    %208 = vector.shape_cast %207 : vector<1xf32> to vector<1x1xf32>
    %209 = tpu.iota {dimensions = array<i32: 1>} : vector<1x8xi32>
    %c0_i32 = arith.constant 0 : i32
    %210 = vector.broadcast %c0_i32 : i32 to vector<1x8xi32>
    %211 = arith.cmpi eq, %209, %210 : vector<1x8xi32>
    %212 = arith.sitofp %202 : vector<1x1xi32> to vector<1x1xf32>
    %cst_49 = arith.constant 0.000000e+00 : f32
    %213 = vector.shape_cast %212 : vector<1x1xf32> to vector<1x1xf32>
    %214 = vector.broadcast %213 : vector<1x1xf32> to vector<1x8xf32>
    %215 = vector.broadcast %cst_49 : f32 to vector<1x8xf32>
    %216 = arith.select %211, %214, %215 : vector<1x8xi1>, vector<1x8xf32>
    %c1_i32 = arith.constant 1 : i32
    %217 = vector.broadcast %c1_i32 : i32 to vector<1x8xi32>
    %218 = arith.cmpi eq, %209, %217 : vector<1x8xi32>
    %cst_50 = arith.constant 0.000000e+00 : f32
    %219 = vector.shape_cast %208 : vector<1x1xf32> to vector<1x1xf32>
    %220 = vector.broadcast %219 : vector<1x1xf32> to vector<1x8xf32>
    %221 = vector.broadcast %cst_50 : f32 to vector<1x8xf32>
    %222 = arith.select %218, %220, %221 : vector<1x8xi1>, vector<1x8xf32>
    %223 = arith.addf %216, %222 : vector<1x8xf32>
    %c2_i32 = arith.constant 2 : i32
    %224 = vector.broadcast %c2_i32 : i32 to vector<1x8xi32>
    %225 = arith.cmpi eq, %209, %224 : vector<1x8xi32>
    %cst_51 = arith.constant 0.000000e+00 : f32
    %226 = vector.shape_cast %190 : vector<1x1xf32> to vector<1x1xf32>
    %227 = vector.broadcast %226 : vector<1x1xf32> to vector<1x8xf32>
    %228 = vector.broadcast %cst_51 : f32 to vector<1x8xf32>
    %229 = arith.select %225, %227, %228 : vector<1x8xi1>, vector<1x8xf32>
    %230 = arith.addf %223, %229 : vector<1x8xf32>
    %c3_i32 = arith.constant 3 : i32
    %231 = vector.broadcast %c3_i32 : i32 to vector<1x8xi32>
    %232 = arith.cmpi eq, %209, %231 : vector<1x8xi32>
    %cst_52 = arith.constant 0.000000e+00 : f32
    %233 = vector.shape_cast %173 : vector<1x1xf32> to vector<1x1xf32>
    %234 = vector.broadcast %233 : vector<1x1xf32> to vector<1x8xf32>
    %235 = vector.broadcast %cst_52 : f32 to vector<1x8xf32>
    %236 = arith.select %232, %234, %235 : vector<1x8xi1>, vector<1x8xf32>
    %237 = arith.addf %230, %236 : vector<1x8xf32>
    %238 = vector.shape_cast %237 : vector<1x8xf32> to vector<1x1x8xf32>
    %c0_53 = arith.constant 0 : index
    %c0_54 = arith.constant 0 : index
    %c0_55 = arith.constant 0 : index
    %239 = vector.load %arg11[%c0_53, %c0_54, %c0_55] : memref<1x1x8xf32, #tpu.memory_space<vmem>>, vector<1x1x8xf32>
    tpu.vector_store %arg11[%c0_53, %c0_54, %c0_55], %238 {strides = array<i32>} : memref<1x1x8xf32, #tpu.memory_space<vmem>>, vector<1x1x8xf32>,
    return
  }
  func.func @transform_0(%arg0: i32) -> (i32, i32, i32, i32) {
    %c0_i32 = arith.constant 0 : i32
    %c0_i32_0 = arith.constant 0 : i32
    %c0_i32_1 = arith.constant 0 : i32
    %c0_i32_2 = arith.constant 0 : i32
    return %arg0, %c0_i32, %c0_i32_0, %c0_i32_1 : i32, i32, i32, i32
  }
  func.func @transform_1(%arg0: i32) -> (i32, i32, i32) {
    %c0_i32 = arith.constant 0 : i32
    %c0_i32_0 = arith.constant 0 : i32
    %c0_i32_1 = arith.constant 0 : i32
    %c0_i32_2 = arith.constant 0 : i32
    return %c0_i32, %c0_i32_0, %c0_i32_1 : i32, i32, i32
  }
  func.func @transform_2(%arg0: i32) -> (i32, i32) {
    %c0_i32 = arith.constant 0 : i32
    %c0_i32_0 = arith.constant 0 : i32
    %c0_i32_1 = arith.constant 0 : i32
    return %c0_i32, %c0_i32_0 : i32, i32
  }
  func.func @transform_3(%arg0: i32) -> (i32, i32, i32) {
    %c0_i32 = arith.constant 0 : i32
    %c0_i32_0 = arith.constant 0 : i32
    %c0_i32_1 = arith.constant 0 : i32
    %c0_i32_2 = arith.constant 0 : i32
    return %c0_i32, %c0_i32_0, %c0_i32_1 : i32, i32, i32
  }
  func.func @transform_4(%arg0: i32) -> (i32, i32) {
    %c0_i32 = arith.constant 0 : i32
    %c0_i32_0 = arith.constant 0 : i32
    %c0_i32_1 = arith.constant 0 : i32
    return %c0_i32, %c0_i32_0 : i32, i32
  }
  func.func @transform_5(%arg0: i32) -> (i32, i32) {
    %c0_i32 = arith.constant 0 : i32
    %c0_i32_0 = arith.constant 0 : i32
    %c0_i32_1 = arith.constant 0 : i32
    return %c0_i32, %c0_i32_0 : i32, i32
  }
  func.func @transform_6(%arg0: i32) -> (i32, i32) {
    %c0_i32 = arith.constant 0 : i32
    %c0_i32_0 = arith.constant 0 : i32
    %c0_i32_1 = arith.constant 0 : i32
    return %c0_i32, %c0_i32_0 : i32, i32
  }
  func.func @transform_7(%arg0: i32) -> (i32, i32) {
    %c0_i32 = arith.constant 0 : i32
    %c0_i32_0 = arith.constant 0 : i32
    %c0_i32_1 = arith.constant 0 : i32
    return %c0_i32, %c0_i32_0 : i32, i32
  }
  func.func @transform_8(%arg0: i32) -> (i32, i32) {
    %c0_i32 = arith.constant 0 : i32
    %c0_i32_0 = arith.constant 0 : i32
    %c0_i32_1 = arith.constant 0 : i32
    return %c0_i32, %c0_i32_0 : i32, i32
  }
  func.func @transform_9(%arg0: i32) -> (i32, i32, i32) {
    %c0_i32 = arith.constant 0 : i32
    %c0_i32_0 = arith.constant 0 : i32
    %c0_i32_1 = arith.constant 0 : i32
    return %arg0, %c0_i32, %c0_i32_0 : i32, i32, i32
  }
  func.func @transform_10(%arg0: i32) -> (i32, i32, i32) {
    %c0_i32 = arith.constant 0 : i32
    %c0_i32_0 = arith.constant 0 : i32
    %c0_i32_1 = arith.constant 0 : i32
    return %arg0, %c0_i32, %c0_i32_0 : i32, i32, i32
  }
}

</mosaic_0001>

<bundles_post_ra>
// kernel: ppo_atari_forward.2
= control target key start
LH: loop header
LB: loop body
LE: loop exit
PB: predicated region body
PF: predicated region fallthrough
CT: control target
= control target key end

     0   :  { %s2341_s12 = smov 0   ;;  %s2786_s0 = inlined_call_operand.vmem [shape: bf16[2,16,16,64], index: 0, kind: input, shape index: {}]   ;;  %s2787_s1 = inlined_call_operand.vmem [shape: bf16[4,64,32], index: 1, kind: input, shape index: {}]   ;;  %s2788_s2 = inlined_call_operand.vmem [shape: f32[1,32], index: 2, kind: input, shape index: {}]   ;;  %s2789_s3 = inlined_call_operand.vmem [shape: bf16[2,16,16,32], index: 3, kind: output, shape index: {}]  }
   0x1 LB: > { %s1731_s13 = sadd.s32 4294967295, %s2319_s12   ;;  %p1735_p0 = scmp.ge.s32.totalorder %s2319_s12, 1  ;;  %s2319_s12 = sphi %s2341_s12, %s13_s12  }
   0x2   : > { %p137_p1 = scmp.lt.s32.totalorder %s2319_s12, 3 }
   0x4   : > { %p138_p2 = pnand %p1735_p0, %p137_p1 }
   0x5   : > { %v2265_v0 = vld [vmem:[%s2787_s1 + $0x20] sm:$0xff] (!%p138_p2)   ;;  %p161_p3 = scmp.lt.s32.totalorder (!%p138_p2), %s1731_s13, 1  ;;  %v2267_v2 = vld [vmem:[%s2787_s1 + $0x28] sm:$0xff] (!%p138_p2)   ;;  %v2269_v4 = vld [vmem:[%s2787_s1 + $0x30] sm:$0xff] (!%p138_p2)   ;;  %vm540_vm0 = vcmask (!%p138_p2), 1047552   ;;  %vm583_vm1 = vcmask (!%p138_p2), 523264  }
   0x6   : > { %141 = sbr.rel (%p138_p2) target bundleno = 371 (0x173), region = 32  ;;  %v2266_v1 = vld [vmem:[%s2787_s1 + $0x40] sm:$0xff] (!%p138_p2)   ;;  %2001 = vmatprep.subr.bf16.mxu1 (!%p138_p2), %v2265_v0  ;;  %v2268_v3 = vld [vmem:[%s2787_s1 + $0x48] sm:$0xff] (!%p138_p2)   ;;  %v2270_v5 = vld [vmem:[%s2787_s1 + $0x50] sm:$0xff] (!%p138_p2)   ;;  %vm541_vm2 = vsmask.f32 (!%p138_p2), 7424 }
   0x7   : > { %2081 = vmatprep.subr.bf16.mxu0 (!%p138_p2), %v2266_v1  ;;  %2002 = vmatpush3.bf16.msra.mxu1 (!%p138_p2), %v2265_v0  ;;  %v2271_v6 = vld [vmem:[%s2787_s1 + $0x38] sm:$0xff] (!%p138_p2)   ;;  %v2277_v19 = vld [vmem:[%s2787_s1] sm:$0xff] (!%p138_p2)   ;;  %vm2409_vm3 = vmand (!%p138_p2), %vm540_vm0, %vm541_vm2  ;;  %vm1643_vm4 = vcmask (!%p138_p2), 257024  }
   0x8   : > { %2082 = vmatpush3.bf16.msra.mxu0 (!%p138_p2), %v2266_v1  ;;  %2003 = vmatprep.subr.bf16.mxu1 (!%p138_p2), %v2267_v2  ;;  %v2272_v9 = vld [vmem:[%s2787_s1 + $0x58] sm:$0xff] (!%p138_p2)   ;;  %v2279_v25 = vld [vmem:[%s2787_s1 + $0x60] sm:$0xff] (!%p138_p2)   ;;  %v2287_v47 = vld [vmem:[%s2787_s1 + $0x8] sm:$0xff] (!%p138_p2)  }
   0x9   : > { %2083 = vmatprep.subr.bf16.mxu0 (!%p138_p2), %v2268_v3  ;;  %v2289_v57 = vld [vmem:[%s2787_s1 + $0x68] sm:$0xff] (!%p138_p2)   ;;  %v2297_v63 = vld [vmem:[%s2787_s1 + $0x10] sm:$0xff] (!%p138_p2)  }
   0xb   : > { %2004 = vmatpush3.bf16.msra.mxu1 (!%p138_p2), %v2267_v2 }
   0xc   : > { %2084 = vmatpush3.bf16.msra.mxu0 (!%p138_p2), %v2268_v3  ;;  %2005 = vmatprep.subr.bf16.mxu1 (!%p138_p2), %v2269_v4 }
   0xd   : > { %s2793_s13 = smov (!%p161_p3, %s1731_s13), 1  ;;  %2085 = vmatprep.subr.bf16.mxu0 %v2270_v5 }
   0xe   : > { %s1887_s24 = sshll.u32 %s2793_s13, 7 }
   0xf   : > { %s2375_s29 = scalar_lea.vmem %s2786_s0, %s1887_s24  ;;  %2006 = vmatpush3.bf16.msra.mxu1 %v2269_v4  ;;  %s2688_s30 = scalar_lea.vmem %s2789_s3, %s1887_s24 }
  0x10   : > { %v172_v7 = vld [vmem:[%s2375_s29] sm:$0xf]  ;;  %v173_v8 = vld [vmem:[%s2375_s29 + $0x4] sm:$0xf]  ;;  %v174_v12 = vld [vmem:[%s2375_s29 + $0x8] sm:$0xf]  ;;  %2086 = vmatpush3.bf16.msra.mxu0 %v2270_v5  ;;  %2007 = vmatprep.subr.bf16.mxu1 %v2271_v6 }
  0x11   : > { %v2385_v10 = vcombine.low %v172_v7, %v173_v8  ;;  %v1756_v11 = vcombine.low %v172_v7, %v172_v7  ;;  %v175_v13 = vld [vmem:[%s2375_s29 + $0xc] sm:$0xf]  ;;  %v1757_v15 = vcombine.low %v174_v12, %v174_v12  ;;  %v176_v20 = vld [vmem:[%s2375_s29 + $0x10] sm:$0xf]  ;;  %v177_v24 = vld [vmem:[%s2375_s29 + $0x14] sm:$0xf]  ;;  %2087 = vmatprep.subr.bf16.mxu0 %v2272_v9 }
  0x12   : > { %v2389_v14 = vcombine.low %v174_v12, %v175_v13  ;;  %v1758_v26 = vcombine.low %v176_v20, %v176_v20  ;;  %v2405_v29 = vcombine.low %v176_v20, %v177_v24  ;;  %v178_v34 = vld [vmem:[%s2375_s29 + $0x18] sm:$0xf]  ;;  %v179_v38 = vld [vmem:[%s2375_s29 + $0x1c] sm:$0xf]  ;;  %v180_v40 = vld [vmem:[%s2375_s29 + $0x20] sm:$0xf] }
  0x13   : > { %v317_v16 = vshrl.u32 %v2385_v10, 16  ;;  %v319_v17 = vshll.u32 %v2385_v10, 16  ;;  %v461_v18 = vshll.u32 %v1756_v11, 16  ;;  %v465_v23 = vshll.u32 %v1757_v15, 16  ;;  %2008 = vmatpush3.bf16.msra.mxu1 %v2271_v6  ;;  %v181_v44 = vld [vmem:[%s2375_s29 + $0x24] sm:$0xf] }
  0x14   : > { %v324_v21 = vshrl.u32 %v2389_v14, 16  ;;  %v326_v22 = vshll.u32 %v2389_v14, 16  ;;  %2089 = vmatprep.mubr.msk.bf16.mxu0 %vm583_vm1, %v2389_v14  ;;  %v469_v33 = vshll.u32 %v1758_v26, 16  ;;  %v331_v36 = vshrl.u32 %v2405_v29, 16  ;;  %2088 = vmatpush3.bf16.msra.mxu0 %v2272_v9  ;;  %v182_v46 = vld [vmem:[%s2375_s29 + $0x28] sm:$0xf] }
  0x15   : > { %v321_v27 = vrot.slane %v319_v17, 1  ;;  %v463_v28 = vrot.slane %v461_v18, 1  ;;  %v467_v32 = vrot.slane %v465_v23, 1  ;;  %v333_v37 = vshll.u32 %v2405_v29, 16  ;;  %2041 = vmatprep.subr.bf16.mxu1 %v2277_v19  ;;  %2121 = vmatprep.subr.bf16.mxu0 %v2279_v25  ;;  %v183_v52 = vld [vmem:[%s2375_s29 + $0x2c] sm:$0xf] }
  0x16   : > { %v328_v31 = vrot.slane %v326_v22, 1  ;;  %v1759_v39 = vcombine.low %v178_v34, %v178_v34  ;;  %v471_v42 = vrot.slane %v469_v33, 1  ;;  %v2418_v43 = vcombine.low %v178_v34, %v179_v38  ;;  %v184_v62 = vld [vmem:[%s2375_s29 + $0x30] sm:$0xf]  ;;  %v185_v4 = vld [vmem:[%s2375_s29 + $0x34] sm:$0xf] }
  0x17   : > { %v322_v35 = vor.u32 %v321_v27, %v317_v16  ;;  %v1760_v45 = vcombine.low %v180_v40, %v180_v40  ;;  %v335_v49 = vrot.slane %v333_v37, 1  ;;  %v2429_v51 = vcombine.low %v180_v40, %v181_v44  ;;  %2090 = vmatmul.mubr.msk.bf16.vlgmr.msra.gmra.mrb[0].mxu0 %vm583_vm1, %v2405_v29  ;;  %v186_v9 = vld [vmem:[%s2375_s29 + $0x38] sm:$0xf]  ;;  %v2299_v11 = vld [vmem:[%s2787_s1 + $0x70] sm:$0xff]   ;;  %v187_v15 = vld [vmem:[%s2375_s29 + $0x3c] sm:$0xf] }
  0x18   : > { %v329_v41 = vor.u32 %v328_v31, %v324_v21  ;;  %v473_v50 = vshll.u32 %v1759_v39, 16  ;;  %v338_v54 = vshrl.u32 %v2418_v43, 16  ;;  %v340_v55 = vshll.u32 %v2418_v43, 16  ;;  %2122 = vmatpush3.bf16.msra.mxu0 %v2279_v25  ;;  %2093 = vmatprep.mubr.msk.bf16.mxu0 %vm583_vm1, %v2418_v43  ;;  %v189_v24 = vld [vmem:[%s2375_s29 + $0x44] sm:$0xf]  ;;  %v2309_v33 = vld [vmem:[%s2787_s1 + $0x78] sm:$0xff]  }
  0x19   : > { %v2427_v48 = vsel %vm2409_vm3, %v322_v35, %v463_v28  ;;  %v477_v56 = vshll.u32 %v1760_v45, 16  ;;  %v336_v58 = vor.u32 %v335_v49, %v331_v36  ;;  %v345_v60 = vshrl.u32 %v2429_v51, 16  ;;  %2123 = vmatprep.subr.bf16.mxu0 %v2289_v57  ;;  %v190_v34 = vld [vmem:[%s2375_s29 + $0x48] sm:$0xf]  ;;  %v191_v39 = vld [vmem:[%s2375_s29 + $0x4c] sm:$0xf] }
  0x1a   : > { %2009 = vmatprep.mubr.msk.bf16.mxu1 %vm583_vm1, %v2427_v48  ;;  %v2436_v53 = vsel %vm2409_vm3, %v329_v41, %v467_v32  ;;  %v475_v59 = vrot.slane %v473_v50, 1  ;;  %v347_v61 = vshll.u32 %v2429_v51, 16  ;;  %v342_v0 = vrot.slane %v340_v55, 1  ;;  %v2307_v32 = vld [vmem:[%s2787_s1 + $0x18] sm:$0xff]   ;;  %v192_v45 = vld [vmem:[%s2375_s29 + $0x50] sm:$0xf] }
  0x1b   : > { %2010 = vmatmul.mubr.msk.bf16.vlgmr.msra.gmra.mrb[0].mxu1 %vm583_vm1, %v2436_v53  ;;  %v479_v1 = vrot.slane %v477_v56, 1  ;;  %v2453_v2 = vcombine.low %v182_v46, %v183_v52  ;;  %v1761_v3 = vcombine.low %v182_v46, %v182_v46  ;;  %v2458_v5 = vsel %vm2409_vm3, %v336_v58, %v471_v42  ;;  %v193_v46 = vld [vmem:[%s2375_s29 + $0x54] sm:$0xf] }
  0x1c   : > { %2042 = vmatpush3.bf16.msra.mxu1 %v2277_v19  ;;  %v349_v6 = vrot.slane %v347_v61, 1  ;;  %v2462_v7 = vcombine.low %v184_v62, %v185_v4  ;;  %v1762_v8 = vcombine.low %v184_v62, %v184_v62  ;;  %2013 = vmatprep.mubr.msk.bf16.mxu1 %vm583_vm1, %v2458_v5  ;;  %v343_v12 = vor.u32 %v342_v0, %v338_v54  ;;  %v188_v19 = vld [vmem:[%s2375_s29 + $0x40] sm:$0xf] }
  0x1d   : > { %2043 = vmatprep.subr.bf16.mxu1 %v2287_v47  ;;  %v354_v13 = vshll.u32 %v2453_v2, 16  ;;  %v352_v17 = vshrl.u32 %v2453_v2, 16  ;;  %v481_v22 = vshll.u32 %v1761_v3, 16  ;;  %2124 = vmatpush3.bf16.msra.mxu0 %v2289_v57  ;;  %v2479_v23 = vcombine.low %v186_v9, %v187_v15 }
  0x1e   : > { %v350_v16 = vor.u32 %v349_v6, %v345_v60  ;;  %v361_v18 = vshll.u32 %v2462_v7, 16  ;;  %v2477_v20 = vsel %vm2409_vm3, %v343_v12, %v475_v59  ;;  %v359_v26 = vshrl.u32 %v2462_v7, 16  ;;  %2125 = vmatprep.subr.bf16.mxu0 %v2299_v11  ;;  %v194_v6 = vld [vmem:[%s2375_s29 + $0x58] sm:$0xf] }
  0x1f   : > { %v356_v21 = vrot.slane %v354_v13, 1  ;;  %v485_v28 = vshll.u32 %v1762_v8, 16  ;;  %v2487_v31 = vcombine.low %v188_v19, %v189_v24  ;;  %2094 = vmatmul.mubr.msk.bf16.gmra.mrb[4].mxu0 %vm583_vm1, %v2429_v51  ;;  %v483_v36 = vrot.slane %v481_v22, 1  ;;  %v195_v8 = vld [vmem:[%s2375_s29 + $0x5c] sm:$0xf] }
  0x20   : > { %2044 = vmatpush3.bf16.msra.mxu1 %v2287_v47  ;;  %v2484_v25 = vsel %vm2409_vm3, %v350_v16, %v479_v1  ;;  %v363_v27 = vrot.slane %v361_v18, 1  ;;  %2097 = vmatprep.mubr.msk.bf16.mxu0 %vm583_vm1, %v2453_v2  ;;  %v368_v37 = vshll.u32 %v2479_v23, 16  ;;  %v1763_v38 = vcombine.low %v186_v9, %v186_v9  ;;  %v196_v9 = vld [vmem:[%s2375_s29 + $0x60] sm:$0xf] }
  0x21   : > { %2045 = vmatprep.subr.bf16.mxu1 %v2297_v63  ;;  %v357_v35 = vor.u32 %v356_v21, %v352_v17  ;;  %v487_v41 = vrot.slane %v485_v28, 1  ;;  %v375_v42 = vshll.u32 %v2487_v31, 16  ;;  %v1764_v44 = vcombine.low %v188_v19, %v188_v19  ;;  %2126 = vmatpush3.bf16.msra.mxu0 %v2299_v11  ;;  %v197_v11 = vld [vmem:[%s2375_s29 + $0x64] sm:$0xf] }
  0x22   : > { %v364_v40 = vor.u32 %v363_v27, %v359_v26  ;;  %2127 = vmatprep.subr.bf16.mxu0 %v2309_v33  ;;  %v366_v47 = vshrl.u32 %v2479_v23, 16  ;;  %v2510_v49 = vcombine.low %v190_v34, %v191_v39  ;;  %v370_v52 = vrot.slane %v368_v37, 1  ;;  %v198_v37 = vld [vmem:[%s2375_s29 + $0x68] sm:$0xf]  ;;  %v200_v39 = vld [vmem:[%s2375_s29 + $0x70] sm:$0xf] }
  0x23   : > { %2014 = vmatmul.mubr.msk.bf16.gmra.mrb[4].mxu1 %vm583_vm1, %v2477_v20  ;;  %v2514_v50 = vsel %vm2409_vm3, %v357_v35, %v483_v36  ;;  %v489_v54 = vshll.u32 %v1763_v38, 16  ;;  %v373_v55 = vshrl.u32 %v2487_v31, 16  ;;  %v377_v57 = vrot.slane %v375_v42, 1  ;;  %v199_v38 = vld [vmem:[%s2375_s29 + $0x6c] sm:$0xf] }
  0x24   : > { %2017 = vmatprep.mubr.msk.bf16.mxu1 %vm583_vm1, %v2484_v25  ;;  %2046 = vmatpush3.bf16.msra.mxu1 %v2297_v63  ;;  %v2519_v56 = vsel %vm2409_vm3, %v364_v40, %v487_v41  ;;  %v493_v58 = vshll.u32 %v1764_v44, 16  ;;  %v2521_v59 = vcombine.low %v192_v45, %v193_v46  ;;  %v382_v60 = vshll.u32 %v2510_v49, 16  ;;  %v201_v40 = vld [vmem:[%s2375_s29 + $0x74] sm:$0xf] }
  0x25   : > { %2047 = vmatprep.subr.bf16.mxu1 %v2307_v32  ;;  %2128 = vmatpush3.bf16.msra.mxu0 %v2309_v33  ;;  %v1765_v61 = vcombine.low %v190_v34, %v190_v34  ;;  %v371_v62 = vor.u32 %v370_v52, %v366_v47  ;;  %v491_v63 = vrot.slane %v489_v54, 1  ;;  %v378_v0 = vor.u32 %v377_v57, %v373_v55 }
  0x26   : > { %v495_v1 = vrot.slane %v493_v58, 1  ;;  %v389_v3 = vshll.u32 %v2521_v59, 16  ;;  %v1766_v4 = vcombine.low %v192_v45, %v192_v45  ;;  %v380_v12 = vshrl.u32 %v2510_v49, 16 }
  0x27   : > { %2098 = vmatmul.mubr.msk.bf16.gmra.mrb[8].mxu0 %vm583_vm1, %v2462_v7  ;;  %v384_v13 = vrot.slane %v382_v60, 1  ;;  %v497_v15 = vshll.u32 %v1765_v61, 16  ;;  %v2540_v16 = vsel %vm2409_vm3, %v371_v62, %v491_v63  ;;  %v387_v17 = vshrl.u32 %v2521_v59, 16 }
  0x28   : > { %2048 = vmatpush3.bf16.msra.mxu1 %v2307_v32  ;;  %2101 = vmatprep.mubr.msk.bf16.mxu0 %vm583_vm1, %v2479_v23  ;;  %v2543_v18 = vcombine.low %v194_v6, %v195_v8  ;;  %v2547_v19 = vsel %vm2409_vm3, %v378_v0, %v495_v1  ;;  %v391_v21 = vrot.slane %v389_v3, 1  ;;  %v501_v22 = vshll.u32 %v1766_v4, 16  ;;  %v202_v4 = vld [vmem:[%s2375_s29 + $0x78] sm:$0xf] }
  0x29   : > { %v2549_v24 = vcombine.low %v196_v9, %v197_v11  ;;  %v385_v26 = vor.u32 %v384_v13, %v380_v12  ;;  %v499_v27 = vrot.slane %v497_v15, 1  ;;  %v1767_v32 = vcombine.low %v194_v6, %v194_v6  ;;  %v203_v6 = vld [vmem:[%s2375_s29 + $0x7c] sm:$0xf] }
  0x2a   : > { %v396_v28 = vshll.u32 %v2543_v18, 16  ;;  %v392_v33 = vor.u32 %v391_v21, %v387_v17  ;;  %v503_v34 = vrot.slane %v501_v22, 1  ;;  %v1768_v36 = vcombine.low %v196_v9, %v196_v9 }
  0x2b   : > { %2018 = vmatmul.mubr.msk.bf16.gmra.mrb[8].mxu1 %vm583_vm1, %v2514_v50  ;;  %v403_v35 = vshll.u32 %v2549_v24, 16  ;;  %v2567_v41 = vsel %vm2409_vm3, %v385_v26, %v499_v27  ;;  %v394_v42 = vshrl.u32 %v2543_v18, 16  ;;  %v505_v45 = vshll.u32 %v1767_v32, 16 }
  0x2c   : > { %2021 = vmatprep.mubr.msk.bf16.mxu1 %vm583_vm1, %v2519_v56  ;;  %v398_v44 = vrot.slane %v396_v28, 1  ;;  %v401_v46 = vshrl.u32 %v2549_v24, 16  ;;  %v2571_v47 = vcombine.low %v198_v37, %v199_v38  ;;  %v2575_v52 = vsel %vm2409_vm3, %v392_v33, %v503_v34 }
  0x2d   : > { %v405_v54 = vrot.slane %v403_v35, 1  ;;  %v509_v55 = vshll.u32 %v1768_v36, 16  ;;  %v2577_v57 = vcombine.low %v200_v39, %v201_v40  ;;  %v507_v60 = vrot.slane %v505_v45, 1 }
  0x2e   : > { %v399_v58 = vor.u32 %v398_v44, %v394_v42  ;;  %v410_v61 = vshll.u32 %v2571_v47, 16  ;;  %v1769_v62 = vcombine.low %v198_v37, %v198_v37  ;;  %v1770_v3 = vcombine.low %v200_v39, %v200_v39 }
  0x2f   : > { %2102 = vmatmul.mubr.msk.bf16.gmra.mrb[12].mxu0 %vm583_vm1, %v2487_v31  ;;  %v406_v63 = vor.u32 %v405_v54, %v401_v46  ;;  %v511_v0 = vrot.slane %v509_v55, 1  ;;  %v417_v1 = vshll.u32 %v2577_v57, 16  ;;  %v408_v8 = vshrl.u32 %v2571_v47, 16 }
  0x30   : > { %2105 = vmatprep.mubr.msk.bf16.mxu0 %vm583_vm1, %v2510_v49  ;;  %v554_v9 = vsel %vm2409_vm3, %v399_v58, %v507_v60  ;;  %v412_v11 = vrot.slane %v410_v61, 1  ;;  %v513_v12 = vshll.u32 %v1769_v62, 16  ;;  %v1755_v13 = vcombine.low %v202_v4, %v203_v6 }
  0x31   : > { %v555_v15 = vsel %vm2409_vm3, %v406_v63, %v511_v0  ;;  %v415_v17 = vshrl.u32 %v2577_v57, 16  ;;  %v419_v21 = vrot.slane %v417_v1, 1  ;;  %v517_v22 = vshll.u32 %v1770_v3, 16 }
  0x32   : > { %v413_v26 = vor.u32 %v412_v11, %v408_v8  ;;  %v515_v27 = vrot.slane %v513_v12, 1  ;;  %v424_v28 = vshll.u32 %v1755_v13, 16  ;;  %v1771_v32 = vcombine.low %v202_v4, %v202_v4 }
  0x33   : > { %2022 = vmatmul.mubr.msk.bf16.gmra.mrb[12].mxu1 %vm583_vm1, %v2540_v16  ;;  %v420_v33 = vor.u32 %v419_v21, %v415_v17  ;;  %v519_v34 = vrot.slane %v517_v22, 1  ;;  %v422_v36 = vshrl.u32 %v1755_v13, 16 }
  0x34   : > { %2025 = vmatprep.mubr.msk.bf16.mxu1 %vm583_vm1, %v2547_v19  ;;  %v556_v35 = vsel %vm2409_vm3, %v413_v26, %v515_v27  ;;  %v426_v37 = vrot.slane %v424_v28, 1  ;;  %v521_v38 = vshll.u32 %v1771_v32, 16 }
  0x35   : > { %v557_v39 = vsel %vm2409_vm3, %v420_v33, %v519_v34 }
  0x36   : > { %v427_v40 = vor.u32 %v426_v37, %v422_v36  ;;  %v523_v42 = vrot.slane %v521_v38, 1 }
  0x37   : > { %2106 = vmatmul.mubr.msk.bf16.gmra.mrb[16].mxu0 %vm583_vm1, %v2521_v59 }
  0x38   : > { %2109 = vmatprep.mubr.msk.bf16.mxu0 %vm583_vm1, %v2543_v18  ;;  %v558_v44 = vsel %vm2409_vm3, %v427_v40, %v523_v42 }
  0x3b   : > { %2026 = vmatmul.mubr.msk.bf16.gmra.mrb[16].mxu1 %vm583_vm1, %v2567_v41 }
  0x3c   : > { %2029 = vmatprep.mubr.msk.bf16.mxu1 %vm583_vm1, %v2575_v52 }
  0x3f   : > { %2110 = vmatmul.mubr.msk.bf16.gmra.mrb[20].mxu0 %vm583_vm1, %v2549_v24 }
  0x40   : > { %2113 = vmatprep.mubr.msk.bf16.mxu0 %vm583_vm1, %v2571_v47 }
  0x43   : > { %2030 = vmatmul.mubr.msk.bf16.gmra.mrb[20].mxu1 %vm583_vm1, %v554_v9 }
  0x44   : > { %2033 = vmatprep.mubr.msk.bf16.mxu1 %vm583_vm1, %v555_v15 }
  0x47   : > { %2114 = vmatmul.mubr.msk.bf16.gmra.mrb[24].mxu0 %vm583_vm1, %v2577_v57 }
  0x48   : > { %2117 = vmatprep.mubr.msk.bf16.mxu0 %vm583_vm1, %v1755_v13 }
  0x4b   : > { %2034 = vmatmul.mubr.msk.bf16.gmra.mrb[24].mxu1 %vm583_vm1, %v556_v35 }
  0x4c   : > { %2037 = vmatprep.mubr.msk.bf16.mxu1 %vm583_vm1, %v557_v39 }
  0x4f   : > { %2118 = vmatmul.mubr.msk.bf16.gmra.mrb[28].mxu0 %vm583_vm1, %v2385_v10 }
  0x50   : > { %2129 = vmatprep.mubr.msk.bf16.mxu0 %vm583_vm1, %v2436_v53 }
  0x53   : > { %2038 = vmatmul.mubr.msk.bf16.gmra.mrb[28].mxu1 %vm583_vm1, %v558_v44 }
  0x54   : > { %2049 = vmatprep.mubr.msk.bf16.mxu1 %vm583_vm1, %v2385_v10 }
  0x57   : > { %2130 = vmatmul.mubr.msk.bf16.vlgmr.msra.gmra.mrb[0].mxu0 %vm583_vm1, %v2458_v5 }
  0x58   : > { %2133 = vmatprep.mubr.msk.bf16.mxu0 %vm583_vm1, %v2477_v20 }
  0x5b   : > { %2050 = vmatmul.mubr.msk.bf16.vlgmr.msra.gmra.mrb[0].mxu1 %vm583_vm1, %v2389_v14 }
  0x5c   : > { %2053 = vmatprep.mubr.msk.bf16.mxu1 %vm583_vm1, %v2405_v29  ;;  %v2678_v29 = vld [vmem:[%s2788_s2] ss:$0 sm:$0xff] }
  0x5f   : > { %2134 = vmatmul.mubr.msk.bf16.gmra.mrb[4].mxu0 %vm583_vm1, %v2484_v25 }
  0x60   : > { %2137 = vmatprep.mubr.msk.bf16.mxu0 %vm583_vm1, %v2514_v50 }
  0x63   : > { %2054 = vmatmul.mubr.msk.bf16.gmra.mrb[4].mxu1 %vm583_vm1, %v2418_v43 }
  0x64   : > { %2057 = vmatprep.mubr.msk.bf16.mxu1 %vm583_vm1, %v2429_v51 }
  0x67   : > { %2138 = vmatmul.mubr.msk.bf16.gmra.mrb[8].mxu0 %vm583_vm1, %v2519_v56 }
  0x68   : > { %2141 = vmatprep.mubr.msk.bf16.mxu0 %vm583_vm1, %v2540_v16 }
  0x6b   : > { %2058 = vmatmul.mubr.msk.bf16.gmra.mrb[8].mxu1 %vm583_vm1, %v2453_v2 }
  0x6c   : > { %2061 = vmatprep.mubr.msk.bf16.mxu1 %vm583_vm1, %v2462_v7 }
  0x6f   : > { %2142 = vmatmul.mubr.msk.bf16.gmra.mrb[12].mxu0 %vm583_vm1, %v2547_v19 }
  0x70   : > { %2145 = vmatprep.mubr.msk.bf16.mxu0 %vm583_vm1, %v2567_v41 }
  0x73   : > { %2062 = vmatmul.mubr.msk.bf16.gmra.mrb[12].mxu1 %vm583_vm1, %v2479_v23 }
  0x74   : > { %2065 = vmatprep.mubr.msk.bf16.mxu1 %vm583_vm1, %v2487_v31 }
  0x77   : > { %2146 = vmatmul.mubr.msk.bf16.gmra.mrb[16].mxu0 %vm583_vm1, %v2575_v52 }
  0x78   : > { %2149 = vmatprep.mubr.msk.bf16.mxu0 %vm583_vm1, %v554_v9 }
  0x7b   : > { %2066 = vmatmul.mubr.msk.bf16.gmra.mrb[16].mxu1 %vm583_vm1, %v2510_v49 }
  0x7c   : > { %2069 = vmatprep.mubr.msk.bf16.mxu1 %vm583_vm1, %v2521_v59 }
  0x7f   : > { %2150 = vmatmul.mubr.msk.bf16.gmra.mrb[20].mxu0 %vm583_vm1, %v555_v15 }
  0x80   : > { %2153 = vmatprep.mubr.msk.bf16.mxu0 %vm583_vm1, %v556_v35 }
  0x83   : > { %2070 = vmatmul.mubr.msk.bf16.gmra.mrb[20].mxu1 %vm583_vm1, %v2543_v18 }
  0x84   : > { %2073 = vmatprep.mubr.msk.bf16.mxu1 %vm583_vm1, %v2549_v24 }
  0x87   : > { %2154 = vmatmul.mubr.msk.bf16.gmra.mrb[24].mxu0 %vm583_vm1, %v557_v39 }
  0x88   : > { %2157 = vmatprep.mubr.msk.bf16.mxu0 %vm583_vm1, %v558_v44 }
  0x8b   : > { %2074 = vmatmul.mubr.msk.bf16.gmra.mrb[24].mxu1 %vm583_vm1, %v2571_v47 }
  0x8c   : > { %2077 = vmatprep.mubr.msk.bf16.mxu1 %vm583_vm1, %v2577_v57 }
  0x8f   : > { %2158 = vmatmul.mubr.msk.bf16.gmra.mrb[28].mxu0 %vm583_vm1, %v2427_v48 }
  0x93   : > { %2078 = vmatmul.mubr.msk.bf16.gmra.mrb[28].mxu1 %vm583_vm1, %v1755_v13 }
 0x12a   : > { %v2131_v14 = vpop.f32.mrb[0].mxu0 }
 0x12b   : > { %v1285_v51 = vpop.f32.mrb[1].mxu0 }
 0x12c   : > { %v2132_v5 = vpop.f32.mrb[2].mxu0 }
 0x12d   : > { %v1288_v25 = vpop.f32.mrb[3].mxu0 }
 0x12e   : > { %v2051_v10 = vpop.f32.mrb[0].mxu1 }
 0x12f   : > { %v2161_v30 = vadd.f32 %v2131_v14, %v2051_v10  ;;  %v883_v43 = vpop.f32.mrb[1].mxu1 }
 0x130   : > { %v2162_v53 = vadd.f32 %v1285_v51, %v883_v43  ;;  %v2052_v2 = vpop.f32.mrb[2].mxu1 }
 0x131   : > { %v1453_v7 = vadd.f32 %v2161_v30, %v2678_v29  ;;  %v2163_v20 = vadd.f32 %v2132_v5, %v2052_v2  ;;  %v886_v23 = vpop.f32.mrb[3].mxu1 }
 0x132   : > { %v1451_v48 = vadd.f32 %v2162_v53, %v2678_v29  ;;  %v2164_v31 = vadd.f32 %v1288_v25, %v886_v23  ;;  %v2135_v45 = vpop.f32.mrb[4].mxu0 }
 0x133   : > { %v1485_v49 = vmax.f32 %v1453_v7, 0.0  ;;  %v1454_v50 = vadd.f32 %v2163_v20, %v2678_v29  ;;  %v1301_v54 = vpop.f32.mrb[5].mxu0 }
 0x134   : > { %v1483_v56 = vmax.f32 %v1451_v48, 0.0  ;;  %v1452_v59 = vadd.f32 %v2164_v31, %v2678_v29  ;;  %v2136_v60 = vpop.f32.mrb[6].mxu0 }
 0x135   : > { %v1891_v16 = vpack.c.bf16 %v1485_v49, %v1485_v49  ;;  %v1486_v18 = vmax.f32 %v1454_v50, 0.0  ;;  %v1304_v0 = vpop.f32.mrb[7].mxu0 }
 0x136   : > { %v1889_v19 = vpack.c.bf16 %v1483_v56, %v1483_v56  ;;  %v1484_v24 = vmax.f32 %v1452_v59, 0.0  ;;  %v2055_v41 = vpop.f32.mrb[4].mxu1 }
 0x137   : > { %1646 = vst.msk [vmem:[%s2688_s30 + $0x8] sm:$0xf] %vm1643_vm4, %v1891_v16  ;;  %v1892_v46 = vpack.c.bf16 %v1486_v18, %v1486_v18  ;;  %v2165_v47 = vadd.f32 %v2135_v45, %v2055_v41  ;;  %v899_v52 = vpop.f32.mrb[5].mxu1 }
 0x138   : > { %1644 = vst.msk [vmem:[%s2688_s30] sm:$0xf] %vm1643_vm4, %v1889_v19  ;;  %v1890_v55 = vpack.c.bf16 %v1484_v24, %v1484_v24  ;;  %v2166_v57 = vadd.f32 %v1301_v54, %v899_v52  ;;  %v2056_v58 = vpop.f32.mrb[6].mxu1 }
 0x139   : > { %1647 = vst.msk [vmem:[%s2688_s30 + $0xc] sm:$0xf] %vm1643_vm4, %v1892_v46  ;;  %v1457_v61 = vadd.f32 %v2165_v47, %v2678_v29  ;;  %v2167_v62 = vadd.f32 %v2136_v60, %v2056_v58  ;;  %v902_v63 = vpop.f32.mrb[7].mxu1 }
 0x13a   : > { %1645 = vst.msk [vmem:[%s2688_s30 + $0x4] sm:$0xf] %vm1643_vm4, %v1890_v55  ;;  %v1455_v1 = vadd.f32 %v2166_v57, %v2678_v29  ;;  %v2168_v3 = vadd.f32 %v1304_v0, %v902_v63  ;;  %v2139_v21 = vpop.f32.mrb[8].mxu0 }
 0x13b   : > { %v1489_v4 = vmax.f32 %v1457_v61, 0.0  ;;  %v1458_v6 = vadd.f32 %v2167_v62, %v2678_v29  ;;  %v1317_v28 = vpop.f32.mrb[9].mxu0 }
 0x13c   : > { %v1487_v8 = vmax.f32 %v1455_v1, 0.0  ;;  %v1456_v9 = vadd.f32 %v2168_v3, %v2678_v29  ;;  %v2140_v35 = vpop.f32.mrb[10].mxu0 }
 0x13d   : > { %v1895_v11 = vpack.c.bf16 %v1489_v4, %v1489_v4  ;;  %v1490_v12 = vmax.f32 %v1458_v6, 0.0  ;;  %v1320_v39 = vpop.f32.mrb[11].mxu0 }
 0x13e   : > { %v1893_v13 = vpack.c.bf16 %v1487_v8, %v1487_v8  ;;  %v1488_v15 = vmax.f32 %v1456_v9, 0.0  ;;  %v2059_v17 = vpop.f32.mrb[8].mxu1 }
 0x13f   : > { %1650 = vst.msk [vmem:[%s2688_s30 + $0x18] sm:$0xf] %vm1643_vm4, %v1895_v11  ;;  %v1896_v22 = vpack.c.bf16 %v1490_v12, %v1490_v12  ;;  %v2169_v26 = vadd.f32 %v2139_v21, %v2059_v17  ;;  %v915_v27 = vpop.f32.mrb[9].mxu1 }
 0x140   : > { %1648 = vst.msk [vmem:[%s2688_s30 + $0x10] sm:$0xf] %vm1643_vm4, %v1893_v13  ;;  %v1894_v32 = vpack.c.bf16 %v1488_v15, %v1488_v15  ;;  %v2170_v33 = vadd.f32 %v1317_v28, %v915_v27  ;;  %v2060_v34 = vpop.f32.mrb[10].mxu1 }
 0x141   : > { %1651 = vst.msk [vmem:[%s2688_s30 + $0x1c] sm:$0xf] %vm1643_vm4, %v1896_v22  ;;  %v1461_v36 = vadd.f32 %v2169_v26, %v2678_v29  ;;  %v2171_v37 = vadd.f32 %v2140_v35, %v2060_v34  ;;  %v918_v38 = vpop.f32.mrb[11].mxu1 }
 0x142   : > { %1649 = vst.msk [vmem:[%s2688_s30 + $0x14] sm:$0xf] %vm1643_vm4, %v1894_v32  ;;  %v1459_v40 = vadd.f32 %v2170_v33, %v2678_v29  ;;  %v2172_v42 = vadd.f32 %v1320_v39, %v918_v38  ;;  %v2143_v7 = vpop.f32.mrb[12].mxu0 }
 0x143   : > { %v1493_v44 = vmax.f32 %v1461_v36, 0.0  ;;  %v1462_v10 = vadd.f32 %v2171_v37, %v2678_v29  ;;  %v1333_v48 = vpop.f32.mrb[13].mxu0 }
 0x144   : > { %v1491_v14 = vmax.f32 %v1459_v40, 0.0  ;;  %v1460_v30 = vadd.f32 %v2172_v42, %v2678_v29  ;;  %v2144_v56 = vpop.f32.mrb[14].mxu0 }
 0x145   : > { %v1899_v43 = vpack.c.bf16 %v1493_v44, %v1493_v44  ;;  %v1494_v51 = vmax.f32 %v1462_v10, 0.0  ;;  %v1336_v19 = vpop.f32.mrb[15].mxu0 }
 0x146   : > { %v1897_v53 = vpack.c.bf16 %v1491_v14, %v1491_v14  ;;  %v1492_v2 = vmax.f32 %v1460_v30, 0.0  ;;  %v2063_v5 = vpop.f32.mrb[12].mxu1 }
 0x147   : > { %1654 = vst.msk [vmem:[%s2688_s30 + $0x28] sm:$0xf] %vm1643_vm4, %v1899_v43  ;;  %v1900_v20 = vpack.c.bf16 %v1494_v51, %v1494_v51  ;;  %v2173_v23 = vadd.f32 %v2143_v7, %v2063_v5  ;;  %v931_v25 = vpop.f32.mrb[13].mxu1 }
 0x148   : > { %1652 = vst.msk [vmem:[%s2688_s30 + $0x20] sm:$0xf] %vm1643_vm4, %v1897_v53  ;;  %v1898_v31 = vpack.c.bf16 %v1492_v2, %v1492_v2  ;;  %v2174_v49 = vadd.f32 %v1333_v48, %v931_v25  ;;  %v2064_v50 = vpop.f32.mrb[14].mxu1 }
 0x149   : > { %1655 = vst.msk [vmem:[%s2688_s30 + $0x2c] sm:$0xf] %vm1643_vm4, %v1900_v20  ;;  %v1465_v59 = vadd.f32 %v2173_v23, %v2678_v29  ;;  %v2175_v16 = vadd.f32 %v2144_v56, %v2064_v50  ;;  %v934_v18 = vpop.f32.mrb[15].mxu1 }
 0x14a   : > { %1653 = vst.msk [vmem:[%s2688_s30 + $0x24] sm:$0xf] %vm1643_vm4, %v1898_v31  ;;  %v1463_v24 = vadd.f32 %v2174_v49, %v2678_v29  ;;  %v2176_v41 = vadd.f32 %v1336_v19, %v934_v18  ;;  %v2147_v61 = vpop.f32.mrb[16].mxu0 }
 0x14b   : > { %v1497_v45 = vmax.f32 %v1465_v59, 0.0  ;;  %v1466_v46 = vadd.f32 %v2175_v16, %v2678_v29  ;;  %v1349_v1 = vpop.f32.mrb[17].mxu0 }
 0x14c   : > { %v1495_v47 = vmax.f32 %v1463_v24, 0.0  ;;  %v1464_v52 = vadd.f32 %v2176_v41, %v2678_v29  ;;  %v2148_v8 = vpop.f32.mrb[18].mxu0 }
 0x14d   : > { %v1903_v54 = vpack.c.bf16 %v1497_v45, %v1497_v45  ;;  %v1498_v55 = vmax.f32 %v1466_v46, 0.0  ;;  %v1352_v13 = vpop.f32.mrb[19].mxu0 }
 0x14e   : > { %v1901_v57 = vpack.c.bf16 %v1495_v47, %v1495_v47  ;;  %v1496_v58 = vmax.f32 %v1464_v52, 0.0  ;;  %v2067_v60 = vpop.f32.mrb[16].mxu1 }
 0x14f   : > { %1658 = vst.msk [vmem:[%s2688_s30 + $0x38] sm:$0xf] %vm1643_vm4, %v1903_v54  ;;  %v1904_v62 = vpack.c.bf16 %v1498_v55, %v1498_v55  ;;  %v2177_v63 = vadd.f32 %v2147_v61, %v2067_v60  ;;  %v947_v0 = vpop.f32.mrb[17].mxu1 }
 0x150   : > { %1656 = vst.msk [vmem:[%s2688_s30 + $0x30] sm:$0xf] %vm1643_vm4, %v1901_v57  ;;  %v1902_v3 = vpack.c.bf16 %v1496_v58, %v1496_v58  ;;  %v2178_v4 = vadd.f32 %v1349_v1, %v947_v0  ;;  %v2068_v6 = vpop.f32.mrb[18].mxu1 }
 0x151   : > { %1659 = vst.msk [vmem:[%s2688_s30 + $0x3c] sm:$0xf] %vm1643_vm4, %v1904_v62  ;;  %v1469_v9 = vadd.f32 %v2177_v63, %v2678_v29  ;;  %v2179_v11 = vadd.f32 %v2148_v8, %v2068_v6  ;;  %v950_v12 = vpop.f32.mrb[19].mxu1 }
 0x152   : > { %1657 = vst.msk [vmem:[%s2688_s30 + $0x34] sm:$0xf] %vm1643_vm4, %v1902_v3  ;;  %v1467_v15 = vadd.f32 %v2178_v4, %v2678_v29  ;;  %v2180_v17 = vadd.f32 %v1352_v13, %v950_v12  ;;  %v2151_v36 = vpop.f32.mrb[20].mxu0 }
 0x153   : > { %v1501_v21 = vmax.f32 %v1469_v9, 0.0  ;;  %v1470_v22 = vadd.f32 %v2179_v11, %v2678_v29  ;;  %v1365_v40 = vpop.f32.mrb[21].mxu0 }
 0x154   : > { %v1499_v26 = vmax.f32 %v1467_v15, 0.0  ;;  %v1468_v27 = vadd.f32 %v2180_v17, %v2678_v29  ;;  %v2152_v14 = vpop.f32.mrb[22].mxu0 }
 0x155   : > { %v1907_v28 = vpack.c.bf16 %v1501_v21, %v1501_v21  ;;  %v1502_v32 = vmax.f32 %v1470_v22, 0.0  ;;  %v1368_v53 = vpop.f32.mrb[23].mxu0 }
 0x156   : > { %v1905_v33 = vpack.c.bf16 %v1499_v26, %v1499_v26  ;;  %v1500_v34 = vmax.f32 %v1468_v27, 0.0  ;;  %v2071_v35 = vpop.f32.mrb[20].mxu1 }
 0x157   : > { %1662 = vst.msk [vmem:[%s2688_s30 + $0x48] sm:$0xf] %vm1643_vm4, %v1907_v28  ;;  %v1908_v37 = vpack.c.bf16 %v1502_v32, %v1502_v32  ;;  %v2181_v38 = vadd.f32 %v2151_v36, %v2071_v35  ;;  %v963_v39 = vpop.f32.mrb[21].mxu1 }
 0x158   : > { %1660 = vst.msk [vmem:[%s2688_s30 + $0x40] sm:$0xf] %vm1643_vm4, %v1905_v33  ;;  %v1906_v42 = vpack.c.bf16 %v1500_v34, %v1500_v34  ;;  %v2182_v44 = vadd.f32 %v1365_v40, %v963_v39  ;;  %v2072_v10 = vpop.f32.mrb[22].mxu1 }
 0x159   : > { %1663 = vst.msk [vmem:[%s2688_s30 + $0x4c] sm:$0xf] %vm1643_vm4, %v1908_v37  ;;  %v1473_v30 = vadd.f32 %v2181_v38, %v2678_v29  ;;  %v2183_v43 = vadd.f32 %v2152_v14, %v2072_v10  ;;  %v966_v51 = vpop.f32.mrb[23].mxu1 }
 0x15a   : > { %1661 = vst.msk [vmem:[%s2688_s30 + $0x44] sm:$0xf] %vm1643_vm4, %v1906_v42  ;;  %v1471_v2 = vadd.f32 %v2182_v44, %v2678_v29  ;;  %v2184_v5 = vadd.f32 %v1368_v53, %v966_v51  ;;  %v2155_v59 = vpop.f32.mrb[24].mxu0 }
 0x15b   : > { %v1505_v7 = vmax.f32 %v1473_v30, 0.0  ;;  %v1474_v20 = vadd.f32 %v2183_v43, %v2678_v29  ;;  %v1381_v24 = vpop.f32.mrb[25].mxu0 }
 0x15c   : > { %v1503_v23 = vmax.f32 %v1471_v2, 0.0  ;;  %v1472_v25 = vadd.f32 %v2184_v5, %v2678_v29  ;;  %v2156_v47 = vpop.f32.mrb[26].mxu0 }
 0x15d   : > { %v1911_v48 = vpack.c.bf16 %v1505_v7, %v1505_v7  ;;  %v1506_v31 = vmax.f32 %v1474_v20, 0.0  ;;  %v1384_v57 = vpop.f32.mrb[27].mxu0 }
 0x15e   : > { %v1909_v49 = vpack.c.bf16 %v1503_v23, %v1503_v23  ;;  %v1504_v50 = vmax.f32 %v1472_v25, 0.0  ;;  %v2075_v56 = vpop.f32.mrb[24].mxu1 }
 0x15f   : > { %1666 = vst.msk [vmem:[%s2688_s30 + $0x58] sm:$0xf] %vm1643_vm4, %v1911_v48  ;;  %v1912_v16 = vpack.c.bf16 %v1506_v31, %v1506_v31  ;;  %v2185_v18 = vadd.f32 %v2155_v59, %v2075_v56  ;;  %v979_v19 = vpop.f32.mrb[25].mxu1 }
 0x160   : > { %1664 = vst.msk [vmem:[%s2688_s30 + $0x50] sm:$0xf] %vm1643_vm4, %v1909_v49  ;;  %v1910_v41 = vpack.c.bf16 %v1504_v50, %v1504_v50  ;;  %v2186_v45 = vadd.f32 %v1381_v24, %v979_v19  ;;  %v2076_v46 = vpop.f32.mrb[26].mxu1 }
 0x161   : > { %1667 = vst.msk [vmem:[%s2688_s30 + $0x5c] sm:$0xf] %vm1643_vm4, %v1912_v16  ;;  %v1477_v52 = vadd.f32 %v2185_v18, %v2678_v29  ;;  %v2187_v54 = vadd.f32 %v2156_v47, %v2076_v46  ;;  %v982_v55 = vpop.f32.mrb[27].mxu1 }
 0x162   : > { %1665 = vst.msk [vmem:[%s2688_s30 + $0x54] sm:$0xf] %vm1643_vm4, %v1910_v41  ;;  %v1475_v58 = vadd.f32 %v2186_v45, %v2678_v29  ;;  %v2188_v60 = vadd.f32 %v1384_v57, %v982_v55  ;;  %v2159_v9 = vpop.f32.mrb[28].mxu0 }
 0x163   : > { %v1509_v61 = vmax.f32 %v1477_v52, 0.0  ;;  %v1478_v62 = vadd.f32 %v2187_v54, %v2678_v29  ;;  %v1397_v15 = vpop.f32.mrb[29].mxu0 }
 0x164   : > { %v1507_v63 = vmax.f32 %v1475_v58, 0.0  ;;  %v1476_v0 = vadd.f32 %v2188_v60, %v2678_v29  ;;  %v2160_v26 = vpop.f32.mrb[30].mxu0 }
 0x165   : > { %v1915_v1 = vpack.c.bf16 %v1509_v61, %v1509_v61  ;;  %v1510_v3 = vmax.f32 %v1478_v62, 0.0  ;;  %v1400_v33 = vpop.f32.mrb[31].mxu0 }
 0x166   : > { %v1913_v4 = vpack.c.bf16 %v1507_v63, %v1507_v63  ;;  %v1508_v6 = vmax.f32 %v1476_v0, 0.0  ;;  %v2079_v8 = vpop.f32.mrb[28].mxu1 }
 0x167   : > { %1670 = vst.msk [vmem:[%s2688_s30 + $0x68] sm:$0xf] %vm1643_vm4, %v1915_v1  ;;  %v1916_v11 = vpack.c.bf16 %v1510_v3, %v1510_v3  ;;  %v2189_v12 = vadd.f32 %v2159_v9, %v2079_v8  ;;  %v995_v13 = vpop.f32.mrb[29].mxu1 }
 0x168   : > { %1668 = vst.msk [vmem:[%s2688_s30 + $0x60] sm:$0xf] %vm1643_vm4, %v1913_v4  ;;  %v1914_v17 = vpack.c.bf16 %v1508_v6, %v1508_v6  ;;  %v2190_v21 = vadd.f32 %v1397_v15, %v995_v13  ;;  %v2080_v22 = vpop.f32.mrb[30].mxu1 }
 0x169   : > { %1671 = vst.msk [vmem:[%s2688_s30 + $0x6c] sm:$0xf] %vm1643_vm4, %v1916_v11  ;;  %v1481_v27 = vadd.f32 %v2189_v12, %v2678_v29  ;;  %v2191_v28 = vadd.f32 %v2160_v26, %v2080_v22  ;;  %v998_v32 = vpop.f32.mrb[31].mxu1 }
 0x16a   : > { %1669 = vst.msk [vmem:[%s2688_s30 + $0x64] sm:$0xf] %vm1643_vm4, %v1914_v17  ;;  %v1479_v34 = vadd.f32 %v2190_v21, %v2678_v29  ;;  %v2192_v35 = vadd.f32 %v1400_v33, %v998_v32 }
 0x16b   : > { %v1513_v36 = vmax.f32 %v1481_v27, 0.0  ;;  %v1482_v37 = vadd.f32 %v2191_v28, %v2678_v29 }
 0x16c   : > { %v1511_v38 = vmax.f32 %v1479_v34, 0.0  ;;  %v1480_v39 = vadd.f32 %v2192_v35, %v2678_v29 }
 0x16d   : > { %v1919_v40 = vpack.c.bf16 %v1513_v36, %v1513_v36  ;;  %v1514_v42 = vmax.f32 %v1482_v37, 0.0 }
 0x16e   : > { %v1917_v44 = vpack.c.bf16 %v1511_v38, %v1511_v38  ;;  %v1512_v10 = vmax.f32 %v1480_v39, 0.0 }
 0x16f   : > { %1674 = vst.msk [vmem:[%s2688_s30 + $0x78] sm:$0xf] %vm1643_vm4, %v1919_v40  ;;  %v1920_v14 = vpack.c.bf16 %v1514_v42, %v1514_v42 }
 0x170   : > { %1672 = vst.msk [vmem:[%s2688_s30 + $0x70] sm:$0xf] %vm1643_vm4, %v1917_v44  ;;  %v1918_v30 = vpack.c.bf16 %v1512_v10, %v1512_v10 }
 0x171   : > { %1675 = vst.msk [vmem:[%s2688_s30 + $0x7c] sm:$0xf] %vm1643_vm4, %v1920_v14 }
 0x172   : > { %1673 = vst.msk [vmem:[%s2688_s30 + $0x74] sm:$0xf] %vm1643_vm4, %v1918_v30 }
 0x173 PF: > { %s13_s12 = sadd.s32 1, %s2319_s12  }
 0x174   : > { %p10_p4 = scmp.ge.s32.totalorder %s13_s12, 4  }
 0x176   :  { %12 = sbr.rel (!%p10_p4) target bundleno = 1 (0x1), region = 62 }

// kernel: ppo_atari_forward.3
= control target key start
LH: loop header
LB: loop body
LE: loop exit
PB: predicated region body
PF: predicated region fallthrough
CT: control target
= control target key end

     0   :  { %s4214_s13 = smov 0   ;;  %s5082_s0 = inlined_call_operand.vmem [shape: bf16[2,8,8,128], index: 0, kind: input, shape index: {}]   ;;  %s5083_s1 = inlined_call_operand.vmem [shape: bf16[4,128,64], index: 1, kind: input, shape index: {}]   ;;  %s5084_s2 = inlined_call_operand.vmem [shape: f32[1,64], index: 2, kind: input, shape index: {}]   ;;  %s5085_s3 = inlined_call_operand.vmem [shape: bf16[9,64,64], index: 3, kind: input, shape index: {}]   ;;  %s5086_s4 = inlined_call_operand.vmem [shape: f32[1,64], index: 4, kind: input, shape index: {}]   ;;  %s5087_s5 = inlined_call_operand.vmem [shape: bf16[1024,64], index: 5, kind: input, shape index: {}]   ;;  %s5088_s6 = inlined_call_operand.vmem [shape: f32[1,64], index: 6, kind: input, shape index: {}]   ;;  %s5089_s7 = inlined_call_operand.vmem [shape: bf16[64,7], index: 7, kind: input, shape index: {}]   ;;  %s5090_s8 = inlined_call_operand.vmem [shape: f32[1,7], index: 8, kind: input, shape index: {}]   ;;  %s5091_s9 = inlined_call_operand.vmem [shape: f32[2,1,6], index: 9, kind: input, shape index: {}]   ;;  %s5092_s10 = inlined_call_operand.vmem [shape: f32[2,1,8], index: 10, kind: output, shape index: {}]  }
   0x1 LB: > { %s3214_s14 = sadd.s32 4294967295, %s4153_s13   ;;  %p3218_p0 = scmp.ge.s32.totalorder %s4153_s13, 1  ;;  %s4153_s13 = sphi %s4214_s13, %s20_s13  }
   0x2   : > { %p320_p1 = scmp.lt.s32.totalorder %s4153_s13, 3 }
   0x4   : > { %p321_p2 = pnand %p3218_p0, %p320_p1 }
   0x5   : > { %v3989_v0 = vld [vmem:[%s5083_s1 + $0x40] sm:$0xff] (!%p321_p2)   ;;  %p359_p3 = scmp.lt.s32.totalorder (!%p321_p2), %s3214_s14, 1  ;;  %v3990_v1 = vld [vmem:[%s5083_s1 + $0x48] sm:$0xff] (!%p321_p2)   ;;  %v3991_v2 = vld [vmem:[%s5083_s1 + $0x50] sm:$0xff] (!%p321_p2)   ;;  %vm547_vm0 = vcmask (!%p321_p2), 1043456   ;;  %vm1512_vm3 = vcmask (!%p321_p2), 1042432  }
   0x6   : > { %324 = sbr.rel (%p321_p2) target bundleno = 1912 (0x778), region = 60  ;;  %3668 = vmatprep.subr.bf16.mxu0 (!%p321_p2), %v3989_v0  ;;  %v3992_v3 = vld [vmem:[%s5083_s1 + $0x58] sm:$0xff] (!%p321_p2)   ;;  %v3993_v11 = vld [vmem:[%s5083_s1 + $0x60] sm:$0xff] (!%p321_p2)   ;;  %vm548_vm1 = vsmask.f32 (!%p321_p2), 3328  ;;  %v3994_v35 = vld [vmem:[%s5083_s1 + $0x68] sm:$0xff] (!%p321_p2)  }
   0x7   : > { %3669 = vmatpush3.bf16.msra.mxu0 (!%p321_p2), %v3989_v0  ;;  %vm4272_vm2 = vmand (!%p321_p2), %vm547_vm0, %vm548_vm1  ;;  %v3995_v50 = vld [vmem:[%s5083_s1 + $0x70] sm:$0xff] (!%p321_p2)   ;;  %vm1325_vm4 = vcmask (!%p321_p2), 523264   ;;  %s4155_s29 = smov (!%p321_p2), 64   ;;  %vm4157_vm5 = vmmov (!%p321_p2), 0   ;;  %vm3090_vm6 = vcmask (!%p321_p2), 40960   ;;  %vm3156_vm14 = vcmask (!%p321_p2), 57344  }
   0x8   : > { %3670 = vmatprep.subr.bf16.mxu0 (!%p321_p2), %v3990_v1 }
   0xb   : > { %3671 = vmatpush3.bf16.msra.mxu0 (!%p321_p2), %v3990_v1  ;;  %v3996_v1 = vld [vmem:[%s5083_s1 + $0x78] sm:$0xff] (!%p321_p2)  }
   0xc   : > { %3672 = vmatprep.subr.bf16.mxu0 (!%p321_p2), %v3991_v2 }
   0xd   : > { %s5096_s14 = smov (!%p359_p3, %s3214_s14), 1 }
   0xe   : > { %s3446_s21 = sshll.u32 %s5096_s14, 5  ;;  %s366_s30 = scalar_lea.vmem %s5091_s9, %s5096_s14 }
   0xf   : > { %s4237_s24 = scalar_lea.vmem %s5082_s0, %s3446_s21  ;;  %3673 = vmatpush3.bf16.msra.mxu0 %v3991_v2  ;;  %s369_s17 = scalar_lea.vmem %s5092_s10, %s5096_s14 }
  0x10   : > { %v4243_v4 = vld [vmem:[%s4237_s24] sm:$0xf]  ;;  %v4246_v5 = vld [vmem:[%s4237_s24 + $0x4] sm:$0xf]  ;;  %v4249_v6 = vld [vmem:[%s4237_s24 + $0x8] sm:$0xf]  ;;  %3674 = vmatprep.subr.bf16.mxu0 %v3992_v3 }
  0x11   : > { %v4252_v7 = vld [vmem:[%s4237_s24 + $0x1c] sm:$0xf]  ;;  %v3221_v8 = vcombine.low %v4243_v4, %v4243_v4  ;;  %v3222_v9 = vcombine.low %v4246_v5, %v4246_v5  ;;  %v3223_v10 = vcombine.low %v4249_v6, %v4249_v6  ;;  %v4268_v18 = vld [vmem:[%s4237_s24 + $0xc] sm:$0xf]  ;;  %v4300_v44 = vld [vmem:[%s4237_s24 + $0x10] sm:$0xf] }
  0x12   : > { %v3228_v12 = vcombine.low %v4252_v7, %v4252_v7  ;;  %v3256_v13 = vcombine.low %v4252_v7, %v4243_v4  ;;  %v3224_v34 = vcombine.low %v4268_v18, %v4268_v18  ;;  %v4307_v49 = vld [vmem:[%s4237_s24 + $0x14] sm:$0xf]  ;;  %v3225_v51 = vcombine.low %v4300_v44, %v4300_v44  ;;  %v4317_v53 = vld [vmem:[%s4237_s24 + $0x18] sm:$0xf] }
  0x13   : > { %v468_v14 = vshrl.u32 %v3221_v8, 16  ;;  %v470_v15 = vshll.u32 %v3221_v8, 16  ;;  %v475_v16 = vshrl.u32 %v3222_v9, 16  ;;  %v477_v17 = vshll.u32 %v3222_v9, 16  ;;  %3675 = vmatpush3.bf16.msra.mxu0 %v3992_v3 }
  0x14   : > { %v482_v19 = vshrl.u32 %v3223_v10, 16  ;;  %v484_v20 = vshll.u32 %v3223_v10, 16  ;;  %v517_v21 = vshrl.u32 %v3228_v12, 16  ;;  %v519_v22 = vshll.u32 %v3228_v12, 16  ;;  %3676 = vmatprep.subr.bf16.mxu0 %v3993_v11 }
  0x15   : > { %v472_v23 = vrot.slane %v470_v15, 1  ;;  %v479_v24 = vrot.slane %v477_v17, 1  ;;  %v531_v25 = vrot.slane %v470_v15, 5  ;;  %v532_v26 = vrot.slane %v477_v17, 5  ;;  %v4001_v17 = vld [vmem:[%s5083_s1] sm:$0xff]  }
  0x16   : > { %v486_v27 = vrot.slane %v484_v20, 1  ;;  %v521_v28 = vrot.slane %v519_v22, 1  ;;  %v533_v29 = vrot.slane %v484_v20, 5  ;;  %v538_v30 = vrot.slane %v519_v22, 5 }
  0x17   : > { %v473_v32 = vor.u32 %v472_v23, %v468_v14  ;;  %v480_v33 = vor.u32 %v479_v24, %v475_v16  ;;  %v491_v40 = vshll.u32 %v3224_v34, 16  ;;  %3677 = vmatpush3.bf16.msra.mxu0 %v3993_v11  ;;  %v489_v47 = vshrl.u32 %v3224_v34, 16  ;;  %v4010_v34 = vld [vmem:[%s5083_s1 + $0x30] sm:$0xff]  }
  0x18   : > { %v487_v36 = vor.u32 %v486_v27, %v482_v19  ;;  %v522_v37 = vor.u32 %v521_v28, %v517_v21  ;;  %3678 = vmatprep.subr.bf16.mxu0 %v3994_v35  ;;  %v3226_v52 = vcombine.low %v4307_v49, %v4307_v49  ;;  %v3227_v55 = vcombine.low %v4317_v53, %v4317_v53  ;;  %v4004_v27 = vld [vmem:[%s5083_s1 + $0x10] sm:$0xff]  }
  0x19   : > { %v4283_v38 = vsel %vm4272_vm2, %v473_v32, %v531_v25  ;;  %v4287_v39 = vsel %vm4272_vm2, %v480_v33, %v532_v26  ;;  %v493_v48 = vrot.slane %v491_v40, 1  ;;  %v534_v54 = vrot.slane %v491_v40, 5  ;;  %v4003_v26 = vld [vmem:[%s5083_s1 + $0x8] sm:$0xff]   ;;  %v4006_v32 = vld [vmem:[%s5083_s1 + $0x20] sm:$0xff]  }
  0x1a   : > { %v4291_v41 = vsel %vm4272_vm2, %v487_v36, %v533_v29  ;;  %v4295_v42 = vsel %vm4272_vm2, %v522_v37, %v538_v30  ;;  %v3229_v43 = vcombine.low %v4283_v38, %v4287_v39  ;;  %v3254_v56 = vcombine.low %v4268_v18, %v4300_v44  ;;  %v4005_v29 = vld [vmem:[%s5083_s1 + $0x18] sm:$0xff]   ;;  %v4007_v33 = vld [vmem:[%s5083_s1 + $0x28] sm:$0xff]   ;;  %v4014_v36 = vld [vmem:[%s5083_s1 + $0x80] sm:$0xff]  }
  0x1b   : > { %v3265_v45 = vcombine.low %v4287_v39, %v4291_v41  ;;  %v3268_v46 = vcombine.low %v4295_v42, %v4283_v38  ;;  %v496_v57 = vshrl.u32 %v3225_v51, 16  ;;  %v498_v58 = vshll.u32 %v3225_v51, 16  ;;  %3679 = vmatpush3.bf16.msra.mxu0 %v3994_v35  ;;  %v4012_v35 = vld [vmem:[%s5083_s1 + $0x38] sm:$0xff]   ;;  %v4016_v40 = vld [vmem:[%s5083_s1 + $0x88] sm:$0xff]  }
  0x1c   : > { %3684 = vmatprep.mubr.bf16.mxu0 %v3229_v43  ;;  %v503_v59 = vshrl.u32 %v3226_v52, 16  ;;  %v505_v60 = vshll.u32 %v3226_v52, 16  ;;  %v494_v61 = vor.u32 %v493_v48, %v489_v47  ;;  %v510_v62 = vshrl.u32 %v3227_v55, 16  ;;  %3680 = vmatprep.subr.bf16.mxu0 %v3995_v50  ;;  %v4017_v47 = vld [vmem:[%s5083_s1 + $0x90] sm:$0xff]   ;;  %v4018_v48 = vld [vmem:[%s5083_s1 + $0x98] sm:$0xff]   ;;  %v4019_v52 = vld [vmem:[%s5083_s1 + $0xa0] sm:$0xff]  }
  0x1d   : > { %v512_v63 = vshll.u32 %v3227_v55, 16  ;;  %v3255_v0 = vcombine.low %v4307_v49, %v4317_v53  ;;  %v500_v2 = vrot.slane %v498_v58, 1  ;;  %v535_v8 = vrot.slane %v498_v58, 5  ;;  %v4022_v55 = vld [vmem:[%s5083_s1 + $0xb0] sm:$0xff]   ;;  %v4038_v39 = vld [vmem:[%s5085_s3 + $0x28] sm:$0xff]   ;;  %v4040_v38 = vld [vmem:[%s5085_s3 + $0x38] sm:$0xff]  }
  0x1e   : > { %v507_v3 = vrot.slane %v505_v60, 1  ;;  %v536_v9 = vrot.slane %v505_v60, 5  ;;  %v4330_v15 = vsel %vm4272_vm2, %v494_v61, %v534_v54  ;;  %v3241_v30 = vcombine.low %v4243_v4, %v4246_v5  ;;  %v4020_v54 = vld [vmem:[%s5083_s1 + $0xa8] sm:$0xff]   ;;  %v4029_v58 = vld [vmem:[%s5083_s1 + $0xd0] sm:$0xff]  }
  0x1f   : > { %v514_v10 = vrot.slane %v512_v63, 1  ;;  %v537_v11 = vrot.slane %v512_v63, 5  ;;  %v501_v12 = vor.u32 %v500_v2, %v496_v57  ;;  %3681 = vmatpush3.bf16.msra.mxu0 %v3995_v50  ;;  %v3230_v23 = vcombine.low %v4291_v41, %v4330_v15  ;;  %v4028_v57 = vld [vmem:[%s5083_s1 + $0xc8] sm:$0xff]   ;;  %v4035_v4 = vld [vmem:[%s5083_s1 + $0xf0] sm:$0xff]  }
  0x20   : > { %v508_v14 = vor.u32 %v507_v3, %v503_v59  ;;  %3682 = vmatprep.subr.bf16.mxu0 %v3996_v1  ;;  %v3242_v37 = vcombine.low %v4249_v6, %v4268_v18  ;;  %v3243_v43 = vcombine.low %v4300_v44, %v4307_v49  ;;  %v3244_v50 = vcombine.low %v4317_v53, %v4252_v7  ;;  %v4030_v59 = vld [vmem:[%s5083_s1 + $0xd8] sm:$0xff]   ;;  %v4031_v18 = vld [vmem:[%s5083_s1 + $0xe0] sm:$0xff]   ;;  %v4032_v44 = vld [vmem:[%s5083_s1 + $0xe8] sm:$0xff]  }
  0x21   : > { %v515_v16 = vor.u32 %v514_v10, %v510_v62  ;;  %v4337_v19 = vsel %vm4272_vm2, %v501_v12, %v535_v8  ;;  %v3253_v51 = vcombine.low %v4246_v5, %v4249_v6  ;;  %v4024_v5 = vld [vmem:[%s5083_s1 + $0xb8] sm:$0xff]   ;;  %v4026_v6 = vld [vmem:[%s5083_s1 + $0xc0] sm:$0xff]   ;;  %v4039_v41 = vld [vmem:[%s5085_s3 + $0x30] sm:$0xff]  }
  0x22   : > { %v4341_v20 = vsel %vm4272_vm2, %v508_v14, %v536_v9  ;;  %v3266_v21 = vcombine.low %v4330_v15, %v4337_v19  ;;  %v4036_v7 = vld [vmem:[%s5083_s1 + $0xf8] sm:$0xff]  }
  0x23   : > { %v4347_v22 = vsel %vm4272_vm2, %v515_v16, %v537_v11  ;;  %3683 = vmatpush3.bf16.msra.mxu0 %v3996_v1  ;;  %v3231_v25 = vcombine.low %v4337_v19, %v4341_v20 }
  0x24   : > { %v3267_v24 = vcombine.low %v4341_v20, %v4347_v22  ;;  %3692 = vmatprep.subr.bf16.mxu0 %v4001_v17  ;;  %v3232_v28 = vcombine.low %v4347_v22, %v4295_v42  ;;  %v4472_v42 = vld [vmem:[%s5085_s3] sm:$0xff]  }
  0x26   : > { %3685 = vmatmul.mubr.bf16.vlgmr.msra.gmra.mrb[0].mxu0 %v3230_v23 }
  0x27   : > { %3693 = vmatpush3.bf16.msra.mxu0 %v4001_v17  ;;  %3688 = vmatprep.mubr.bf16.mxu0 %v3231_v25 }
  0x28   : > { %3694 = vmatprep.subr.bf16.mxu0 %v4003_v26 }
  0x2b   : > { %3695 = vmatpush3.bf16.msra.mxu0 %v4003_v26 }
  0x2c   : > { %3696 = vmatprep.subr.bf16.mxu0 %v4004_v27 }
  0x2e   : > { %3689 = vmatmul.mubr.bf16.gmra.mrb[4].mxu0 %v3232_v28 }
  0x2f   : > { %3697 = vmatpush3.bf16.msra.mxu0 %v4004_v27  ;;  %3708 = vmatprep.mubr.bf16.mxu0 %v3241_v30 }
  0x30   : > { %3698 = vmatprep.subr.bf16.mxu0 %v4005_v29 }
  0x33   : > { %3699 = vmatpush3.bf16.msra.mxu0 %v4005_v29 }
  0x34   : > { %3700 = vmatprep.subr.bf16.mxu0 %v4006_v32 }
  0x37   : > { %3701 = vmatpush3.bf16.msra.mxu0 %v4006_v32 }
  0x38   : > { %3702 = vmatprep.subr.bf16.mxu0 %v4007_v33 }
  0x3b   : > { %3703 = vmatpush3.bf16.msra.mxu0 %v4007_v33 }
  0x3c   : > { %3704 = vmatprep.subr.bf16.mxu0 %v4010_v34 }
  0x3f   : > { %3705 = vmatpush3.bf16.msra.mxu0 %v4010_v34 }
  0x40   : > { %3706 = vmatprep.subr.bf16.mxu0 %v4012_v35 }
  0x43   : > { %3707 = vmatpush3.bf16.msra.mxu0 %v4012_v35 }
  0x44   : > { %3716 = vmatprep.subr.bf16.mxu0 %v4014_v36 }
  0x46   : > { %3709 = vmatmul.mubr.bf16.vlgmr.msra.gmra.mrb[0].mxu0 %v3242_v37 }
  0x47   : > { %3717 = vmatpush3.bf16.msra.mxu0 %v4014_v36  ;;  %3712 = vmatprep.mubr.bf16.mxu0 %v3243_v43 }
  0x48   : > { %3718 = vmatprep.subr.bf16.mxu0 %v4016_v40 }
  0x4b   : > { %3719 = vmatpush3.bf16.msra.mxu0 %v4016_v40 }
  0x4c   : > { %3720 = vmatprep.subr.bf16.mxu0 %v4017_v47 }
  0x4e   : > { %3713 = vmatmul.mubr.bf16.gmra.mrb[4].mxu0 %v3244_v50 }
  0x4f   : > { %3721 = vmatpush3.bf16.msra.mxu0 %v4017_v47  ;;  %3732 = vmatprep.mubr.bf16.mxu0 %v3253_v51 }
  0x50   : > { %3722 = vmatprep.subr.bf16.mxu0 %v4018_v48 }
  0x53   : > { %3723 = vmatpush3.bf16.msra.mxu0 %v4018_v48 }
  0x54   : > { %3724 = vmatprep.subr.bf16.mxu0 %v4019_v52 }
  0x57   : > { %3725 = vmatpush3.bf16.msra.mxu0 %v4019_v52 }
  0x58   : > { %3726 = vmatprep.subr.bf16.mxu0 %v4020_v54 }
  0x5b   : > { %3727 = vmatpush3.bf16.msra.mxu0 %v4020_v54 }
  0x5c   : > { %3728 = vmatprep.subr.bf16.mxu0 %v4022_v55 }
  0x5f   : > { %3729 = vmatpush3.bf16.msra.mxu0 %v4022_v55 }
  0x60   : > { %3730 = vmatprep.subr.bf16.mxu0 %v4024_v5 }
  0x63   : > { %3731 = vmatpush3.bf16.msra.mxu0 %v4024_v5 }
  0x64   : > { %3740 = vmatprep.subr.bf16.mxu0 %v4026_v6 }
  0x66   : > { %3733 = vmatmul.mubr.bf16.vlgmr.msra.gmra.mrb[0].mxu0 %v3254_v56 }
  0x67   : > { %3741 = vmatpush3.bf16.msra.mxu0 %v4026_v6  ;;  %3736 = vmatprep.mubr.bf16.mxu0 %v3255_v0 }
  0x68   : > { %3742 = vmatprep.subr.bf16.mxu0 %v4028_v57 }
  0x6b   : > { %3743 = vmatpush3.bf16.msra.mxu0 %v4028_v57 }
  0x6c   : > { %3744 = vmatprep.subr.bf16.mxu0 %v4029_v58 }
  0x6e   : > { %3737 = vmatmul.mubr.bf16.gmra.mrb[4].mxu0 %v3256_v13  ;;  %v4037_v13 = vld [vmem:[%s5085_s3 + $0x20] sm:$0xff]  }
  0x6f   : > { %3745 = vmatpush3.bf16.msra.mxu0 %v4029_v58  ;;  %3756 = vmatprep.mubr.bf16.mxu0 %v3265_v45  ;;  %v3277_v45 = vld [vmem:[%s5084_s2] ss:$0 sm:$0xff] }
  0x70   : > { %3746 = vmatprep.subr.bf16.mxu0 %v4030_v59  ;;  %3764 = vmatprep.subr.bf16.mxu1 %v4037_v13 }
  0x71   : > { %3765 = vmatpush3.bf16.msra.mxu1 %v4037_v13 }
  0x72   : > { %3766 = vmatprep.subr.bf16.mxu1 %v4038_v39 }
  0x73   : > { %3747 = vmatpush3.bf16.msra.mxu0 %v4030_v59 }
  0x74   : > { %3748 = vmatprep.subr.bf16.mxu0 %v4031_v18 }
  0x75   : > { %3767 = vmatpush3.bf16.msra.mxu1 %v4038_v39 }
  0x76   : > { %3768 = vmatprep.subr.bf16.mxu1 %v4039_v41 }
  0x77   : > { %3749 = vmatpush3.bf16.msra.mxu0 %v4031_v18 }
  0x78   : > { %3750 = vmatprep.subr.bf16.mxu0 %v4032_v44 }
  0x79   : > { %3769 = vmatpush3.bf16.msra.mxu1 %v4039_v41 }
  0x7a   : > { %3770 = vmatprep.subr.bf16.mxu1 %v4040_v38 }
  0x7b   : > { %3751 = vmatpush3.bf16.msra.mxu0 %v4032_v44 }
  0x7c   : > { %3752 = vmatprep.subr.bf16.mxu0 %v4035_v4 }
  0x7d   : > { %3771 = vmatpush3.bf16.msra.mxu1 %v4040_v38 }
  0x7e   : > { %3780 = vmatprep.subr.bf16.mxu1 %v4472_v42 }
  0x7f   : > { %3753 = vmatpush3.bf16.msra.mxu0 %v4035_v4 }
  0x80   : > { %3754 = vmatprep.subr.bf16.mxu0 %v4036_v7 }
  0x83   : > { %3755 = vmatpush3.bf16.msra.mxu0 %v4036_v7 }
  0x86   : > { %3757 = vmatmul.mubr.bf16.vlgmr.msra.gmra.mrb[0].mxu0 %v3266_v21 }
  0x87   : > { %3760 = vmatprep.mubr.bf16.mxu0 %v3267_v24 }
  0x8e   : > { %3761 = vmatmul.mubr.bf16.gmra.mrb[4].mxu0 %v3268_v46 }
 0x159   : > { %v3758_v46 = vpop.f32.mrb[0].mxu0 }
 0x15a   : > { %v1083_v49 = vadd.f32 %v3758_v46, %v3277_v45  ;;  %v1035_v53 = vpop.f32.mrb[1].mxu0 }
 0x15b   : > { %v1081_v56 = vadd.f32 %v3277_v45, %v1035_v53  ;;  %v3759_v60 = vpop.f32.mrb[2].mxu0 }
 0x15c   : > { %v1091_v61 = vmax.f32 %v1083_v49, 0.0  ;;  %v1084_v62 = vadd.f32 %v3759_v60, %v3277_v45  ;;  %v1038_v63 = vpop.f32.mrb[3].mxu0 }
 0x15d   : > { %v1089_v0 = vmax.f32 %v1081_v56, 0.0  ;;  %v1082_v1 = vadd.f32 %v3277_v45, %v1038_v63 }
 0x15e   : > { %v4478_v2 = vpack.c.bf16 %v1091_v61, %v1091_v61  ;;  %v1092_v3 = vmax.f32 %v1084_v62, 0.0 }
 0x15f   : > { %v4480_v8 = vpack.c.bf16 %v1089_v0, %v1089_v0  ;;  %v1090_v9 = vmax.f32 %v1082_v1, 0.0 }
 0x160   : > { %v1498_v10 = vrot.slane %v4478_v2, 1  ;;  %v1506_v11 = vrot.slane %v4478_v2, 5  ;;  %v4484_v12 = vpack.c.bf16 %v1092_v3, %v1091_v61  ;;  %v4486_v14 = vpack.c.bf16 %v1092_v3, %v1092_v3 }
 0x161   : > { %v4488_v15 = vpack.c.bf16 %v1090_v9, %v1089_v0  ;;  %v4490_v16 = vpack.c.bf16 %v1090_v9, %v1090_v9  ;;  %v3762_v17 = vpop.f32.mrb[4].mxu0  ;;  %v1496_v20 = vrot.slane %v4480_v8, 1  ;;  %v1504_v21 = vrot.slane %v4480_v8, 5 }
 0x162   : > { %v4493_v19 = vsel %vm1512_vm3, %v1498_v10, %v1506_v11  ;;  %v1051_v22 = vpop.f32.mrb[5].mxu0  ;;  %v1215_v23 = vshrl.u32 %v4486_v14, 16  ;;  %v1217_v24 = vshll.u32 %v4486_v14, 16  ;;  %v1499_v25 = vrot.slane %v4486_v14, 1 }
 0x163   : > { %v1507_v26 = vrot.slane %v4486_v14, 5  ;;  %v3763_v27 = vpop.f32.mrb[6].mxu0  ;;  %v1497_v28 = vrot.slane %v4490_v16, 1  ;;  %v1087_v29 = vadd.f32 %v3762_v17, %v3277_v45  ;;  %v1085_v30 = vadd.f32 %v3277_v45, %v1051_v22 }
 0x164   : > { %v1088_v32 = vadd.f32 %v3763_v27, %v3277_v45  ;;  %v1054_v33 = vpop.f32.mrb[7].mxu0  ;;  %v1505_v35 = vrot.slane %v4490_v16, 5  ;;  %v1196_v37 = vshll.u32 %v4480_v8, 16  ;;  %v1194_v51 = vshrl.u32 %v4480_v8, 16 }
 0x165   : > { %v4503_v34 = vsel %vm1512_vm3, %v1499_v25, %v1507_v26  ;;  %v1086_v36 = vadd.f32 %v3277_v45, %v1054_v33  ;;  %v1095_v43 = vmax.f32 %v1087_v29, 0.0  ;;  %v1093_v47 = vmax.f32 %v1085_v30, 0.0 }
 0x166   : > { %v4509_v40 = vcombine.low %v4493_v19, %v4503_v34  ;;  %v1096_v48 = vmax.f32 %v1088_v32, 0.0  ;;  %v1198_v52 = vrot.slane %v1196_v37, 1  ;;  %v1203_v54 = vshll.u32 %v4490_v16, 16 }
 0x167   : > { %v1094_v50 = vmax.f32 %v1086_v36, 0.0  ;;  %v4513_v55 = vpack.c.bf16 %v1095_v43, %v1095_v43  ;;  %v4515_v5 = vpack.c.bf16 %v1093_v47, %v1093_v47  ;;  %v1201_v18 = vshrl.u32 %v4490_v16, 16 }
 0x168   : > { %v4517_v6 = vpack.c.bf16 %v1096_v48, %v1095_v43  ;;  %v4519_v57 = vpack.c.bf16 %v1096_v48, %v1096_v48  ;;  %v1208_v44 = vshrl.u32 %v4478_v2, 16  ;;  %v1199_v13 = vor.u32 %v1198_v52, %v1194_v51 }
 0x169   : > { %v4521_v58 = vpack.c.bf16 %v1094_v50, %v1093_v47  ;;  %v4523_v59 = vpack.c.bf16 %v1094_v50, %v1094_v50  ;;  %v1236_v4 = vshrl.u32 %v4513_v55, 16  ;;  %v1238_v7 = vshll.u32 %v4513_v55, 16 }
 0x16a   : > { %v1205_v39 = vrot.slane %v1203_v54, 1  ;;  %v1502_v41 = vrot.slane %v4513_v55, 1  ;;  %v1510_v38 = vrot.slane %v4513_v55, 5  ;;  %v1222_v45 = vshrl.u32 %v4515_v5, 16 }
 0x16b   : > { %v1224_v46 = vshll.u32 %v4515_v5, 16  ;;  %v1500_v49 = vrot.slane %v4515_v5, 1  ;;  %v1508_v53 = vrot.slane %v4515_v5, 5  ;;  %v1503_v56 = vrot.slane %v4519_v57, 1 }
 0x16c   : > { %v1511_v60 = vrot.slane %v4519_v57, 5  ;;  %v1229_v62 = vshrl.u32 %v4523_v59, 16  ;;  %v1231_v63 = vshll.u32 %v4523_v59, 16  ;;  %v1501_v0 = vrot.slane %v4523_v59, 1 }
 0x16d   : > { %v1226_v61 = vrot.slane %v1224_v46, 1  ;;  %v1509_v1 = vrot.slane %v4523_v59, 5  ;;  %v1206_v3 = vor.u32 %v1205_v39, %v1201_v18  ;;  %v1210_v9 = vshll.u32 %v4478_v2, 16 }
 0x16e   : > { %v1219_v10 = vrot.slane %v1217_v24, 1  ;;  %v1233_v11 = vrot.slane %v1231_v63, 1  ;;  %v1240_v17 = vrot.slane %v1238_v7, 1  ;;  %v1243_v22 = vshrl.u32 %v4519_v57, 16 }
 0x16f   : > { %v1227_v14 = vor.u32 %v1226_v61, %v1222_v45  ;;  %v1212_v25 = vrot.slane %v1210_v9, 1  ;;  %v1245_v27 = vshll.u32 %v4519_v57, 16  ;;  %v1257_v29 = vrot.slane %v1196_v37, 5 }
 0x170   : > { %v1220_v26 = vor.u32 %v1219_v10, %v1215_v23  ;;  %v1241_v30 = vor.u32 %v1240_v17, %v1236_v4  ;;  %v1258_v32 = vrot.slane %v1203_v54, 5  ;;  %v1259_v33 = vrot.slane %v1210_v9, 5  ;;  %v4048_v9 = vld [vmem:[%s5085_s3 + $0x58] sm:$0xff]   ;;  %v4049_v10 = vld [vmem:[%s5085_s3 + $0x60] sm:$0xff]  }
 0x171   : > { %v1260_v36 = vrot.slane %v1217_v24, 5  ;;  %v1213_v43 = vor.u32 %v1212_v25, %v1208_v44  ;;  %v1247_v47 = vrot.slane %v1245_v27, 1  ;;  %v1261_v48 = vrot.slane %v1224_v46, 5  ;;  %v4052_v25 = vld [vmem:[%s5085_s3 + $0x78] sm:$0xff]  }
 0x172   : > { %v1263_v50 = vrot.slane %v1238_v7, 5  ;;  %v1264_v2 = vrot.slane %v1245_v27, 5  ;;  %v4546_v51 = vsel %vm4272_vm2, %v1199_v13, %v1257_v29  ;;  %v4550_v52 = vsel %vm4272_vm2, %v1206_v3, %v1258_v32  ;;  %v4042_v7 = vld [vmem:[%s5085_s3 + $0x8] sm:$0xff]   ;;  %v4047_v3 = vld [vmem:[%s5085_s3 + $0x50] sm:$0xff]   ;;  %v4053_v29 = vld [vmem:[%s5085_s3 + $0x80] sm:$0xff]  }
 0x173   : > { %v4554_v23 = vsel %vm4272_vm2, %v1220_v26, %v1260_v36  ;;  %v1248_v37 = vor.u32 %v1247_v47, %v1243_v22  ;;  %v4558_v24 = vsel %vm4272_vm2, %v1213_v43, %v1259_v33  ;;  %v4562_v54 = vsel %vm4272_vm2, %v1227_v14, %v1261_v48  ;;  %v4051_v14 = vld [vmem:[%s5085_s3 + $0x70] sm:$0xff]   ;;  %v4054_v43 = vld [vmem:[%s5085_s3 + $0x88] sm:$0xff]  }
 0x174   : > { %v4566_v5 = vsel %vm4272_vm2, %v1241_v30, %v1263_v50  ;;  %v4570_v57 = vcombine.low %v4546_v51, %v4550_v52  ;;  %v4574_v59 = vcombine.low %v4558_v24, %v4554_v23  ;;  %v3326_v18 = vcombine.low %v4550_v52, %v4558_v24  ;;  %v4055_v48 = vld [vmem:[%s5085_s3 + $0x90] sm:$0xff]   ;;  %v4060_v24 = vld [vmem:[%s5085_s3 + $0xb8] sm:$0xff]  }
 0x175   : > { %v3327_v44 = vcombine.low %v4554_v23, %v4562_v54  ;;  %v4582_v4 = vsel %vm4272_vm2, %v1248_v37, %v1264_v2  ;;  %v1234_v13 = vor.u32 %v1233_v11, %v1229_v62  ;;  %v1262_v39 = vrot.slane %v1231_v63, 5  ;;  %v4050_v11 = vld [vmem:[%s5085_s3 + $0x68] sm:$0xff]   ;;  %v4059_v52 = vld [vmem:[%s5085_s3 + $0xb0] sm:$0xff]   ;;  %v4061_v23 = vld [vmem:[%s5085_s3 + $0xc0] sm:$0xff]  }
 0x176   : > { %v4592_v45 = vsel %vm1512_vm3, %v1496_v20, %v1504_v21  ;;  %v4596_v46 = vcombine.low %v4566_v5, %v4582_v4  ;;  %3772 = vmatprep.mubr.msk.bf16.mxu1 %vm1325_vm4, %v4570_v57  ;;  %v3329_v61 = vcombine.low %v4582_v4, %v4546_v51  ;;  %v4607_v62 = vsel %vm1512_vm3, %v1497_v28, %v1505_v35  ;;  %v4064_v51 = vld [vmem:[%s5085_s3 + $0xd8] sm:$0xff]  }
 0x177   : > { %v4610_v8 = vsel %vm1512_vm3, %v1500_v49, %v1508_v53  ;;  %3773 = vmatmul.mubr.msk.bf16.vlgmr.msra.gmra.mrb[0].mxu1 %vm1325_vm4, %v4574_v59  ;;  %v4616_v20 = vsel %vm4272_vm2, %v1234_v13, %v1262_v39  ;;  %v4620_v21 = vcombine.low %v4592_v45, %v4607_v62  ;;  %v4623_v63 = vsel %vm1512_vm3, %v1501_v0, %v1509_v1  ;;  %v4045_v0 = vld [vmem:[%s5085_s3 + $0x40] sm:$0xff]   ;;  %v4046_v1 = vld [vmem:[%s5085_s3 + $0x48] sm:$0xff]  }
 0x178   : > { %v3339_v16 = vcombine.low %v4503_v34, %v4610_v8  ;;  %3781 = vmatpush3.bf16.msra.mxu1 %v4472_v42  ;;  %v4630_v28 = vcombine.low %v4562_v54, %v4616_v20  ;;  %v4634_v31 = vcombine.low %v4610_v8, %v4623_v63  ;;  %v4641_v35 = vsel %vm1512_vm3, %v1502_v41, %v1510_v38  ;;  %v4043_v42 = vld [vmem:[%s5085_s3 + $0x10] sm:$0xff]   ;;  %v4057_v13 = vld [vmem:[%s5085_s3 + $0xa0] sm:$0xff]   ;;  %v4058_v39 = vld [vmem:[%s5085_s3 + $0xa8] sm:$0xff]  }
 0x179   : > { %v4644_v49 = vsel %vm1512_vm3, %v1503_v56, %v1511_v60  ;;  %3782 = vmatprep.subr.bf16.mxu1 %v4042_v7  ;;  %v3328_v55 = vcombine.low %v4616_v20, %v4566_v5  ;;  %v3338_v41 = vcombine.low %v4607_v62, %v4493_v19  ;;  %v3340_v38 = vcombine.low %v4623_v63, %v4641_v35  ;;  %v4044_v60 = vld [vmem:[%s5085_s3 + $0x18] sm:$0xff]   ;;  %v4062_v54 = vld [vmem:[%s5085_s3 + $0xc8] sm:$0xff]   ;;  %v4063_v19 = vld [vmem:[%s5085_s3 + $0xd0] sm:$0xff]  }
 0x17a   : > { %v4651_v53 = vcombine.low %v4641_v35, %v4644_v49  ;;  %3776 = vmatprep.mubr.msk.bf16.mxu1 %vm1325_vm4, %v4630_v28  ;;  %v3341_v56 = vcombine.low %v4644_v49, %v4592_v45  ;;  %v1106_v17 = vunpack.c.h.b16 %v4488_v15  ;;  %v1107_v22 = vunpack.c.l.b16 %v4484_v12  ;;  %v4065_v34 = vld [vmem:[%s5085_s3 + $0xe0] sm:$0xff]   ;;  %v4066_v5 = vld [vmem:[%s5085_s3 + $0xe8] sm:$0xff]   ;;  %v4081_v49 = vld [vmem:[%s5087_s5 + $0x50] sm:$0xff]  }
 0x17b   : > { %v1109_v27 = vunpack.c.l.b16 %v4521_v58  ;;  %v1110_v30 = vunpack.c.h.b16 %v4521_v58  ;;  %v1111_v32 = vunpack.c.l.b16 %v4517_v6  ;;  %v1108_v33 = vunpack.c.h.b16 %v4484_v12  ;;  %v4074_v8 = vld [vmem:[%s5087_s5 + $0xc0] sm:$0xff]   ;;  %v4080_v35 = vld [vmem:[%s5087_s5 + $0x88] sm:$0xff]  }
 0x17c   : > { %3783 = vmatpush3.bf16.msra.mxu1 %v4042_v7  ;;  %v1658_v26 = vpack.c.b16 %v1107_v22, %v1106_v17  ;;  %v1112_v50 = vunpack.c.h.b16 %v4517_v6  ;;  %v1105_v2 = vunpack.c.l.b16 %v4488_v15  ;;  %v4056_v7 = vld [vmem:[%s5085_s3 + $0x98] sm:$0xff]   ;;  %v4075_v20 = vld [vmem:[%s5087_s5] sm:$0xff]   ;;  %v4093_v17 = vld [vmem:[%s5087_s5 + $0x68] sm:$0xff]  }
 0x17d   : > { %3784 = vmatprep.subr.bf16.mxu1 %v4043_v42  ;;  %v1659_v36 = vpack.c.b16 %v1109_v27, %v1108_v33  ;;  %v1660_v47 = vpack.c.b16 %v1111_v32, %v1110_v30  ;;  %v4076_v63 = vld [vmem:[%s5087_s5 + $0x80] sm:$0xff]   ;;  %v4094_v22 = vld [vmem:[%s5087_s5 + $0xe8] sm:$0xff]   ;;  %v4098_v30 = vld [vmem:[%s5087_s5 + $0xf0] sm:$0xff]  }
 0x17e   : > { %v1661_v37 = vpack.c.b16 %v1105_v2, %v1112_v50  ;;  %v4096_v27 = vld [vmem:[%s5087_s5 + $0xa8] sm:$0xff]   ;;  %v4099_v32 = vld [vmem:[%s5087_s5 + $0x30] sm:$0xff]  }
 0x17f   : > { %3777 = vmatmul.mubr.msk.bf16.gmra.mrb[4].mxu1 %vm1325_vm4, %v4596_v46  ;;  %v4100_v33 = vld [vmem:[%s5087_s5 + $0xb0] sm:$0xff]  }
 0x180   : > { %3785 = vmatpush3.bf16.msra.mxu1 %v4043_v42  ;;  %3788 = vmatprep.mubr.msk.bf16.mxu1 %vm1325_vm4, %v4488_v15  ;;  %v4082_v42 = vld [vmem:[%s5087_s5 + $0xd0] sm:$0xff]  }
 0x181   : > { %3786 = vmatprep.subr.bf16.mxu1 %v4044_v60 }
 0x184   : > { %3787 = vmatpush3.bf16.msra.mxu1 %v4044_v60  ;;  %v4088_v60 = vld [vmem:[%s5087_s5 + $0x98] sm:$0xff]  }
 0x185   : > { %3796 = vmatprep.subr.bf16.mxu1 %v4045_v0 }
 0x187   : > { %3789 = vmatmul.mubr.msk.bf16.vlgmr.msra.gmra.mrb[0].mxu1 %vm1325_vm4, %v4484_v12 }
 0x188   : > { %3797 = vmatpush3.bf16.msra.mxu1 %v4045_v0  ;;  %3792 = vmatprep.mubr.msk.bf16.mxu1 %vm1325_vm4, %v4521_v58  ;;  %v4089_v0 = vld [vmem:[%s5087_s5 + $0x60] sm:$0xff]  }
 0x189   : > { %3798 = vmatprep.subr.bf16.mxu1 %v4046_v1 }
 0x18c   : > { %3799 = vmatpush3.bf16.msra.mxu1 %v4046_v1  ;;  %v4090_v1 = vld [vmem:[%s5087_s5 + $0xe0] sm:$0xff]  }
 0x18d   : > { %3800 = vmatprep.subr.bf16.mxu1 %v4047_v3 }
 0x18f   : > { %3793 = vmatmul.mubr.msk.bf16.gmra.mrb[8].mxu1 %vm1325_vm4, %v4517_v6 }
 0x190   : > { %3801 = vmatpush3.bf16.msra.mxu1 %v4047_v3  ;;  %3804 = vmatprep.mubr.msk.bf16.mxu1 %vm1325_vm4, %v4620_v21 }
 0x191   : > { %3802 = vmatprep.subr.bf16.mxu1 %v4048_v9 }
 0x194   : > { %3803 = vmatpush3.bf16.msra.mxu1 %v4048_v9 }
 0x195   : > { %3812 = vmatprep.subr.bf16.mxu1 %v4049_v10 }
 0x197   : > { %3805 = vmatmul.mubr.msk.bf16.vlgmr.msra.gmra.mrb[0].mxu1 %vm1325_vm4, %v4509_v40 }
 0x198   : > { %3813 = vmatpush3.bf16.msra.mxu1 %v4049_v10  ;;  %3808 = vmatprep.mubr.msk.bf16.mxu1 %vm1325_vm4, %v4634_v31  ;;  %v4091_v10 = vld [vmem:[%s5087_s5 + $0x20] sm:$0xff]  }
 0x199   : > { %3814 = vmatprep.subr.bf16.mxu1 %v4050_v11 }
 0x19c   : > { %3815 = vmatpush3.bf16.msra.mxu1 %v4050_v11  ;;  %v4092_v11 = vld [vmem:[%s5087_s5 + $0xa0] sm:$0xff]  }
 0x19d   : > { %3816 = vmatprep.subr.bf16.mxu1 %v4051_v14 }
 0x19f   : > { %3809 = vmatmul.mubr.msk.bf16.gmra.mrb[12].mxu1 %vm1325_vm4, %v4651_v53 }
 0x1a0   : > { %3817 = vmatpush3.bf16.msra.mxu1 %v4051_v14  ;;  %3820 = vmatprep.mubr.msk.bf16.mxu1 %vm1325_vm4, %v1658_v26  ;;  %v4095_v26 = vld [vmem:[%s5087_s5 + $0x28] sm:$0xff]  }
 0x1a1   : > { %3818 = vmatprep.subr.bf16.mxu1 %v4052_v25 }
 0x1a4   : > { %3819 = vmatpush3.bf16.msra.mxu1 %v4052_v25 }
 0x1a5   : > { %3828 = vmatprep.subr.bf16.mxu1 %v4053_v29 }
 0x1a7   : > { %3821 = vmatmul.mubr.msk.bf16.vlgmr.msra.gmra.mrb[0].mxu1 %vm1325_vm4, %v1659_v36 }
 0x1a8   : > { %3829 = vmatpush3.bf16.msra.mxu1 %v4053_v29  ;;  %3824 = vmatprep.mubr.msk.bf16.mxu1 %vm1325_vm4, %v1660_v47  ;;  %v4097_v29 = vld [vmem:[%s5087_s5 + $0x70] sm:$0xff]  }
 0x1a9   : > { %3830 = vmatprep.subr.bf16.mxu1 %v4054_v43 }
 0x1ac   : > { %3831 = vmatpush3.bf16.msra.mxu1 %v4054_v43 }
 0x1ad   : > { %3832 = vmatprep.subr.bf16.mxu1 %v4055_v48 }
 0x1af   : > { %3825 = vmatmul.mubr.msk.bf16.gmra.mrb[16].mxu1 %vm1325_vm4, %v1661_v37 }
 0x1b0   : > { %3833 = vmatpush3.bf16.msra.mxu1 %v4055_v48  ;;  %3836 = vmatprep.mubr.msk.bf16.mxu1 %vm1325_vm4, %v3326_v18  ;;  %v4068_v18 = vld [vmem:[%s5085_s3 + $0xf8] sm:$0xff]  }
 0x1b1   : > { %3834 = vmatprep.subr.bf16.mxu1 %v4056_v7 }
 0x1b4   : > { %3835 = vmatpush3.bf16.msra.mxu1 %v4056_v7 }
 0x1b5   : > { %3844 = vmatprep.subr.bf16.mxu1 %v4057_v13 }
 0x1b7   : > { %3837 = vmatmul.mubr.msk.bf16.vlgmr.msra.gmra.mrb[0].mxu1 %vm1325_vm4, %v3327_v44 }
 0x1b8   : > { %3845 = vmatpush3.bf16.msra.mxu1 %v4057_v13  ;;  %3840 = vmatprep.mubr.msk.bf16.mxu1 %vm1325_vm4, %v3328_v55  ;;  %v4084_v55 = vld [vmem:[%s5087_s5 + $0x90] sm:$0xff]  }
 0x1b9   : > { %3846 = vmatprep.subr.bf16.mxu1 %v4058_v39 }
 0x1bc   : > { %3847 = vmatpush3.bf16.msra.mxu1 %v4058_v39 }
 0x1bd   : > { %3848 = vmatprep.subr.bf16.mxu1 %v4059_v52 }
 0x1bf   : > { %3841 = vmatmul.mubr.msk.bf16.gmra.mrb[20].mxu1 %vm1325_vm4, %v3329_v61 }
 0x1c0   : > { %3849 = vmatpush3.bf16.msra.mxu1 %v4059_v52  ;;  %3852 = vmatprep.mubr.msk.bf16.mxu1 %vm1325_vm4, %v3338_v41  ;;  %v4085_v41 = vld [vmem:[%s5087_s5 + $0x58] sm:$0xff]  }
 0x1c1   : > { %3850 = vmatprep.subr.bf16.mxu1 %v4060_v24 }
 0x1c4   : > { %3851 = vmatpush3.bf16.msra.mxu1 %v4060_v24 }
 0x1c5   : > { %3860 = vmatprep.subr.bf16.mxu1 %v4061_v23 }
 0x1c7   : > { %3853 = vmatmul.mubr.msk.bf16.vlgmr.msra.gmra.mrb[0].mxu1 %vm1325_vm4, %v3339_v16  ;;  %v4077_v16 = vld [vmem:[%s5087_s5 + $0x48] sm:$0xff]  }
 0x1c8   : > { %3861 = vmatpush3.bf16.msra.mxu1 %v4061_v23  ;;  %3856 = vmatprep.mubr.msk.bf16.mxu1 %vm1325_vm4, %v3340_v38  ;;  %v4086_v38 = vld [vmem:[%s5087_s5 + $0xd8] sm:$0xff]  }
 0x1c9   : > { %3862 = vmatprep.subr.bf16.mxu1 %v4062_v54 }
 0x1cc   : > { %3863 = vmatpush3.bf16.msra.mxu1 %v4062_v54 }
 0x1cd   : > { %3864 = vmatprep.subr.bf16.mxu1 %v4063_v19 }
 0x1cf   : > { %3857 = vmatmul.mubr.msk.bf16.gmra.mrb[24].mxu1 %vm1325_vm4, %v3341_v56  ;;  %v4087_v56 = vld [vmem:[%s5087_s5 + $0x18] sm:$0xff]  }
 0x1d0   : > { %3865 = vmatpush3.bf16.msra.mxu1 %v4063_v19  ;;  %3868 = vmatprep.mubr.msk.bf16.mxu1 %vm1325_vm4, %v4484_v12  ;;  %v4067_v12 = vld [vmem:[%s5085_s3 + $0xf0] sm:$0xff]  }
 0x1d1   : > { %3866 = vmatprep.subr.bf16.mxu1 %v4064_v51 }
 0x1d4   : > { %3867 = vmatpush3.bf16.msra.mxu1 %v4064_v51 }
 0x1d5   : > { %3876 = vmatprep.subr.bf16.mxu1 %v4065_v34 }
 0x1d7   : > { %3869 = vmatmul.mubr.msk.bf16.vlgmr.msra.gmra.mrb[0].mxu1 %vm1325_vm4, %v4521_v58  ;;  %v4070_v58 = vld [vmem:[%s5085_s3 + $0x108] sm:$0xff]  }
 0x1d8   : > { %3877 = vmatpush3.bf16.msra.mxu1 %v4065_v34  ;;  %3872 = vmatprep.mubr.msk.bf16.mxu1 %vm1325_vm4, %v4517_v6  ;;  %v4069_v6 = vld [vmem:[%s5085_s3 + $0x100] sm:$0xff]  }
 0x1d9   : > { %3878 = vmatprep.subr.bf16.mxu1 %v4066_v5 }
 0x1dc   : > { %3879 = vmatpush3.bf16.msra.mxu1 %v4066_v5 }
 0x1dd   : > { %3880 = vmatprep.subr.bf16.mxu1 %v4067_v12 }
 0x1df   : > { %3873 = vmatmul.mubr.msk.bf16.gmra.mrb[28].mxu1 %vm1325_vm4, %v4488_v15  ;;  %v4071_v15 = vld [vmem:[%s5085_s3 + $0x110] sm:$0xff]  }
 0x1e0   : > { %3881 = vmatpush3.bf16.msra.mxu1 %v4067_v12  ;;  %3884 = vmatprep.mubr.msk.bf16.mxu1 %vm1325_vm4, %v4574_v59  ;;  %v4072_v59 = vld [vmem:[%s5085_s3 + $0x118] sm:$0xff]  }
 0x1e1   : > { %3882 = vmatprep.subr.bf16.mxu1 %v4068_v18 }
 0x1e4   : > { %3883 = vmatpush3.bf16.msra.mxu1 %v4068_v18 }
 0x1e5   : > { %3892 = vmatprep.subr.bf16.mxu1 %v4069_v6 }
 0x1e7   : > { %3885 = vmatmul.mubr.msk.bf16.vlgmr.msra.gmra.mrb[0].mxu1 %vm1325_vm4, %v4630_v28  ;;  %v4078_v28 = vld [vmem:[%s5087_s5 + $0xc8] sm:$0xff]  }
 0x1e8   : > { %3893 = vmatpush3.bf16.msra.mxu1 %v4069_v6  ;;  %3888 = vmatprep.mubr.msk.bf16.mxu1 %vm1325_vm4, %v4596_v46  ;;  %v3374_v6 = vld [vmem:[%s5086_s4] ss:$0 sm:$0xff] }
 0x1e9   : > { %3894 = vmatprep.subr.bf16.mxu1 %v4070_v58 }
 0x1ec   : > { %3895 = vmatpush3.bf16.msra.mxu1 %v4070_v58 }
 0x1ed   : > { %3896 = vmatprep.subr.bf16.mxu1 %v4071_v15 }
 0x1ef   : > { %3889 = vmatmul.mubr.msk.bf16.gmra.mrb[32].mxu1 %vm1325_vm4, %v4570_v57 }
 0x1f0   : > { %3897 = vmatpush3.bf16.msra.mxu1 %v4071_v15  ;;  %3900 = vmatprep.mubr.msk.bf16.mxu1 %vm1325_vm4, %v4509_v40  ;;  %v4073_v40 = vld [vmem:[%s5087_s5 + $0x40] sm:$0xff]   ;;  %v4101_v15 = vld [vmem:[%s5087_s5 + $0x78] sm:$0xff]  }
 0x1f1   : > { %3898 = vmatprep.subr.bf16.mxu1 %v4072_v59  ;;  %3575 = vmatprep.subr.bf16.mxu0 %v4073_v40 }
 0x1f2   : > { %3576 = vmatpush3.bf16.msra.mxu0 %v4075_v20 }
 0x1f3   : > { %3577 = vmatprep.subr.bf16.mxu0 %v4077_v16  ;;  %v4106_v16 = vld [vmem:[%s5087_s5 + $0x1c0] sm:$0xff]  }
 0x1f4   : > { %3899 = vmatpush3.bf16.msra.mxu1 %v4072_v59  ;;  %v4102_v59 = vld [vmem:[%s5087_s5 + $0xf8] sm:$0xff]  }
 0x1f5   : > { %3597 = vmatprep.subr.bf16.mxu1 %v4074_v8 }
 0x1f7   : > { %3901 = vmatmul.mubr.msk.bf16.vlgmr.msra.gmra.mrb[0].mxu1 %vm1325_vm4, %v4634_v31  ;;  %v4079_v31 = vld [vmem:[%s5087_s5 + $0x8] sm:$0xff]  }
 0x1f8   : > { %3904 = vmatprep.mubr.msk.bf16.mxu1 %vm1325_vm4, %v4651_v53  ;;  %3598 = vmatpush3.bf16.msra.mxu1 %v4076_v63  ;;  %v4083_v53 = vld [vmem:[%s5087_s5 + $0x10] sm:$0xff]   ;;  %v4105_v63 = vld [vmem:[%s5087_s5 + $0x140] sm:$0xff]  }
 0x1f9   : > { %3599 = vmatprep.subr.bf16.mxu1 %v4078_v28  ;;  %3578 = vmatpush3.bf16.msra.mxu0 %v4079_v31 }
 0x1fa   : > { %3579 = vmatprep.subr.bf16.mxu0 %v4081_v49 }
 0x1fc   : > { %3600 = vmatpush3.bf16.msra.mxu1 %v4080_v35 }
 0x1fd   : > { %3601 = vmatprep.subr.bf16.mxu1 %v4082_v42  ;;  %3580 = vmatpush3.bf16.msra.mxu0 %v4083_v53 }
 0x1fe   : > { %3581 = vmatprep.subr.bf16.mxu0 %v4085_v41 }
 0x1ff   : > { %3905 = vmatmul.mubr.msk.bf16.gmra.mrb[36].mxu1 %vm1325_vm4, %v4620_v21 }
 0x200   : > { %3602 = vmatpush3.bf16.msra.mxu1 %v4084_v55 }
 0x201   : > { %3603 = vmatprep.subr.bf16.mxu1 %v4086_v38  ;;  %3582 = vmatpush3.bf16.msra.mxu0 %v4087_v56 }
 0x202   : > { %3583 = vmatprep.subr.bf16.mxu0 %v4089_v0 }
 0x204   : > { %3604 = vmatpush3.bf16.msra.mxu1 %v4088_v60 }
 0x205   : > { %3605 = vmatprep.subr.bf16.mxu1 %v4090_v1  ;;  %3584 = vmatpush3.bf16.msra.mxu0 %v4091_v10 }
 0x206   : > { %3585 = vmatprep.subr.bf16.mxu0 %v4093_v17 }
 0x208   : > { %3606 = vmatpush3.bf16.msra.mxu1 %v4092_v11 }
 0x209   : > { %3607 = vmatprep.subr.bf16.mxu1 %v4094_v22  ;;  %3586 = vmatpush3.bf16.msra.mxu0 %v4095_v26 }
 0x20a   : > { %3587 = vmatprep.subr.bf16.mxu0 %v4097_v29  ;;  %v4107_v29 = vld [vmem:[%s5087_s5 + $0x100] sm:$0xff]  }
 0x20c   : > { %3608 = vmatpush3.bf16.msra.mxu1 %v4096_v27 }
 0x20d   : > { %3609 = vmatprep.subr.bf16.mxu1 %v4098_v30  ;;  %3588 = vmatpush3.bf16.msra.mxu0 %v4099_v32  ;;  %v4108_v30 = vld [vmem:[%s5087_s5 + $0x180] sm:$0xff]  }
 0x20e   : > { %3589 = vmatprep.subr.bf16.mxu0 %v4101_v15  ;;  %v4123_v15 = vld [vmem:[%s5087_s5 + $0x120] sm:$0xff]  }
 0x210   : > { %3610 = vmatpush3.bf16.msra.mxu1 %v4100_v33 }
 0x211   : > { %3611 = vmatprep.subr.bf16.mxu1 %v4102_v59  ;;  %v4124_v59 = vld [vmem:[%s5087_s5 + $0x1a0] sm:$0xff]  }
 0x252   : > { %v3778_v44 = vpop.f32.mrb[4].mxu1 }
 0x253   : > { %v1388_v4 = vpop.f32.mrb[5].mxu1  ;;  %v4103_v44 = vld [vmem:[%s5087_s5 + $0x38] sm:$0xff]  }
 0x254   : > { %v3779_v45 = vpop.f32.mrb[6].mxu1  ;;  %3590 = vmatpush3.bf16.msra.mxu0 %v4103_v44  ;;  %v4125_v44 = vld [vmem:[%s5087_s5 + $0x168] sm:$0xff]  }
 0x255   : > { %v1390_v46 = vpop.f32.mrb[7].mxu1  ;;  %3619 = vmatprep.subr.bf16.mxu0 %v4105_v63  ;;  %v4135_v63 = vld [vmem:[%s5087_s5 + $0x138] sm:$0xff]  }
 0x262   : > { %v3794_v57 = vpop.f32.mrb[8].mxu1 }
 0x263   : > { %v1485_v61 = vpop.f32.mrb[9].mxu1 }
 0x264   : > { %v3795_v62 = vpop.f32.mrb[10].mxu1  ;;  %v4104_v61 = vld [vmem:[%s5087_s5 + $0xb8] sm:$0xff]  }
 0x265   : > { %v1487_v21 = vpop.f32.mrb[11].mxu1  ;;  %3612 = vmatpush3.bf16.msra.mxu1 %v4104_v61  ;;  %v4130_v61 = vld [vmem:[%s5087_s5 + $0x1f0] sm:$0xff]  }
 0x266   : > { %3641 = vmatprep.subr.bf16.mxu1 %v4106_v16  ;;  %v4136_v16 = vld [vmem:[%s5087_s5 + $0x1b8] sm:$0xff]  }
 0x272   : > { %v3810_v3 = vpop.f32.mrb[12].mxu1 }
 0x273   : > { %v1643_v9 = vpop.f32.mrb[13].mxu1 }
 0x274   : > { %v3811_v14 = vpop.f32.mrb[14].mxu1 }
 0x275   : > { %v1645_v25 = vpop.f32.mrb[15].mxu1 }
 0x282   : > { %v3826_v36 = vpop.f32.mrb[16].mxu1 }
 0x283   : > { %v1748_v43 = vpop.f32.mrb[17].mxu1  ;;  %v4109_v36 = vld [vmem:[%s5087_s5 + $0x148] sm:$0xff]  }
 0x284   : > { %v3827_v47 = vpop.f32.mrb[18].mxu1  ;;  %v4110_v43 = vld [vmem:[%s5087_s5 + $0x1c8] sm:$0xff]  }
 0x285   : > { %v1750_v48 = vpop.f32.mrb[19].mxu1 }
 0x292   : > { %v3842_v50 = vpop.f32.mrb[20].mxu1 }
 0x293   : > { %v1853_v2 = vpop.f32.mrb[21].mxu1  ;;  %v4111_v50 = vld [vmem:[%s5087_s5 + $0x108] sm:$0xff]  }
 0x294   : > { %v3843_v37 = vpop.f32.mrb[22].mxu1 }
 0x295   : > { %v1855_v7 = vpop.f32.mrb[23].mxu1  ;;  %v4112_v37 = vld [vmem:[%s5087_s5 + $0x188] sm:$0xff]  }
 0x2a2   : > { %v3858_v13 = vpop.f32.mrb[24].mxu1 }
 0x2a3   : > { %v1958_v39 = vpop.f32.mrb[25].mxu1  ;;  %v4113_v13 = vld [vmem:[%s5087_s5 + $0x150] sm:$0xff]  }
 0x2a4   : > { %v3859_v52 = vpop.f32.mrb[26].mxu1  ;;  %v4114_v39 = vld [vmem:[%s5087_s5 + $0x1d0] sm:$0xff]  }
 0x2a5   : > { %v1960_v24 = vpop.f32.mrb[27].mxu1 }
 0x2a6   : > { %v4115_v24 = vld [vmem:[%s5087_s5 + $0x110] sm:$0xff]  }
 0x2b2   : > { %v3874_v23 = vpop.f32.mrb[28].mxu1 }
 0x2b3   : > { %v2063_v54 = vpop.f32.mrb[29].mxu1  ;;  %v4116_v23 = vld [vmem:[%s5087_s5 + $0x190] sm:$0xff]  }
 0x2b4   : > { %v3875_v19 = vpop.f32.mrb[30].mxu1 }
 0x2b5   : > { %v2065_v51 = vpop.f32.mrb[31].mxu1 }
 0x2b6   : > { %v4117_v51 = vld [vmem:[%s5087_s5 + $0x158] sm:$0xff]  }
 0x2c2   : > { %v3890_v34 = vpop.f32.mrb[32].mxu1 }
 0x2c3   : > { %v2152_v5 = vpop.f32.mrb[33].mxu1  ;;  %v4118_v34 = vld [vmem:[%s5087_s5 + $0x1d8] sm:$0xff]  }
 0x2c4   : > { %v3891_v12 = vpop.f32.mrb[34].mxu1 }
 0x2c5   : > { %v2154_v18 = vpop.f32.mrb[35].mxu1  ;;  %v4119_v12 = vld [vmem:[%s5087_s5 + $0x118] sm:$0xff]  }
 0x2c6   : > { %v4120_v18 = vld [vmem:[%s5087_s5 + $0x198] sm:$0xff]  }
 0x2ca   : > { %v3902_v58 = vpop.f32.mrb[0].mxu1 }
 0x2cb   : > { %v2265_v4 = vadd.f32 %v3902_v58, %v3374_v6  ;;  %v2225_v45 = vpop.f32.mrb[1].mxu1  ;;  %v4122_v58 = vld [vmem:[%s5087_s5 + $0x1e0] sm:$0xff]  }
 0x2cc   : > { %v2263_v46 = vadd.f32 %v3374_v6, %v2225_v45  ;;  %v3903_v57 = vpop.f32.mrb[2].mxu1  ;;  %v4127_v45 = vld [vmem:[%s5087_s5 + $0x128] sm:$0xff]  }
 0x2cd   : > { %v2266_v62 = vadd.f32 %v3903_v57, %v3374_v6  ;;  %v2228_v40 = vpop.f32.mrb[3].mxu1  ;;  %v2269_v20 = vmax.f32 %v2265_v4, 0.0  ;;  %v4126_v4 = vld [vmem:[%s5087_s5 + $0x1e8] sm:$0xff]   ;;  %v4129_v57 = vld [vmem:[%s5087_s5 + $0x170] sm:$0xff]  }
 0x2ce   : > { %v2264_v8 = vadd.f32 %v3374_v6, %v2228_v40  ;;  %v2267_v28 = vmax.f32 %v2263_v46, 0.0  ;;  %v4121_v6 = vld [vmem:[%s5087_s5 + $0x160] sm:$0xff]   ;;  %v4128_v46 = vld [vmem:[%s5087_s5 + $0x1a8] sm:$0xff]   ;;  %v4132_v40 = vld [vmem:[%s5087_s5 + $0x1b0] sm:$0xff]  }
 0x2cf   : > { %v2270_v21 = vmax.f32 %v2266_v62, 0.0  ;;  %v4131_v62 = vld [vmem:[%s5087_s5 + $0x130] sm:$0xff]  }
 0x2d0   : > { %v2268_v31 = vmax.f32 %v2264_v8, 0.0 }
 0x2d1   : > { %v4941_v35 = vpack.c.bf16 %v2270_v21, %v2269_v20  ;;  %v4133_v20 = vld [vmem:[%s5087_s5 + $0x178] sm:$0xff]  }
 0x2d2   : > { %v2271_v49 = vpack.c.bf16 %v2268_v31, %v2267_v28  ;;  %v3906_v42 = vpop.f32.mrb[36].mxu1  ;;  %v4134_v21 = vld [vmem:[%s5087_s5 + $0x1f8] sm:$0xff]  }
 0x2d3   : > { %v2241_v53 = vpop.f32.mrb[37].mxu1  ;;  %v2292_v1 = vshrl.u32 %v4941_v35, 16  ;;  %v2297_v2 = vrot.slane %v4941_v35, 1  ;;  %v2305_v54 = vrot.slane %v4941_v35, 5  ;;  %v2301_v31 = vrot.slane %v4941_v35, 4 }
 0x2d4   : > { %v3907_v55 = vpop.f32.mrb[38].mxu1  ;;  %v2274_v41 = vshrl.u32 %v2271_v49, 16  ;;  %v2279_v11 = vrot.slane %v2271_v49, 1  ;;  %v2287_v14 = vrot.slane %v2271_v49, 5  ;;  %v2283_v27 = vrot.slane %v2271_v49, 4  ;;  %v4137_v53 = vld [vmem:[%s5089_s7] sm:$0xff]  }
 0x2d5   : > { %v2243_v38 = vpop.f32.mrb[39].mxu1  ;;  %v2298_v3 = vrot.slane %v2292_v1, 1  ;;  %v2302_v9 = vrot.slane %v2292_v1, 4  ;;  %v2306_v10 = vrot.slane %v2292_v1, 5  ;;  %v4156_v55 = vmov 0.0  }
 0x2d6   : > { %v2288_v56 = vrot.slane %v2274_v41, 5  ;;  %v2280_v60 = vrot.slane %v2274_v41, 1  ;;  %v2284_v0 = vrot.slane %v2274_v41, 4  ;;  %v4140_v38 = vld [vmem:[%s5089_s7 + $0x18] sm:$0xff]  }
 0x2d8   : > { %2289 = vrot.lane.b32.xlu1 %v2288_v56, %s4155_s29  ;;  %2281 = vrot.lane.b32.xlu0 %v2280_v60, %s4155_s29 }
 0x2dc   : > { %2285 = vrot.lane.b32.xlu1 %v2284_v0, %s4155_s29  ;;  %2276 = vrot.lane.b32.xlu0 %v2274_v41, %s4155_s29  ;;  %v4138_v41 = vld [vmem:[%s5089_s7 + $0x8] sm:$0xff]   ;;  %v2467_v0 = vld [vmem:[%s5088_s6] sm:$0x1] }
 0x2e0   : > { %2294 = vrot.lane.b32.xlu1 %v2292_v1, %s4155_s29  ;;  %2299 = vrot.lane.b32.xlu0 %v2298_v3, %s4155_s29 }
 0x2e4   : > { %2303 = vrot.lane.b32.xlu1 %v2302_v9, %s4155_s29  ;;  %2307 = vrot.lane.b32.xlu0 %v2306_v10, %s4155_s29 }
 0x34a   : > { %v2290_v17 = vpop.permute.xlu1 %2289  ;;  %v2282_v22 = vpop.permute.xlu0 %2281 }
 0x34b   : > { %v2314_v25 = vsel %vm1325_vm4, %v2279_v11, %v2282_v22  ;;  %v2322_v26 = vsel %vm1325_vm4, %v2287_v14, %v2290_v17 }
 0x34c   : > { %2884 = vmatprep.mubr.bf16.mxu0 %v2314_v25  ;;  %2924 = vmatprep.mubr.bf16.mxu1 %v2322_v26 }
 0x34e   : > { %v2286_v32 = vpop.permute.xlu1 %2285  ;;  %v2277_v33 = vpop.permute.xlu0 %2276 }
 0x34f   : > { %v2318_v47 = vsel %vm1325_vm4, %v2283_v27, %v2286_v32  ;;  %v2310_v48 = vsel %vm1325_vm4, %v2271_v49, %v2277_v33 }
 0x350   : > { %2885 = vmatmul.mubr.bf16.vlgmr.msra.gmra.mrb[8].mxu0 %v2310_v48  ;;  %2925 = vmatmul.mubr.bf16.vlgmr.msra.gmra.mrb[40].mxu1 %v2318_v47 }
 0x351   : > { %3620 = vmatpush3.bf16.msra.mxu0 %v4107_v29  ;;  %3642 = vmatpush3.bf16.msra.mxu1 %v4108_v30 }
 0x352   : > { %v2300_v7 = vpop.permute.xlu0 %2299  ;;  %3621 = vmatprep.subr.bf16.mxu0 %v4109_v36  ;;  %3643 = vmatprep.subr.bf16.mxu1 %v4110_v43  ;;  %v2295_v8 = vpop.permute.xlu1 %2294 }
 0x353   : > { %v2329_v52 = vsel %vm1325_vm4, %v2297_v2, %v2300_v7  ;;  %v2325_v49 = vsel %vm1325_vm4, %v4941_v35, %v2295_v8  ;;  %v4139_v35 = vld [vmem:[%s5089_s7 + $0x10] sm:$0xff]  }
 0x354   : > { %2964 = vmatprep.mubr.bf16.mxu0 %v2329_v52 }
 0x355   : > { %3622 = vmatpush3.bf16.msra.mxu0 %v4111_v50  ;;  %3644 = vmatpush3.bf16.msra.mxu1 %v4112_v37 }
 0x356   : > { %v2308_v19 = vpop.permute.xlu0 %2307  ;;  %3623 = vmatprep.subr.bf16.mxu0 %v4113_v13  ;;  %3645 = vmatprep.subr.bf16.mxu1 %v4114_v39  ;;  %v2304_v28 = vpop.permute.xlu1 %2303  ;;  %v3022_v39 = vld [vmem:[%s5090_s8] sm:$0x1] }
 0x357   : > { %v2337_v5 = vsel %vm1325_vm4, %v2305_v54, %v2308_v19  ;;  %v2333_v42 = vsel %vm1325_vm4, %v2301_v31, %v2304_v28 }
 0x358   : > { %3004 = vmatprep.mubr.bf16.mxu1 %v2337_v5 }
 0x359   : > { %3624 = vmatpush3.bf16.msra.mxu0 %v4115_v24  ;;  %3646 = vmatpush3.bf16.msra.mxu1 %v4116_v23  ;;  %v3110_v24 = vld [vmem:[%s366_s30] sm:$0x1] }
 0x35a   : > { %3625 = vmatprep.subr.bf16.mxu0 %v4117_v51  ;;  %3647 = vmatprep.subr.bf16.mxu1 %v4118_v34 }
 0x35d   : > { %3626 = vmatpush3.bf16.msra.mxu0 %v4119_v12  ;;  %3648 = vmatpush3.bf16.msra.mxu1 %v4120_v18  ;;  %v3115_v18 = vlaneseq }
 0x35e   : > { %3627 = vmatprep.subr.bf16.mxu0 %v4121_v6  ;;  %3649 = vmatprep.subr.bf16.mxu1 %v4122_v58 }
 0x35f   : > { %v3116_v58 = vand.u32 127, %v3115_v18 }
 0x361   : > { %3628 = vmatpush3.bf16.msra.mxu0 %v4123_v15  ;;  %3650 = vmatpush3.bf16.msra.mxu1 %v4124_v59  ;;  %vm3139_vm10 = vcmp.eq.s32.totalorder %v3116_v58, 0  ;;  %vm3142_vm11 = vcmp.eq.s32.totalorder %v3116_v58, 1  ;;  %vm3145_vm12 = vcmp.eq.s32.totalorder %v3116_v58, 2  ;;  %vm3148_vm13 = vcmp.eq.s32.totalorder %v3116_v58, 3 }
 0x362   : > { %3629 = vmatprep.subr.bf16.mxu0 %v4125_v44  ;;  %3651 = vmatprep.subr.bf16.mxu1 %v4126_v4 }
 0x365   : > { %3630 = vmatpush3.bf16.msra.mxu0 %v4127_v45  ;;  %3652 = vmatpush3.bf16.msra.mxu1 %v4128_v46 }
 0x366   : > { %3631 = vmatprep.subr.bf16.mxu0 %v4129_v57  ;;  %3653 = vmatprep.subr.bf16.mxu1 %v4130_v61 }
 0x369   : > { %3632 = vmatpush3.bf16.msra.mxu0 %v4131_v62  ;;  %3654 = vmatpush3.bf16.msra.mxu1 %v4132_v40  ;;  %v4158_v40 = vmov 6  }
 0x36a   : > { %3633 = vmatprep.subr.bf16.mxu0 %v4133_v20  ;;  %3655 = vmatprep.subr.bf16.mxu1 %v4134_v21 }
 0x36b   : > { %3988 = vset.pattern.permute.xlu0 %v4158_v40 }
 0x36d   : > { %3634 = vmatpush3.bf16.msra.mxu0 %v4135_v63  ;;  %3656 = vmatpush3.bf16.msra.mxu1 %v4136_v16 }
 0x36e   : > { %3908 = vmatprep.subr.bf16.mxu0 %v4156_v55 }
 0x370   : > { %2965 = vmatmul.mubr.bf16.vlgmr.msra.gmra.mrb[12].mxu0 %v2325_v49  ;;  %3005 = vmatmul.mubr.bf16.vlgmr.msra.gmra.mrb[44].mxu1 %v2333_v42 }
 0x371   : > { %3909 = vmatpush3.bf16.msra.mxu0 %v4137_v53  ;;  %3916 = vmatprep.mubr.msk.bf16.mxu0 %vm4157_vm5, %v4156_v55 }
 0x372   : > { %3910 = vmatprep.subr.bf16.mxu0 %v4156_v55 }
 0x375   : > { %3911 = vmatpush3.bf16.msra.mxu0 %v4138_v41 }
 0x376   : > { %3912 = vmatprep.subr.bf16.mxu0 %v4156_v55 }
 0x379   : > { %3913 = vmatpush3.bf16.msra.mxu0 %v4139_v35 }
 0x37a   : > { %3914 = vmatprep.subr.bf16.mxu0 %v4156_v55 }
 0x37d   : > { %3915 = vmatpush3.bf16.msra.mxu0 %v4140_v38 }
 0x423   : > { %v3591_v56 = vpop.f32.mrb[8].mxu0  ;;  %v3613_v60 = vpop.f32.mrb[40].mxu1 }
 0x424   : > { %v3592_v1 = vpop.f32.mrb[9].mxu0  ;;  %v3614_v3 = vpop.f32.mrb[41].mxu1 }
 0x425   : > { %v3593_v9 = vadd.f32 %v3592_v1, %v3591_v56  ;;  %v3615_v10 = vadd.f32 %v3614_v3, %v3613_v60  ;;  %v3594_v11 = vpop.f32.mrb[10].mxu0  ;;  %v3616_v14 = vpop.f32.mrb[42].mxu1 }
 0x426   : > { %v3595_v17 = vpop.f32.mrb[11].mxu0  ;;  %v3617_v22 = vpop.f32.mrb[43].mxu1 }
 0x427   : > { %v2887_v25 = vadd.f32 %v3593_v9, %v2467_v0 }
 0x429   : > { %v2927_v26 = vadd.f32 %v3615_v10, %v2887_v25 }
 0x443   : > { %v3635_v27 = vpop.f32.mrb[12].mxu0  ;;  %v3657_v29 = vpop.f32.mrb[44].mxu1 }
 0x444   : > { %v3636_v30 = vpop.f32.mrb[13].mxu0  ;;  %v3658_v32 = vpop.f32.mrb[45].mxu1 }
 0x445   : > { %v3637_v33 = vadd.f32 %v3636_v30, %v3635_v27  ;;  %v3659_v36 = vadd.f32 %v3658_v32, %v3657_v29  ;;  %v3638_v43 = vpop.f32.mrb[14].mxu0  ;;  %v3660_v47 = vpop.f32.mrb[46].mxu1 }
 0x446   : > { %v3639_v48 = vpop.f32.mrb[15].mxu0  ;;  %v3661_v50 = vpop.f32.mrb[47].mxu1 }
 0x447   : > { %v2967_v2 = vadd.f32 %v3637_v33, %v2927_v26 }
 0x449   : > { %v3007_v37 = vadd.f32 %v3659_v36, %v2967_v2 }
 0x44b   : > { %v3012_v7 = vmax.f32 %v3007_v37, 0.0 }
 0x44d   : > { %v3013_v13 = vpack.c.bf16 %v3012_v7, %v3012_v7 }
 0x44f   : > { %3917 = vmatmul.mubr.msk.bf16.vlgmr.msra.gmra.mrb[16].mxu0 %vm1325_vm4, %v3013_v13 }
 0x522   : > { %v3084_v52 = vpop.f32.mrb[16].mxu0 }
 0x523   : > { %v3085_v23 = vadd.f32 %v3084_v52, %v3022_v39  ;;  %v3918_v54 = vpop.f32.mrb[17].mxu0 }
 0x524   : > { %v3087_v19 = vpop.f32.mrb[18].mxu0 }
 0x525   : > { %v3919_v51 = vpop.f32.mrb[19].mxu0  ;;  %v3091_v34 = vsel %vm3090_vm6, %v3085_v23, -inf  ;;  %v3111_v5 = vadd.f32 %v3110_v24, %v3085_v23 }
 0x526   : > { %3092 = vmax.xlane.f32.xlu1 %v3091_v34 }
 0x527   : > { %v3112_v12 = vsel %vm3090_vm6, %v3111_v5, -inf }
 0x528   : > { %3113 = vmax.xlane.f32.xlu0 %v3112_v12 }
 0x5b3   : > { %v3093_v6 = vpop.xlane.xlu1 %3092 }
 0x5b4   : > { %v3094_v15 = vsub.f32 %v3085_v23, %v3093_v6 }
 0x5b5   : > { %v3114_v59 = vpop.xlane.xlu0 %3113 }
 0x5b6   : > { %v3095_v44 = vmul.f32 1.442695, %v3094_v15  ;;  %vm3117_vm7 = vcmp.ge.f32.partialorder %v3111_v5, %v3114_v59 }
 0x5b7   : > { %v3118_v4 = vsel %vm3117_vm7, %v3116_v58, 6 }
 0x5b8   : > { %4141 = vpow2.f32 %v3095_v44  ;;  %v3119_v45 = vsel %vm3090_vm6, %v3118_v4, 2147483647 }
 0x5b9   : > { %v3121_v46 = vshra.s32 %v3119_v45, 16  ;;  %v3120_v8 = vand.u32 65535, %v3119_v45 }
 0x5bb   : > { %v3123_v57 = vcvt.s32.f32 %v3121_v46  ;;  %v3122_v21 = vcvt.s32.f32 %v3120_v8 }
 0x5bd   : > { %3124 = vmin.xlane.f32.xlu0 %v3123_v57 }
 0x5c2   : > { %v4142_v61 = vpop.eup %4141 }
 0x5c3   : > { %v3097_v62 = vsel %vm3090_vm6, %v4142_v61, 0.0 }
 0x5c4   : > { %3098 = vadd.xlane.f32.xlu0 %v3097_v62 }
 0x64a   : > { %v3125_v20 = vpop.xlane.xlu0 %3124 }
 0x64b   : > { %vm3126_vm8 = vcmp.eq.f32.partialorder %v3123_v57, %v3125_v20  ;;  %v3131_v35 = vcvt.f32.s32 %v3125_v20 }
 0x64c   : > { %v3127_v63 = vsel %vm3126_vm8, %v3122_v21, inf }
 0x64d   : > { %3128 = vmin.xlane.f32.xlu1 %v3127_v63  ;;  %v3132_v56 = vshll.u32 %v3131_v35, 16 }
 0x651   : > { %v3099_v16 = vpop.xlane.xlu0 %3098 }
 0x652   : > { %4143 = vlog2.f32 %v3099_v16 }
 0x653   : > { %4145 = vrcp.f32 %v3099_v16 }
 0x65c   : > { %v4144_v28 = vpop.eup %4143 }
 0x65d   : > { %v4146_v31 = vpop.eup %4145  ;;  %v3101_v49 = vmul.f32 0.6931472, %v4144_v28 }
 0x65e   : > { %v3104_v53 = vmul.f32 %v4146_v31, %v4142_v61 }
 0x65f   : > { %v3102_v42 = vsub.f32 %v3094_v15, %v3101_v49 }
 0x661   : > { %v3105_v55 = vmul.f32 %v3104_v53, %v3102_v42 }
 0x663   : > { %v3106_v41 = vsel %vm3090_vm6, %v3105_v55, 0.0 }
 0x664   : > { %3107 = vadd.xlane.f32.xlu0 %v3106_v41 }
 0x67a   : > { %3151 = vperm.xlu0 %3988, %v3085_v23  }
 0x6da   : > { %v3129_v38 = vpop.xlane.xlu1 %3128 }
 0x6db   : > { %v3130_v60 = vcvt.f32.s32 %v3129_v38 }
 0x6dd   : > { %v3133_v0 = vadd.s32 %v3132_v56, %v3130_v60 }
 0x6df   : > { %vm3134_vm9 = vcmp.eq.s32.totalorder %v3116_v58, %v3133_v0  ;;  %v3140_v10 = vcvt.s32.f32 %v3133_v0 }
 0x6e0   : > { %v3135_v1 = vsel %vm3134_vm9, %v3102_v42, 0.0 }
 0x6e1   : > { %v3136_v3 = vsel %vm3090_vm6, %v3135_v1, 0.0  ;;  %v3141_v17 = vsel %vm3139_vm10, %v3140_v10, 0.0 }
 0x6e2   : > { %3137 = vadd.xlane.f32.xlu1 %v3136_v3 }
 0x6f1   : > { %v3108_v9 = vpop.xlane.xlu0 %3107 }
 0x6f2   : > { %v3109_v11 = vsub.f32 0.0, %v3108_v9 }
 0x6f4   : > { %v3146_v27 = vsel %vm3145_vm12, %v3109_v11, 0.0 }
 0x6f9   : > { %v3152_v25 = vpop.permute.xlu0 %3151 }
 0x6fa   : > { %v3154_v30 = vsel %vm3148_vm13, %v3152_v25, 0.0 }
 0x76f   : > { %v3138_v14 = vpop.xlane.xlu1 %3137 }
 0x770   : > { %v3143_v22 = vsel %vm3142_vm11, %v3138_v14, 0.0 }
 0x771   : > { %v3144_v26 = vadd.f32 %v3143_v22, %v3141_v17 }
 0x773   : > { %v3147_v29 = vadd.f32 %v3146_v27, %v3144_v26 }
 0x775   : > { %v3155_v32 = vadd.f32 %v3154_v30, %v3147_v29 }
 0x777   : > { %3157 = vst.msk [vmem:[%s369_s17] sm:$0x1] %vm3156_vm14, %v3155_v32 }
 0x778 PF: > { %s20_s13 = sadd.s32 1, %s4153_s13  }
 0x779   : > { %p17_p4 = scmp.ge.s32.totalorder %s20_s13, 4  }
 0x77b   :  { %19 = sbr.rel (!%p17_p4) target bundleno = 1 (0x1), region = 93 }

</bundles_post_ra>
